<compile_context>
chip_gen: v7x
topology: tpu7x:2x2x1
jax: 0.10.0
libtpu: 0.0.40
codegen_flags: <defaults>
</compile_context>

<pallas_src>
import math

import jax
import jax.numpy as jnp
from jax import lax
from jax.experimental import pallas as pl
from jax.experimental.pallas import tpu as pltpu

LANE = 128


def _rup(x, m=LANE):
    return ((x + m - 1) // m) * m


def _pick_row_tile(H, W, cp1, cp2, cmax, n):
    """Largest row tile that divides H, leaves >=2 tiles and fits a small VMEM budget."""
    budget = 8 * 1024 * 1024
    for th in (64, 32, 16, 8):
        if H % th != 0 or H // th < 2:
            continue
        r0 = th + 2 * n
        est = (r0 * W * cp1 * 2                      # x halo buffer (bf16)
               + r0 * (W + 2) * cmax * 2             # width-padded conv scratch (bf16)
               + 2 * th * W * cp2 * 4                # double-buffered output tile (f32)
               + 4 * r0 * W * max(cmax, cp2) * 4)    # in-kernel f32 temporaries (rough)
        if est <= budget:
            return th
    return H


# ----------------------------- fused ELAN_X kernel ----------------------------------

def _make_elan_x_kernel(n, TH, W, cp1, cp11, cp22, cp2, cmax, num_h):
    R0 = TH + 2 * n                                  # rows of cv1 output incl. halo

    def kernel(*refs):
        # ---- unpack refs: inputs, output, scratch ------------------------------------
        x_hbm, w1_ref, b1_ref = refs[0], refs[1], refs[2]
        pos = 3
        w3_refs, b3_refs = [], []
        for _ in range(n):
            w3_refs.append(refs[pos]); b3_refs.append(refs[pos + 1]); pos += 2
        w2a_ref = refs[pos]; pos += 1
        w2b_refs = list(refs[pos:pos + n]); pos += n
        b2_ref = refs[pos]; pos += 1
        out_ref = refs[pos]; pos += 1
        x_buf, copy_sem, pad_scr = refs[pos], refs[pos + 1], refs[pos + 2]

        b = pl.program_id(0)
        h = pl.program_id(1)
        r0 = h * TH                                   # first output row of this tile

        # ---- bring the x halo window (rows [r0, r0+TH+2n) of the H-padded x) to VMEM --
        cp = pltpu.make_async_copy(x_hbm.at[b, pl.ds(r0, R0)], x_buf, copy_sem)
        cp.start()
        # Overlap the DMA with the one-time clear of the width-padded conv scratch.
        # Boundary columns stay zero for the whole chain (never overwritten) and stale
        # interior rows/channels are never read, so one clear per grid step suffices.
        pad_scr[...] = jnp.zeros((R0, W + 2, cmax), jnp.bfloat16)
        cp.wait()
        # TODO(synk): double-buffer this halo DMA across grid steps once a megacore-safe
        # per-core priming scheme is in place (keeping it per-step keeps both grid axes
        # safely "parallel" for the 2-TensorCore v7x split).

        # ---- cv1: y0 = SiLU(x @ W1 + b1) over halo rows (bf16 matmul, f32 accumulate) --
        z0 = jnp.dot(x_buf[...].reshape(R0 * W, cp1), w1_ref[...],
                     preferred_element_type=jnp.float32) + b1_ref[...]
        y0_bf = (z0 * jax.nn.sigmoid(z0)).astype(jnp.bfloat16)       # (R0*W, cp11)

        # ---- cv2 with the channel concat fused in: streaming per-branch matmuls -------
        # y0 appears twice in the concat -> its two cv2 weight slices were pre-summed.
        acc2 = jnp.dot(y0_bf[n * W:(n + TH) * W, :], w2a_ref[...],
                       preferred_element_type=jnp.float32)

        cur_bf = y0_bf.reshape(R0, W, cp11)           # current conv input (incl. halo)
        cur_rows, cur_c = R0, cp11
        for s in range(n):
            halo_in = n - s
            out_rows = cur_rows - 2

            # write the conv input into the width-padded scratch; out-of-image halo rows
            # must then be re-zeroed (cv1/previous conv of zero-padding is not zero).
            pad_scr[0:cur_rows, 1:W + 1, 0:cur_c] = cur_bf

            @pl.when(h == 0)
            def _():
                pad_scr[0:halo_in, :, 0:cur_c] = jnp.zeros(
                    (halo_in, W + 2, cur_c), jnp.bfloat16)

            @pl.when(h == num_h - 1)
            def _():
                pad_scr[halo_in + TH:cur_rows, :, 0:cur_c] = jnp.zeros(
                    (halo_in, W + 2, cur_c), jnp.bfloat16)

            # 3x3 conv as 9 shifted matmuls; contraction dim lane-padded (K = cur_c >= 128)
            acc = None
            for ky in range(3):
                for kx in range(3):
                    patch = pad_scr[ky:ky + out_rows, kx:kx + W, 0:cur_c]
                    part = jnp.dot(patch.reshape(out_rows * W, cur_c),
                                   w3_refs[s][ky, kx],
                                   preferred_element_type=jnp.float32)
                    acc = part if acc is None else acc + part
            zt = acc + b3_refs[s][...]
            t_bf = (zt * jax.nn.sigmoid(zt)).astype(jnp.bfloat16)    # (out_rows*W, cp22)

            halo_out = halo_in - 1
            acc2 = acc2 + jnp.dot(t_bf[halo_out * W:(halo_out + TH) * W, :],
                                  w2b_refs[s][...],
                                  preferred_element_type=jnp.float32)
            cur_bf = t_bf.reshape(out_rows, W, cp22)
            cur_rows, cur_c = out_rows, cp22

        z2 = acc2 + b2_ref[...]
        out = z2 * jax.nn.sigmoid(z2)
        out_ref[...] = out.reshape(1, TH, W, cp2)

    return kernel


# ----------------------------- forward wrapper --------------------------------------

def elan_x_forward(x_nchw, kp):
    """ELAN_X forward. x: (N, C1, H, W) float32 NCHW -> (N, C2, H, W) float32 NCHW."""
    n = kp["n"]
    N, C1, H, W = x_nchw.shape
    assert C1 == kp["c1"]
    cp1, cp11, cp22, cp2 = kp["cp1"], kp["cp11"], kp["cp22"], kp["cp2"]
    cmax = max(cp11, cp22)
    TH = _pick_row_tile(H, W, cp1, cp2, cmax, n)
    num_h = H // TH

    # NCHW -> NHWC, lane-pad channels, halo-pad rows, cast to bf16 (f32 accum in-kernel)
    x = jnp.transpose(x_nchw, (0, 2, 3, 1))
    x = jnp.pad(x, ((0, 0), (n, n), (0, 0), (0, cp1 - C1))).astype(jnp.bfloat16)

    def _const_spec(arr):
        nd = arr.ndim
        return pl.BlockSpec(arr.shape, lambda *_: (0,) * nd)

    inputs = [x, kp["w1"], kp["b1"]]
    for s in range(n):
        inputs += [kp["w3"][s], kp["b3"][s]]
    inputs.append(kp["w2a"])
    inputs += list(kp["w2b"])
    inputs.append(kp["b2"])

    in_specs = [pl.BlockSpec(memory_space=pl.ANY)] + [_const_spec(a) for a in inputs[1:]]

    kernel = _make_elan_x_kernel(n, TH, W, cp1, cp11, cp22, cp2, cmax, num_h)
    out = pl.pallas_call(
        kernel,
        out_shape=jax.ShapeDtypeStruct((N, H, W, cp2), jnp.float32),
        grid_spec=pltpu.PrefetchScalarGridSpec(
            num_scalar_prefetch=0,
            grid=(N, num_h),
            in_specs=in_specs,
            out_specs=pl.BlockSpec((1, TH, W, cp2), lambda b, h: (b, h, 0, 0)),
            scratch_shapes=[
                pltpu.VMEM((TH + 2 * n, W, cp1), jnp.bfloat16),       # x halo buffer
                pltpu.SemaphoreType.DMA,                              # its DMA semaphore
                pltpu.VMEM((TH + 2 * n, W + 2, cmax), jnp.bfloat16),  # W-padded conv input
            ]),
        compiler_params=pltpu.CompilerParams(
            dimension_semantics=("parallel", "parallel"),
            vmem_limit_bytes=32 * 1024 * 1024),
    )(*inputs)

    out = out[..., :kp["c2"]]
    return jnp.transpose(out, (0, 3, 1, 2))


# ----------------------------- parameters ------------------------------------------

def make_conv_params(key, cin, cout, k):
    """Conv2d(bias=False) weight + eval-mode BatchNorm folded into (w_oihw, bias)."""
    k1, k2, k3, k4, k5 = jax.random.split(key, 5)
    w = jax.random.normal(k1, (cout, cin, k, k), jnp.float32) / math.sqrt(cin * k * k)
    gamma = 1.0 + 0.1 * jax.random.normal(k2, (cout,), jnp.float32)
    beta = 0.1 * jax.random.normal(k3, (cout,), jnp.float32)
    mean = 0.1 * jax.random.normal(k4, (cout,), jnp.float32)
    var = jnp.abs(jax.random.normal(k5, (cout,), jnp.float32)) + 0.5
    scale = gamma / jnp.sqrt(var + 1e-5)
    return w * scale[:, None, None, None], beta - mean * scale


def make_elan_x_params(key, c1, c2, n=1):
    c11, c22 = c1 // 2, c2 // 2
    ks = jax.random.split(key, 2 + n)
    return {
        "c1": c1, "c2": c2, "n": n,
        "cv1": make_conv_params(ks[0], c1, c11, 1),
        "cv2": make_conv_params(ks[1], 2 * c11 + n * c22, c2, 1),
        "m": [make_conv_params(ks[2 + i], c11 if i == 0 else c22, c22, 3)
              for i in range(n)],
    }


def prepare_kernel_params(p):
    """Hoist transposes / lane-padding / bf16 casts / y0-weight pre-sum out of the forward."""
    c1, c2, n = p["c1"], p["c2"], p["n"]
    c11, c22 = c1 // 2, c2 // 2
    cp1, cp11, cp22, cp2 = _rup(c1), _rup(c11), _rup(c22), _rup(c2)

    def pad2(w, r, c):       # (rows, cols) zero-pad + bf16
        return jnp.zeros((r, c), jnp.bfloat16).at[:w.shape[0], :w.shape[1]].set(
            w.astype(jnp.bfloat16))

    def padb(b, c):          # bias -> (1, c) f32
        return jnp.zeros((1, c), jnp.float32).at[0, :b.shape[0]].set(b)

    w1, b1 = p["cv1"]
    w1k = pad2(jnp.transpose(w1[:, :, 0, 0], (1, 0)), cp1, cp11)
    b1k = padb(b1, cp11)

    w3k, b3k = [], []
    for i, (w3, b3) in enumerate(p["m"]):
        cin = c11 if i == 0 else c22
        cpin = cp11 if i == 0 else cp22
        wt = jnp.transpose(w3, (2, 3, 1, 0))                    # (3, 3, cin, c22)
        wk = jnp.zeros((3, 3, cpin, cp22), jnp.bfloat16
                       ).at[:, :, :cin, :c22].set(wt.astype(jnp.bfloat16))
        w3k.append(wk)
        b3k.append(padb(b3, cp22))

    w2, b2 = p["cv2"]
    w2t = jnp.transpose(w2[:, :, 0, 0], (1, 0))                 # (2*c11 + n*c22, c2)
    w2a = pad2(w2t[:c11] + w2t[c11:2 * c11], cp11, cp2)         # y0 used twice -> pre-sum
    w2b = [pad2(w2t[2 * c11 + i * c22: 2 * c11 + (i + 1) * c22], cp22, cp2)
           for i in range(n)]
    b2k = padb(b2, cp2)

    return dict(n=n, c1=c1, c2=c2, c11=c11, c22=c22,
                cp1=cp1, cp11=cp11, cp22=cp22, cp2=cp2,
                w1=w1k, b1=b1k, w3=w3k, b3=b3k, w2a=w2a, w2b=w2b, b2=b2k)


# ----------------------------- pure-JAX reference -----------------------------------

def _conv_silu_ref(x_nhwc, w_oihw, b, pad):
    w_hwio = jnp.transpose(w_oihw, (2, 3, 1, 0))
    y = lax.conv_general_dilated(x_nhwc, w_hwio, (1, 1),
                                 padding=[(pad, pad), (pad, pad)],
                                 dimension_numbers=("NHWC", "HWIO", "NHWC"))
    y = y + b
    return y * jax.nn.sigmoid(y)


def elan_x_ref(x_nchw, params):
    x = jnp.transpose(x_nchw, (0, 2, 3, 1))
    y0 = _conv_silu_ref(x, *params["cv1"], pad=0)
    ys = [y0, y0]
    for (w3, b3) in params["m"]:
        ys.append(_conv_silu_ref(ys[-1], w3, b3, pad=1))
    cat = jnp.concatenate(ys, axis=-1)
    out = _conv_silu_ref(cat, *params["cv2"], pad=0)
    return jnp.transpose(out, (0, 3, 1, 2))


# ----------------------------- main --------------------------------------------------

if __name__ == "__main__":
    key = jax.random.PRNGKey(0)
    kx, kparam = jax.random.split(key)

    N, C1, H, W = 2, 4, 16, 16
    C2, n_conv = 8, 1

    x = jax.random.normal(kx, (N, C1, H, W), jnp.float32)        # NCHW like PyTorch
    params = make_elan_x_params(kparam, C1, C2, n=n_conv)
    kparams = prepare_kernel_params(params)

    out = elan_x_forward(x, kparams)
    out = jax.block_until_ready(out)

    ref = elan_x_ref(x, params)
    assert out.shape == (N, C2, H, W), out.shape
    max_err = float(jnp.max(jnp.abs(out - ref)))
    # bf16 matmul inputs vs f32 reference -> loose tolerance
    assert jnp.allclose(out, ref, rtol=5e-2, atol=5e-2), max_err

    print("KERNEL_OK")
</pallas_src>

<mosaic_0001>
module attributes {stable_mosaic.version = 11 : i64} {
  func.func @kernel(%arg0: i32, %arg1: i32, %arg2: memref<2x18x16x128xbf16, #tpu.memory_space<any>>, %arg3: memref<128x128xbf16, #tpu.memory_space<vmem>>, %arg4: memref<1x128xf32, #tpu.memory_space<vmem>>, %arg5: memref<3x3x128x128xbf16, #tpu.memory_space<vmem>>, %arg6: memref<1x128xf32, #tpu.memory_space<vmem>>, %arg7: memref<128x128xbf16, #tpu.memory_space<vmem>>, %arg8: memref<128x128xbf16, #tpu.memory_space<vmem>>, %arg9: memref<1x128xf32, #tpu.memory_space<vmem>>, %arg10: memref<1x8x16x128xf32, #tpu.memory_space<vmem>>, %arg11: memref<10x16x128xbf16, #tpu.memory_space<vmem>>, %arg12: memref<!tpu.dma_semaphore, #tpu.memory_space<semaphore_mem>>, %arg13: memref<10x18x128xbf16, #tpu.memory_space<vmem>>) attributes {dimension_semantics = [#tpu.dimension_semantics<parallel>, #tpu.dimension_semantics<parallel>], iteration_bounds = array<i64: 2, 2>, scalar_prefetch = 0 : i64, scratch_operands = 3 : i64, tpu.core_type = #tpu.core_type<tc>, window_params = [{}, {pipeline_mode = #tpu.pipeline_mode<synchronous>, transform_indices = @transform_1, window_bounds = array<i64: 128, 128>}, {pipeline_mode = #tpu.pipeline_mode<synchronous>, transform_indices = @transform_2, window_bounds = array<i64: 1, 128>}, {pipeline_mode = #tpu.pipeline_mode<synchronous>, transform_indices = @transform_3, window_bounds = array<i64: 3, 3, 128, 128>}, {pipeline_mode = #tpu.pipeline_mode<synchronous>, transform_indices = @transform_4, window_bounds = array<i64: 1, 128>}, {pipeline_mode = #tpu.pipeline_mode<synchronous>, transform_indices = @transform_5, window_bounds = array<i64: 128, 128>}, {pipeline_mode = #tpu.pipeline_mode<synchronous>, transform_indices = @transform_6, window_bounds = array<i64: 128, 128>}, {pipeline_mode = #tpu.pipeline_mode<synchronous>, transform_indices = @transform_7, window_bounds = array<i64: 1, 128>}, {transform_indices = @transform_8, window_bounds = array<i64: 1, 8, 16, 128>}]} {
    %c8_i32 = arith.constant 8 : i32
    %0 = arith.muli %arg1, %c8_i32 : i32
    %c0_i32 = arith.constant 0 : i32
    %c0_i32_0 = arith.constant 0 : i32
    %1 = tpu.memref_slice %arg2[%arg0, %0, %c0_i32, %c0_i32_0] : memref<2x18x16x128xbf16, #tpu.memory_space<any>> -> memref<1x10x16x128xbf16, #tpu.memory_space<any>>
    %2 = tpu.memref_squeeze %1 : memref<1x10x16x128xbf16, #tpu.memory_space<any>> -> memref<10x16x128xbf16, #tpu.memory_space<any>>
    tpu.enqueue_dma source(%2 : memref<10x16x128xbf16, #tpu.memory_space<any>>) target(%arg11 : memref<10x16x128xbf16, #tpu.memory_space<vmem>>) target_semaphore(%arg12 : memref<!tpu.dma_semaphore, #tpu.memory_space<semaphore_mem>>)
    %cst = arith.constant 0.000000e+00 : bf16
    %3 = vector.broadcast %cst : bf16 to vector<10x18x128xbf16>
    %c0 = arith.constant 0 : index
    %c0_1 = arith.constant 0 : index
    %c0_2 = arith.constant 0 : index
    %4 = vector.load %arg13[%c0, %c0_1, %c0_2] : memref<10x18x128xbf16, #tpu.memory_space<vmem>>, vector<10x18x128xbf16>
    tpu.vector_store %arg13[%c0, %c0_1, %c0_2], %3 {strides = array<i32>} : memref<10x18x128xbf16, #tpu.memory_space<vmem>>, vector<10x18x128xbf16>,
    %c0_i32_3 = arith.constant 0 : i32
    %c0_i32_4 = arith.constant 0 : i32
    %5 = tpu.memref_slice %arg2[%arg0, %0, %c0_i32_3, %c0_i32_4] : memref<2x18x16x128xbf16, #tpu.memory_space<any>> -> memref<1x10x16x128xbf16, #tpu.memory_space<any>>
    %6 = tpu.memref_squeeze %5 : memref<1x10x16x128xbf16, #tpu.memory_space<any>> -> memref<10x16x128xbf16, #tpu.memory_space<any>>
    tpu.wait_dma2 semaphore(%arg12 : memref<!tpu.dma_semaphore, #tpu.memory_space<semaphore_mem>>) src(%6 : memref<10x16x128xbf16, #tpu.memory_space<any>>) dst(%arg11 : memref<10x16x128xbf16, #tpu.memory_space<vmem>>)
    %c0_5 = arith.constant 0 : index
    %c0_6 = arith.constant 0 : index
    %c0_7 = arith.constant 0 : index
    %7 = vector.load %arg11[%c0_5, %c0_6, %c0_7] : memref<10x16x128xbf16, #tpu.memory_space<vmem>>, vector<10x16x128xbf16>
    %8 = vector.shape_cast %7 : vector<10x16x128xbf16> to vector<160x128xbf16>
    %c0_8 = arith.constant 0 : index
    %c0_9 = arith.constant 0 : index
    %9 = vector.load %arg3[%c0_8, %c0_9] : memref<128x128xbf16, #tpu.memory_space<vmem>>, vector<128x128xbf16>
    %cst_10 = arith.constant dense<0.000000e+00> : vector<160x128xf32>
    %10 = tpu.matmul %8, %9, %cst_10 {dimension_numbers = #tpu.dot_dimension_numbers<[1], [0], [0], [1], [0, 0, 1, 1], [], []>} : vector<160x128xbf16>, vector<128x128xbf16>, vector<160x128xf32> -> vector<160x128xf32>
    %c0_11 = arith.constant 0 : index
    %c0_12 = arith.constant 0 : index
    %11 = vector.load %arg4[%c0_11, %c0_12] : memref<1x128xf32, #tpu.memory_space<vmem>>, vector<1x128xf32>
    %12 = vector.broadcast %11 : vector<1x128xf32> to vector<160x128xf32>
    %13 = arith.addf %10, %12 : vector<160x128xf32>
    %14 = arith.negf %13 : vector<160x128xf32>
    %15 = math.exp %14 : vector<160x128xf32>
    %cst_13 = arith.constant 1.000000e+00 : f32
    %16 = vector.broadcast %cst_13 : f32 to vector<160x128xf32>
    %17 = arith.addf %16, %15 : vector<160x128xf32>
    %18 = arith.divf %16, %17 : vector<160x128xf32>
    %19 = arith.mulf %13, %18 : vector<160x128xf32>
    %20 = arith.truncf %19 : vector<160x128xf32> to vector<160x128xbf16>
    %21 = vector.extract_strided_slice %20 {offsets = [16, 0], sizes = [128, 128], strides = [1, 1]} : vector<160x128xbf16> to vector<128x128xbf16>
    %c0_14 = arith.constant 0 : index
    %c0_15 = arith.constant 0 : index
    %22 = vector.load %arg7[%c0_14, %c0_15] : memref<128x128xbf16, #tpu.memory_space<vmem>>, vector<128x128xbf16>
    %cst_16 = arith.constant dense<0.000000e+00> : vector<128x128xf32>
    %23 = tpu.matmul %21, %22, %cst_16 {dimension_numbers = #tpu.dot_dimension_numbers<[1], [0], [0], [1], [0, 0, 1, 1], [], []>} : vector<128x128xbf16>, vector<128x128xbf16>, vector<128x128xf32> -> vector<128x128xf32>
    %24 = vector.shape_cast %20 : vector<160x128xbf16> to vector<10x16x128xbf16>
    %c0_17 = arith.constant 0 : index
    %c1 = arith.constant 1 : index
    %c0_18 = arith.constant 0 : index
    %25 = vector.load %arg13[%c0_17, %c1, %c0_18] : memref<10x18x128xbf16, #tpu.memory_space<vmem>>, vector<10x16x128xbf16>
    tpu.vector_store %arg13[%c0_17, %c1, %c0_18], %24 {strides = array<i32>} : memref<10x18x128xbf16, #tpu.memory_space<vmem>>, vector<10x16x128xbf16>,
    %c0_i32_19 = arith.constant 0 : i32
    %26 = arith.cmpi eq, %arg1, %c0_i32_19 : i32
    %27 = arith.extui %26 : i1 to i32
    %c0_i32_20 = arith.constant 0 : i32
    %28 = arith.cmpi ne, %27, %c0_i32_20 : i32
    scf.if %28 {
      %cst_106 = arith.constant 0.000000e+00 : bf16
      %109 = vector.broadcast %cst_106 : bf16 to vector<1x18x128xbf16>
      %c0_107 = arith.constant 0 : index
      %c0_108 = arith.constant 0 : index
      %c0_109 = arith.constant 0 : index
      %110 = vector.load %arg13[%c0_107, %c0_108, %c0_109] : memref<10x18x128xbf16, #tpu.memory_space<vmem>>, vector<1x18x128xbf16>
      tpu.vector_store %arg13[%c0_107, %c0_108, %c0_109], %109 {strides = array<i32>} : memref<10x18x128xbf16, #tpu.memory_space<vmem>>, vector<1x18x128xbf16>,
    } else {
    }
    %c1_i32 = arith.constant 1 : i32
    %29 = arith.cmpi eq, %arg1, %c1_i32 : i32
    %30 = arith.extui %29 : i1 to i32
    %c0_i32_21 = arith.constant 0 : i32
    %31 = arith.cmpi ne, %30, %c0_i32_21 : i32
    scf.if %31 {
      %cst_106 = arith.constant 0.000000e+00 : bf16
      %109 = vector.broadcast %cst_106 : bf16 to vector<1x18x128xbf16>
      %c9 = arith.constant 9 : index
      %c0_107 = arith.constant 0 : index
      %c0_108 = arith.constant 0 : index
      %110 = vector.load %arg13[%c9, %c0_107, %c0_108] : memref<10x18x128xbf16, #tpu.memory_space<vmem>>, vector<1x18x128xbf16>
      tpu.vector_store %arg13[%c9, %c0_107, %c0_108], %109 {strides = array<i32>} : memref<10x18x128xbf16, #tpu.memory_space<vmem>>, vector<1x18x128xbf16>,
    } else {
    }
    %c0_22 = arith.constant 0 : index
    %c0_23 = arith.constant 0 : index
    %c0_24 = arith.constant 0 : index
    %32 = vector.load %arg13[%c0_22, %c0_23, %c0_24] : memref<10x18x128xbf16, #tpu.memory_space<vmem>>, vector<8x16x128xbf16>
    %33 = vector.shape_cast %32 : vector<8x16x128xbf16> to vector<128x128xbf16>
    %c0_25 = arith.constant 0 : index
    %c0_26 = arith.constant 0 : index
    %c0_27 = arith.constant 0 : index
    %c0_28 = arith.constant 0 : index
    %34 = vector.load %arg5[%c0_25, %c0_26, %c0_27, %c0_28] : memref<3x3x128x128xbf16, #tpu.memory_space<vmem>>, vector<1x1x128x128xbf16>
    %35 = vector.shape_cast %34 : vector<1x1x128x128xbf16> to vector<128x128xbf16>
    %cst_29 = arith.constant dense<0.000000e+00> : vector<128x128xf32>
    %36 = tpu.matmul %33, %35, %cst_29 {dimension_numbers = #tpu.dot_dimension_numbers<[1], [0], [0], [1], [0, 0, 1, 1], [], []>} : vector<128x128xbf16>, vector<128x128xbf16>, vector<128x128xf32> -> vector<128x128xf32>
    %c0_30 = arith.constant 0 : index
    %c1_31 = arith.constant 1 : index
    %c0_32 = arith.constant 0 : index
    %37 = vector.load %arg13[%c0_30, %c1_31, %c0_32] : memref<10x18x128xbf16, #tpu.memory_space<vmem>>, vector<8x16x128xbf16>
    %38 = vector.shape_cast %37 : vector<8x16x128xbf16> to vector<128x128xbf16>
    %c0_33 = arith.constant 0 : index
    %c1_34 = arith.constant 1 : index
    %c0_35 = arith.constant 0 : index
    %c0_36 = arith.constant 0 : index
    %39 = vector.load %arg5[%c0_33, %c1_34, %c0_35, %c0_36] : memref<3x3x128x128xbf16, #tpu.memory_space<vmem>>, vector<1x1x128x128xbf16>
    %40 = vector.shape_cast %39 : vector<1x1x128x128xbf16> to vector<128x128xbf16>
    %cst_37 = arith.constant dense<0.000000e+00> : vector<128x128xf32>
    %41 = tpu.matmul %38, %40, %cst_37 {dimension_numbers = #tpu.dot_dimension_numbers<[1], [0], [0], [1], [0, 0, 1, 1], [], []>} : vector<128x128xbf16>, vector<128x128xbf16>, vector<128x128xf32> -> vector<128x128xf32>
    %42 = arith.addf %36, %41 : vector<128x128xf32>
    %c0_38 = arith.constant 0 : index
    %c2 = arith.constant 2 : index
    %c0_39 = arith.constant 0 : index
    %43 = vector.load %arg13[%c0_38, %c2, %c0_39] : memref<10x18x128xbf16, #tpu.memory_space<vmem>>, vector<8x16x128xbf16>
    %44 = vector.shape_cast %43 : vector<8x16x128xbf16> to vector<128x128xbf16>
    %c0_40 = arith.constant 0 : index
    %c2_41 = arith.constant 2 : index
    %c0_42 = arith.constant 0 : index
    %c0_43 = arith.constant 0 : index
    %45 = vector.load %arg5[%c0_40, %c2_41, %c0_42, %c0_43] : memref<3x3x128x128xbf16, #tpu.memory_space<vmem>>, vector<1x1x128x128xbf16>
    %46 = vector.shape_cast %45 : vector<1x1x128x128xbf16> to vector<128x128xbf16>
    %cst_44 = arith.constant dense<0.000000e+00> : vector<128x128xf32>
    %47 = tpu.matmul %44, %46, %cst_44 {dimension_numbers = #tpu.dot_dimension_numbers<[1], [0], [0], [1], [0, 0, 1, 1], [], []>} : vector<128x128xbf16>, vector<128x128xbf16>, vector<128x128xf32> -> vector<128x128xf32>
    %48 = arith.addf %42, %47 : vector<128x128xf32>
    %c1_45 = arith.constant 1 : index
    %c0_46 = arith.constant 0 : index
    %c0_47 = arith.constant 0 : index
    %49 = vector.load %arg13[%c1_45, %c0_46, %c0_47] : memref<10x18x128xbf16, #tpu.memory_space<vmem>>, vector<8x16x128xbf16>
    %50 = vector.shape_cast %49 : vector<8x16x128xbf16> to vector<128x128xbf16>
    %c1_48 = arith.constant 1 : index
    %c0_49 = arith.constant 0 : index
    %c0_50 = arith.constant 0 : index
    %c0_51 = arith.constant 0 : index
    %51 = vector.load %arg5[%c1_48, %c0_49, %c0_50, %c0_51] : memref<3x3x128x128xbf16, #tpu.memory_space<vmem>>, vector<1x1x128x128xbf16>
    %52 = vector.shape_cast %51 : vector<1x1x128x128xbf16> to vector<128x128xbf16>
    %cst_52 = arith.constant dense<0.000000e+00> : vector<128x128xf32>
    %53 = tpu.matmul %50, %52, %cst_52 {dimension_numbers = #tpu.dot_dimension_numbers<[1], [0], [0], [1], [0, 0, 1, 1], [], []>} : vector<128x128xbf16>, vector<128x128xbf16>, vector<128x128xf32> -> vector<128x128xf32>
    %54 = arith.addf %48, %53 : vector<128x128xf32>
    %c1_53 = arith.constant 1 : index
    %c1_54 = arith.constant 1 : index
    %c0_55 = arith.constant 0 : index
    %55 = vector.load %arg13[%c1_53, %c1_54, %c0_55] : memref<10x18x128xbf16, #tpu.memory_space<vmem>>, vector<8x16x128xbf16>
    %56 = vector.shape_cast %55 : vector<8x16x128xbf16> to vector<128x128xbf16>
    %c1_56 = arith.constant 1 : index
    %c1_57 = arith.constant 1 : index
    %c0_58 = arith.constant 0 : index
    %c0_59 = arith.constant 0 : index
    %57 = vector.load %arg5[%c1_56, %c1_57, %c0_58, %c0_59] : memref<3x3x128x128xbf16, #tpu.memory_space<vmem>>, vector<1x1x128x128xbf16>
    %58 = vector.shape_cast %57 : vector<1x1x128x128xbf16> to vector<128x128xbf16>
    %cst_60 = arith.constant dense<0.000000e+00> : vector<128x128xf32>
    %59 = tpu.matmul %56, %58, %cst_60 {dimension_numbers = #tpu.dot_dimension_numbers<[1], [0], [0], [1], [0, 0, 1, 1], [], []>} : vector<128x128xbf16>, vector<128x128xbf16>, vector<128x128xf32> -> vector<128x128xf32>
    %60 = arith.addf %54, %59 : vector<128x128xf32>
    %c1_61 = arith.constant 1 : index
    %c2_62 = arith.constant 2 : index
    %c0_63 = arith.constant 0 : index
    %61 = vector.load %arg13[%c1_61, %c2_62, %c0_63] : memref<10x18x128xbf16, #tpu.memory_space<vmem>>, vector<8x16x128xbf16>
    %62 = vector.shape_cast %61 : vector<8x16x128xbf16> to vector<128x128xbf16>
    %c1_64 = arith.constant 1 : index
    %c2_65 = arith.constant 2 : index
    %c0_66 = arith.constant 0 : index
    %c0_67 = arith.constant 0 : index
    %63 = vector.load %arg5[%c1_64, %c2_65, %c0_66, %c0_67] : memref<3x3x128x128xbf16, #tpu.memory_space<vmem>>, vector<1x1x128x128xbf16>
    %64 = vector.shape_cast %63 : vector<1x1x128x128xbf16> to vector<128x128xbf16>
    %cst_68 = arith.constant dense<0.000000e+00> : vector<128x128xf32>
    %65 = tpu.matmul %62, %64, %cst_68 {dimension_numbers = #tpu.dot_dimension_numbers<[1], [0], [0], [1], [0, 0, 1, 1], [], []>} : vector<128x128xbf16>, vector<128x128xbf16>, vector<128x128xf32> -> vector<128x128xf32>
    %66 = arith.addf %60, %65 : vector<128x128xf32>
    %c2_69 = arith.constant 2 : index
    %c0_70 = arith.constant 0 : index
    %c0_71 = arith.constant 0 : index
    %67 = vector.load %arg13[%c2_69, %c0_70, %c0_71] : memref<10x18x128xbf16, #tpu.memory_space<vmem>>, vector<8x16x128xbf16>
    %68 = vector.shape_cast %67 : vector<8x16x128xbf16> to vector<128x128xbf16>
    %c2_72 = arith.constant 2 : index
    %c0_73 = arith.constant 0 : index
    %c0_74 = arith.constant 0 : index
    %c0_75 = arith.constant 0 : index
    %69 = vector.load %arg5[%c2_72, %c0_73, %c0_74, %c0_75] : memref<3x3x128x128xbf16, #tpu.memory_space<vmem>>, vector<1x1x128x128xbf16>
    %70 = vector.shape_cast %69 : vector<1x1x128x128xbf16> to vector<128x128xbf16>
    %cst_76 = arith.constant dense<0.000000e+00> : vector<128x128xf32>
    %71 = tpu.matmul %68, %70, %cst_76 {dimension_numbers = #tpu.dot_dimension_numbers<[1], [0], [0], [1], [0, 0, 1, 1], [], []>} : vector<128x128xbf16>, vector<128x128xbf16>, vector<128x128xf32> -> vector<128x128xf32>
    %72 = arith.addf %66, %71 : vector<128x128xf32>
    %c2_77 = arith.constant 2 : index
    %c1_78 = arith.constant 1 : index
    %c0_79 = arith.constant 0 : index
    %73 = vector.load %arg13[%c2_77, %c1_78, %c0_79] : memref<10x18x128xbf16, #tpu.memory_space<vmem>>, vector<8x16x128xbf16>
    %74 = vector.shape_cast %73 : vector<8x16x128xbf16> to vector<128x128xbf16>
    %c2_80 = arith.constant 2 : index
    %c1_81 = arith.constant 1 : index
    %c0_82 = arith.constant 0 : index
    %c0_83 = arith.constant 0 : index
    %75 = vector.load %arg5[%c2_80, %c1_81, %c0_82, %c0_83] : memref<3x3x128x128xbf16, #tpu.memory_space<vmem>>, vector<1x1x128x128xbf16>
    %76 = vector.shape_cast %75 : vector<1x1x128x128xbf16> to vector<128x128xbf16>
    %cst_84 = arith.constant dense<0.000000e+00> : vector<128x128xf32>
    %77 = tpu.matmul %74, %76, %cst_84 {dimension_numbers = #tpu.dot_dimension_numbers<[1], [0], [0], [1], [0, 0, 1, 1], [], []>} : vector<128x128xbf16>, vector<128x128xbf16>, vector<128x128xf32> -> vector<128x128xf32>
    %78 = arith.addf %72, %77 : vector<128x128xf32>
    %c2_85 = arith.constant 2 : index
    %c2_86 = arith.constant 2 : index
    %c0_87 = arith.constant 0 : index
    %79 = vector.load %arg13[%c2_85, %c2_86, %c0_87] : memref<10x18x128xbf16, #tpu.memory_space<vmem>>, vector<8x16x128xbf16>
    %80 = vector.shape_cast %79 : vector<8x16x128xbf16> to vector<128x128xbf16>
    %c2_88 = arith.constant 2 : index
    %c2_89 = arith.constant 2 : index
    %c0_90 = arith.constant 0 : index
    %c0_91 = arith.constant 0 : index
    %81 = vector.load %arg5[%c2_88, %c2_89, %c0_90, %c0_91] : memref<3x3x128x128xbf16, #tpu.memory_space<vmem>>, vector<1x1x128x128xbf16>
    %82 = vector.shape_cast %81 : vector<1x1x128x128xbf16> to vector<128x128xbf16>
    %cst_92 = arith.constant dense<0.000000e+00> : vector<128x128xf32>
    %83 = tpu.matmul %80, %82, %cst_92 {dimension_numbers = #tpu.dot_dimension_numbers<[1], [0], [0], [1], [0, 0, 1, 1], [], []>} : vector<128x128xbf16>, vector<128x128xbf16>, vector<128x128xf32> -> vector<128x128xf32>
    %84 = arith.addf %78, %83 : vector<128x128xf32>
    %c0_93 = arith.constant 0 : index
    %c0_94 = arith.constant 0 : index
    %85 = vector.load %arg6[%c0_93, %c0_94] : memref<1x128xf32, #tpu.memory_space<vmem>>, vector<1x128xf32>
    %86 = vector.broadcast %85 : vector<1x128xf32> to vector<128x128xf32>
    %87 = arith.addf %84, %86 : vector<128x128xf32>
    %88 = arith.negf %87 : vector<128x128xf32>
    %89 = math.exp %88 : vector<128x128xf32>
    %cst_95 = arith.constant 1.000000e+00 : f32
    %90 = vector.broadcast %cst_95 : f32 to vector<128x128xf32>
    %91 = arith.addf %90, %89 : vector<128x128xf32>
    %92 = arith.divf %90, %91 : vector<128x128xf32>
    %93 = arith.mulf %87, %92 : vector<128x128xf32>
    %94 = arith.truncf %93 : vector<128x128xf32> to vector<128x128xbf16>
    %c0_96 = arith.constant 0 : index
    %c0_97 = arith.constant 0 : index
    %95 = vector.load %arg8[%c0_96, %c0_97] : memref<128x128xbf16, #tpu.memory_space<vmem>>, vector<128x128xbf16>
    %cst_98 = arith.constant dense<0.000000e+00> : vector<128x128xf32>
    %96 = tpu.matmul %94, %95, %cst_98 {dimension_numbers = #tpu.dot_dimension_numbers<[1], [0], [0], [1], [0, 0, 1, 1], [], []>} : vector<128x128xbf16>, vector<128x128xbf16>, vector<128x128xf32> -> vector<128x128xf32>
    %97 = arith.addf %23, %96 : vector<128x128xf32>
    %c0_99 = arith.constant 0 : index
    %c0_100 = arith.constant 0 : index
    %98 = vector.load %arg9[%c0_99, %c0_100] : memref<1x128xf32, #tpu.memory_space<vmem>>, vector<1x128xf32>
    %99 = vector.broadcast %98 : vector<1x128xf32> to vector<128x128xf32>
    %100 = arith.addf %97, %99 : vector<128x128xf32>
    %101 = arith.negf %100 : vector<128x128xf32>
    %102 = math.exp %101 : vector<128x128xf32>
    %cst_101 = arith.constant 1.000000e+00 : f32
    %103 = vector.broadcast %cst_101 : f32 to vector<128x128xf32>
    %104 = arith.addf %103, %102 : vector<128x128xf32>
    %105 = arith.divf %103, %104 : vector<128x128xf32>
    %106 = arith.mulf %100, %105 : vector<128x128xf32>
    %107 = vector.shape_cast %106 : vector<128x128xf32> to vector<1x8x16x128xf32>
    %c0_102 = arith.constant 0 : index
    %c0_103 = arith.constant 0 : index
    %c0_104 = arith.constant 0 : index
    %c0_105 = arith.constant 0 : index
    %108 = vector.load %arg10[%c0_102, %c0_103, %c0_104, %c0_105] : memref<1x8x16x128xf32, #tpu.memory_space<vmem>>, vector<1x8x16x128xf32>
    tpu.vector_store %arg10[%c0_102, %c0_103, %c0_104, %c0_105], %107 {strides = array<i32>} : memref<1x8x16x128xf32, #tpu.memory_space<vmem>>, vector<1x8x16x128xf32>,
    return
  }
  func.func @transform_1(%arg0: i32, %arg1: i32) -> (i32, i32) {
    %c0_i32 = arith.constant 0 : i32
    %c0_i32_0 = arith.constant 0 : i32
    %c0_i32_1 = arith.constant 0 : i32
    return %c0_i32, %c0_i32_0 : i32, i32
  }
  func.func @transform_2(%arg0: i32, %arg1: i32) -> (i32, i32) {
    %c0_i32 = arith.constant 0 : i32
    %c0_i32_0 = arith.constant 0 : i32
    %c0_i32_1 = arith.constant 0 : i32
    return %c0_i32, %c0_i32_0 : i32, i32
  }
  func.func @transform_3(%arg0: i32, %arg1: i32) -> (i32, i32, i32, i32) {
    %c0_i32 = arith.constant 0 : i32
    %c0_i32_0 = arith.constant 0 : i32
    %c0_i32_1 = arith.constant 0 : i32
    %c0_i32_2 = arith.constant 0 : i32
    %c0_i32_3 = arith.constant 0 : i32
    return %c0_i32, %c0_i32_0, %c0_i32_1, %c0_i32_2 : i32, i32, i32, i32
  }
  func.func @transform_4(%arg0: i32, %arg1: i32) -> (i32, i32) {
    %c0_i32 = arith.constant 0 : i32
    %c0_i32_0 = arith.constant 0 : i32
    %c0_i32_1 = arith.constant 0 : i32
    return %c0_i32, %c0_i32_0 : i32, i32
  }
  func.func @transform_5(%arg0: i32, %arg1: i32) -> (i32, i32) {
    %c0_i32 = arith.constant 0 : i32
    %c0_i32_0 = arith.constant 0 : i32
    %c0_i32_1 = arith.constant 0 : i32
    return %c0_i32, %c0_i32_0 : i32, i32
  }
  func.func @transform_6(%arg0: i32, %arg1: i32) -> (i32, i32) {
    %c0_i32 = arith.constant 0 : i32
    %c0_i32_0 = arith.constant 0 : i32
    %c0_i32_1 = arith.constant 0 : i32
    return %c0_i32, %c0_i32_0 : i32, i32
  }
  func.func @transform_7(%arg0: i32, %arg1: i32) -> (i32, i32) {
    %c0_i32 = arith.constant 0 : i32
    %c0_i32_0 = arith.constant 0 : i32
    %c0_i32_1 = arith.constant 0 : i32
    return %c0_i32, %c0_i32_0 : i32, i32
  }
  func.func @transform_8(%arg0: i32, %arg1: i32) -> (i32, i32, i32, i32) {
    %c0_i32 = arith.constant 0 : i32
    %c0_i32_0 = arith.constant 0 : i32
    %c0_i32_1 = arith.constant 0 : i32
    return %arg0, %arg1, %c0_i32, %c0_i32_0 : i32, i32, i32, i32
  }
}

</mosaic_0001>

<bundles_post_ra>
// kernel: tpu_custom_call.1
= control target key start
LH: loop header
LB: loop body
LE: loop exit
PB: predicated region body
PF: predicated region fallthrough
CT: control target
= control target key end

     0   :  { %13 = vsyncpa [#allocation6], 0  ;;  %s7888_s0 = inlined_call_operand.hbm [shape: bf16[2,18,16,128], index: 0, kind: input, shape index: {}]   ;;  %s7889_s1 = inlined_call_operand.hbm [shape: bf16[128,128], index: 1, kind: input, shape index: {}]   ;;  %s7890_s2 = inlined_call_operand.vmem [shape: f32[1,128], index: 2, kind: input, shape index: {}]   ;;  %s7891_s3 = inlined_call_operand.hbm [shape: bf16[3,3,128,128], index: 3, kind: input, shape index: {}]   ;;  %s7892_s4 = inlined_call_operand.vmem [shape: f32[1,128], index: 4, kind: input, shape index: {}]   ;;  %s7893_s5 = inlined_call_operand.hbm [shape: bf16[128,128], index: 5, kind: input, shape index: {}]   ;;  %s7894_s6 = inlined_call_operand.hbm [shape: bf16[128,128], index: 6, kind: input, shape index: {}]   ;;  %s7895_s7 = inlined_call_operand.vmem [shape: f32[1,128], index: 7, kind: input, shape index: {}]   ;;  %s7896_s8 = inlined_call_operand.hbm [shape: f32[2,16,16,128], index: 8, kind: output, shape index: {}]  }
   0x1   :  { %14 = vsyncpa [#allocation9], 0 }
   0x2   :  { %15 = vsyncpa [#allocation12], 0 }
   0x3   :  { %16 = vsyncpa [#allocation7], 0 }
   0x4   :  { %18 = vsyncpa [#allocation7 + $0x1], 0  ;;  %s6458_s27 = smov 0   ;;  %s6460_s28 = smov 0  }
   0x5   :  { %s6462_s29 = smov 0   ;;  %s6464_s30 = smov 0  }
   0x6   :  { %s6466_s9 = smov 0   ;;  %s6468_s10 = smov 0  }
   0x7   :  { %s6470_s11 = smov 0   ;;  %s6472_s12 = smov 0  }
   0x8 LB: > { %7929 = sst [smem:[#allocation23_spill]] %s6370_s27  ;;  %s4670_s13 = sadd.s32 4294967295, %s6398_s12   ;;  %s6398_s12 = sphi %s6472_s12, %s24_s12   ;;  %s6394_s11 = sphi %s6470_s11, %s8045_s11   ;;  %s6390_s10 = sphi %s6468_s10, %s8044_s10   ;;  %s6386_s9 = sphi %s6466_s9, %s8043_s9   ;;  %s6382_s30 = sphi %s6464_s30, %s8042_s30   ;;  %s6378_s29 = sphi %s6462_s29, %s8041_s29   ;;  %s6374_s28 = sphi %s6460_s28, %s8047_s28   ;;  %s6370_s27 = sphi %s6458_s27, %s8046_s27  }
   0x9   : > { %7930 = sst [smem:[#allocation24_spill]] %s6378_s29  ;;  %s4671_s14 = sadd.s32 4294967294, %s6398_s12  }
   0xa   : > { %7931 = sst [smem:[#allocation25_spill]] %s6390_s10  ;;  %s33_s15 = sadd.s32 1, %s6390_s10 }
   0xb   : > { %7932 = sst [smem:[#allocation26_spill]] %s6394_s11  ;;  %s36_s16 = sadd.s32 1, %s6394_s11 }
   0xc   : > { %7933 = sst [smem:[#allocation27_spill]] %s6398_s12  ;;  %p34_p0 = scmp.ge.s32.totalorder %s33_s15, 2 }
   0xd   : > { %s192_s17 = sadd.s32 1, %s6378_s29  ;;  %p202_p1 = scmp.ne.s32.totalorder %s6378_s29, %s6374_s28 }
   0xe   : > { %p203_p2 = scmp.eq.s32.totalorder %s4670_s13, 3  ;;  %s8049_s15 = smov (%p34_p0, %s33_s15), 0 }
   0xf   : > { %7934 = sst [smem:[#allocation28_spill]] %s8049_s15  ;;  %s8051_s16 = smov (!%p34_p0, %s36_s16), %s6394_s11 }
  0x10   : > { %s188_s18 = ssub.s32 %s6390_s10, %s8049_s15  ;;  %p6510_p3 = por %p203_p2, %p202_p1 }
  0x11   : > { %p38_p4 = scmp.ge.s32.totalorder %s8051_s16, 2  ;;  %p208_p5 = scmp.ne.s32.totalorder %s6374_s28, %s6370_s27 }
  0x12   : > { %s7935_s19 = scalar_select %p6510_p3, 1, 0 }
  0x13   : > { %p209_p6 = scmp.eq.s32.totalorder %s4671_s14, 3  ;;  %p4672_p7 = scmp.ge.s32.totalorder %s6398_s12, 1 }
  0x14   : > { %s8053_s16 = smov (%p38_p4, %s8051_s16), 0  ;;  %p216_p9 = scmp.lt.s32.totalorder %s6398_s12, 5 }
  0x15   : > { %7936 = sst [smem:[#allocation29_spill]] %s8053_s16  ;;  %p6519_p8 = por %p209_p6, %p208_p5 }
  0x16   : > { %s187_s21 = ssub.s32 %s6394_s11, %s8053_s16  ;;  %p6526_p10 = pnand %p4672_p7, %p216_p9 }
  0x17   : > { %s7937_s20 = scalar_select %p6519_p8, 1, 0 }
  0x18   : > { %s189_s22 = sor.u32 %s188_s18, %s187_s21  ;;  %p6530_p12 = scmp.eq.s32.totalorder %s4670_s13, 0 }
  0x19   : > { %7938 = sst [smem:[#allocation30_spill]] %s7937_s20  ;;  %p190_p11 = scmp.eq.s32.totalorder %s189_s22, 0 }
  0x1a   : > { %s7939_s23 = scalar_select %p6526_p10, 1, 0 }
  0x1b   : > { %s7940_s24 = scalar_select %p6530_p12, 1, 0 }
  0x1c   : > { %p5729_p13 = pneg %p6526_p10  ;;  %s6400_s14 = smov [#allocation8]  }
  0x1d   : > { %s6537_s25 = scalar_select %p190_p11, %s6378_s29, %s192_s17  }
  0x1e   : > { %p6541_p0 = pnand %p6530_p12, %p5729_p13  ;;  %s244_s18 = sshll.u32 %s6400_s14, 4  ;;  %s245_s18 = int_to_ptr.vmem [resolvable:$true] %s244_s18 }
  0x1f   : > { %7941 = sst [smem:[#allocation31_spill]] %s6537_s25  ;;  %s6154_s13 = scalar_lea.hbm %s7891_s3, 9216 }
  0x20   : > { %p6155_p1 = scmp.ne.s32.totalorder %s7891_s3, %s6154_s13  ;;  %p6553_p2 = pneg %p6541_p0 }
  0x21   : > { %p6161_p6 = scmp.lt.u32.totalorder %s6154_s13, %s7891_s3 }
  0x22   : > { %p6157_p4 = pnand %p6553_p2, %p6155_p1 }
  0x24   : > { %p6158_p5 = pneg %p6157_p4 }
  0x26   : > { %p6163_p7 = pnand %p6161_p6, %p6158_p5 }
  0x28   : > { %6166 = shalt.err (!%p6163_p7)
}
  0x29   : > { %s6167_s21 = scalar_lea.vmem %s245_s18, 9216  ;;  %p6175_p8 = scmp.lt.s32.totalorder %s245_s18, %s245_s18 }
  0x2a   : > { %p6168_p9 = scmp.ne.s32.totalorder %s245_s18, %s6167_s21  ;;  %p6176_p3 = scmp.lt.s32.totalorder %s6167_s21, %s6167_s21 }
  0x2c   : > { %p6170_p11 = pnand %p6168_p9, %p6553_p2  ;;  %p6177_p12 = por %p6176_p3, %p6175_p8 }
  0x2e   : > { %p6171_p13 = pneg %p6170_p11 }
  0x30   : > { %p6178_p10 = pnand %p6177_p12, %p6171_p13 }
  0x32   : > { %6181 = shalt.err (!%p6178_p10)
}
  0x33   : > { %s6401_s15 = smov 64   ;;  %s6402_s16 = smov 4  }
  0x34   : > { %5735 = dma.hbm_to_vmem [thread:$0]  (!%p6541_p0), %s7891_s3, 9216, %s245_s18, [#allocation9], %s6401_s15, %s6401_s15, %s6402_s16  }
  0x35   : > { %s6403_s13 = smov [#allocation5]   ;;  %s6404_s10 = smov [#allocation10]  }
  0x36   : > { %s228_s14 = sshll.u32 %s6403_s13, 4  ;;  %s260_s25 = sshll.u32 %s6404_s10, 4  ;;  %s229_s14 = int_to_ptr.vmem [resolvable:$true] %s228_s14  ;;  %s6572_s25 = int_to_ptr.vmem [resolvable:$true] %s260_s25 }
  0x37   : > { %s6182_s20 = scalar_lea.hbm %s7889_s1, 1024 }
  0x38   : > { %p6183_p3 = scmp.ne.s32.totalorder %s7889_s1, %s6182_s20  ;;  %p6189_p12 = scmp.lt.u32.totalorder %s6182_s20, %s7889_s1 }
  0x3a   : > { %p6185_p8 = pnand %p6183_p3, %p6553_p2 }
  0x3c   : > { %p6186_p10 = pneg %p6185_p8 }
  0x3e   : > { %p6191_p1 = pnand %p6189_p12, %p6186_p10 }
  0x40   : > { %6194 = shalt.err (!%p6191_p1)
}
  0x41   : > { %s6195_s10 = scalar_lea.vmem %s229_s14, 1024  ;;  %p6203_p7 = scmp.lt.s32.totalorder %s229_s14, %s229_s14 }
  0x42   : > { %p6196_p4 = scmp.ne.s32.totalorder %s229_s14, %s6195_s10  ;;  %p6204_p9 = scmp.lt.s32.totalorder %s6195_s10, %s6195_s10 }
  0x44   : > { %p6198_p5 = pnand %p6196_p4, %p6553_p2  ;;  %p6205_p11 = por %p6204_p9, %p6203_p7 }
  0x46   : > { %p6199_p6 = pneg %p6198_p5 }
  0x48   : > { %p6206_p13 = pnand %p6205_p11, %p6199_p6 }
  0x4a   : > { %6209 = shalt.err (!%p6206_p13)
}
  0x4b   : > { %5732 = dma.hbm_to_vmem [thread:$0]  (!%p6541_p0), %s7889_s1, 1024, %s229_s14, [#allocation6], %s6401_s15, %s6401_s15, %s6402_s16  }
  0x4c   : > { %s6210_s22 = scalar_lea.hbm %s7893_s5, 1024 }
  0x4d   : > { %p6211_p3 = scmp.ne.s32.totalorder %s7893_s5, %s6210_s22  ;;  %p6217_p12 = scmp.lt.u32.totalorder %s6210_s22, %s7893_s5 }
  0x4f   : > { %p6213_p8 = pnand %p6211_p3, %p6553_p2 }
  0x51   : > { %p6214_p10 = pneg %p6213_p8 }
  0x53   : > { %p6219_p1 = pnand %p6217_p12, %p6214_p10 }
  0x55   : > { %6222 = shalt.err (!%p6219_p1)
}
  0x56   : > { %s6223_s14 = scalar_lea.vmem %s6572_s25, 1024  ;;  %p6231_p7 = scmp.lt.s32.totalorder %s6572_s25, %s6572_s25 }
  0x57   : > { %p6224_p4 = scmp.ne.s32.totalorder %s6572_s25, %s6223_s14  ;;  %p6232_p9 = scmp.lt.s32.totalorder %s6223_s14, %s6223_s14 }
  0x59   : > { %p6226_p5 = pnand %p6224_p4, %p6553_p2  ;;  %p6233_p11 = por %p6232_p9, %p6231_p7 }
  0x5b   : > { %p6227_p6 = pneg %p6226_p5 }
  0x5d   : > { %p6234_p13 = pnand %p6233_p11, %p6227_p6 }
  0x5f   : > { %6237 = shalt.err (!%p6234_p13)
}
  0x60   : > { %5738 = dma.hbm_to_vmem [thread:$0]  (!%p6541_p0), %s7893_s5, 1024, %s6572_s25, [#allocation9], %s6401_s15, %s6401_s15, %s6402_s16  }
  0x61   : > { %s6405_s29 = smov [#allocation11]   ;;  %s6238_s13 = scalar_lea.hbm %s7894_s6, 1024 }
  0x62   : > { %s273_s12 = sshll.u32 %s6405_s29, 4  ;;  %p6239_p3 = scmp.ne.s32.totalorder %s7894_s6, %s6238_s13  ;;  %s274_s12 = int_to_ptr.vmem [resolvable:$true] %s273_s12 }
  0x63   : > { %p6245_p12 = scmp.lt.u32.totalorder %s6238_s13, %s7894_s6 }
  0x64   : > { %p6241_p8 = pnand %p6239_p3, %p6553_p2 }
  0x66   : > { %p6242_p10 = pneg %p6241_p8 }
  0x68   : > { %p6247_p1 = pnand %p6245_p12, %p6242_p10 }
  0x6a   : > { %6250 = shalt.err (!%p6247_p1)
}
  0x6b   : > { %s6251_s25 = scalar_lea.vmem %s274_s12, 1024  ;;  %p6259_p7 = scmp.lt.s32.totalorder %s274_s12, %s274_s12 }
  0x6c   : > { %p6252_p4 = scmp.ne.s32.totalorder %s274_s12, %s6251_s25  ;;  %p6260_p9 = scmp.lt.s32.totalorder %s6251_s25, %s6251_s25 }
  0x6e   : > { %p6254_p5 = pnand %p6252_p4, %p6553_p2  ;;  %p6261_p11 = por %p6260_p9, %p6259_p7 }
  0x70   : > { %p6255_p6 = pneg %p6254_p5 }
  0x72   : > { %p6262_p13 = pnand %p6261_p11, %p6255_p6 }
  0x74   : > { %6265 = shalt.err (!%p6262_p13)
}
  0x75   : > { %5741 = dma.hbm_to_vmem [thread:$0]  (!%p6541_p0), %s7894_s6, 1024, %s274_s12, [#allocation12], %s6401_s15, %s6401_s15, %s6402_s16  }
  0x76   : > { %p7944_p3 = scmp.ne.s32.totalorder %s7939_s23, 0 }
  0x78   : > { %292 = sbr.rel (%p7944_p3) target bundleno = 1298 (0x512), region = 48 }
  0x7f   : > { %p7945_p2 = scmp.ne.s32.totalorder %s7940_s24, 0 }
  0x81   : > { %6351 = dma.done.wait (%p7945_p2), [#allocation6], 1024  }
  0x82   : > { %6353 = vsyncadd (%p7945_p2), [#allocation6], 4294966272 }
  0x83   : > { %6355 = dma.done.wait (%p7945_p2), [#allocation9], 10240  }
  0x84   : > { %6357 = vsyncadd (%p7945_p2), [#allocation9], 4294957056 }
  0x85   : > { %6359 = dma.done.wait (%p7945_p2), [#allocation12], 1024  }
  0x86   : > { %6361 = vsyncadd (%p7945_p2), [#allocation12], 4294966272  ;;  %s328_s23 = sand.u32 1, %s6374_s28   ;;  %s4963_s26 = sshll.u32 %s6382_s30, 4  ;;  %v6406_v0 = vmov 0  }
  0x87   : > { %s6660_s17 = sshll.u32 %s328_s23, 7  ;;  %s335_s15 = smul.u32 36, %s6386_s9  ;;  %350 = vst [vmem:[#allocation4] sm:$0xf] %v6406_v0  ;;  %351 = vst [vmem:[#allocation4 + $0x4] sm:$0xf] %v6406_v0 }
  0x88   : > { %352 = vst [vmem:[#allocation4 + $0x8] sm:$0x1] %v6406_v0  ;;  %353 = vst [vmem:[#allocation4 + $0xc] sm:$0xf] %v6406_v0  ;;  %s6407_s16 = smov [#allocation2]   ;;  %s6268_s14 = scalar_lea.hbm %s7888_s0, 4608 }
  0x89   : > { %354 = vst [vmem:[#allocation4 + $0x10] sm:$0xf] %v6406_v0  ;;  %355 = vst [vmem:[#allocation4 + $0x14] sm:$0x1] %v6406_v0  ;;  %s336_s24 = sadd.s32 %s4963_s26, %s335_s15  ;;  %s346_s29 = sshll.u32 %s6407_s16, 4  ;;  %s347_s29 = int_to_ptr.vmem [resolvable:$true] %s346_s29 }
  0x8a   : > { %356 = vst [vmem:[#allocation4 + $0x18] sm:$0xf] %v6406_v0  ;;  %357 = vst [vmem:[#allocation4 + $0x1c] sm:$0xf] %v6406_v0  ;;  %s4685_s12 = sshll.u32 %s336_s24, 6 }
  0x8b   : > { %358 = vst [vmem:[#allocation4 + $0x20] sm:$0x1] %v6406_v0  ;;  %359 = vst [vmem:[#allocation4 + $0x24] sm:$0xf] %v6406_v0  ;;  %s338_s13 = scalar_lea.hbm %s7888_s0, %s4685_s12 }
  0x8c   : > { %360 = vst [vmem:[#allocation4 + $0x28] sm:$0xf] %v6406_v0  ;;  %361 = vst [vmem:[#allocation4 + $0x2c] sm:$0x1] %v6406_v0  ;;  %s6266_s21 = scalar_lea.hbm %s338_s13, 1280  ;;  %p6269_p8 = scmp.lt.u32.totalorder %s338_s13, %s7888_s0 }
  0x8d   : > { %362 = vst [vmem:[#allocation4 + $0x30] sm:$0xf] %v6406_v0  ;;  %363 = vst [vmem:[#allocation4 + $0x34] sm:$0xf] %v6406_v0  ;;  %p6267_p0 = scmp.ne.s32.totalorder %s338_s13, %s6266_s21  ;;  %p6270_p10 = scmp.lt.u32.totalorder %s6268_s14, %s6266_s21 }
  0x8e   : > { %364 = vst [vmem:[#allocation4 + $0x38] sm:$0x1] %v6406_v0  ;;  %365 = vst [vmem:[#allocation4 + $0x3c] sm:$0xf] %v6406_v0  ;;  %p6272_p1 = scmp.lt.u32.totalorder %s6266_s21, %s338_s13 }
  0x8f   : > { %366 = vst [vmem:[#allocation4 + $0x40] sm:$0xf] %v6406_v0  ;;  %367 = vst [vmem:[#allocation4 + $0x44] sm:$0x1] %v6406_v0  ;;  %p6271_p12 = por %p6270_p10, %p6269_p8 }
  0x90   : > { %368 = vst [vmem:[#allocation4 + $0x48] sm:$0xf] %v6406_v0  ;;  %369 = vst [vmem:[#allocation4 + $0x4c] sm:$0xf] %v6406_v0 }
  0x91   : > { %370 = vst [vmem:[#allocation4 + $0x50] sm:$0x1] %v6406_v0  ;;  %371 = vst [vmem:[#allocation4 + $0x54] sm:$0xf] %v6406_v0  ;;  %p6273_p4 = por %p6272_p1, %p6271_p12 }
  0x92   : > { %372 = vst [vmem:[#allocation4 + $0x58] sm:$0xf] %v6406_v0  ;;  %373 = vst [vmem:[#allocation4 + $0x5c] sm:$0x1] %v6406_v0 }
  0x93   : > { %374 = vst [vmem:[#allocation4 + $0x60] sm:$0xf] %v6406_v0  ;;  %375 = vst [vmem:[#allocation4 + $0x64] sm:$0xf] %v6406_v0  ;;  %p6274_p5 = pnand %p6273_p4, %p6267_p0 }
  0x94   : > { %376 = vst [vmem:[#allocation4 + $0x68] sm:$0x1] %v6406_v0  ;;  %377 = vst [vmem:[#allocation4 + $0x6c] sm:$0xf] %v6406_v0 }
  0x95   : > { %378 = vst [vmem:[#allocation4 + $0x70] sm:$0xf] %v6406_v0  ;;  %379 = vst [vmem:[#allocation4 + $0x74] sm:$0x1] %v6406_v0 }
  0x96   : > { %6277 = shalt.err (!%p6274_p5)  }
  0x97   : > { %s6278_s27 = scalar_lea.vmem %s347_s29, 1280  ;;  %p6283_p7 = scmp.lt.s32.totalorder %s347_s29, %s347_s29 }
  0x98   : > { %p6279_p6 = scmp.ne.s32.totalorder %s347_s29, %s6278_s27  ;;  %p6284_p9 = scmp.lt.s32.totalorder %s6278_s27, %s6278_s27 }
  0x9a   : > { %p6285_p11 = por %p6284_p9, %p6283_p7 }
  0x9c   : > { %p6286_p13 = pnand %p6285_p11, %p6279_p6 }
  0x9e   : > { %6289 = shalt.err (!%p6286_p13)  }
  0x9f   : > { %349 = dma.hbm_to_vmem [thread:$0]  %s338_s13, 1280, %s347_s29, [#allocation3] }
  0xa0   : > { %s6677_s15 = scalar_lea.vmem [#allocation13], %s6660_s17 }
  0xa1   : > { %6362 = dma.done.wait [#allocation3], 1280 }
  0xa2   : > { %6363 = vsyncadd [#allocation3], 4294966016  ;;  %v6679_v1 = vld [vmem:[#allocation10] sm:$0xf]  ;;  %v6681_v2 = vld [vmem:[#allocation10 + $0x4] sm:$0xf] }
  0xa3   : > { %7946 = vst [vmem:[#allocation32_spill] sm:$0xff] %v6679_v1  ;;  %7947 = vst [vmem:[#allocation33_spill] sm:$0xff] %v6681_v2  ;;  %v6683_v3 = vld [vmem:[#allocation10 + $0x8] sm:$0xf]  ;;  %v6685_v4 = vld [vmem:[#allocation10 + $0xc] sm:$0xf] }
  0xa4   : > { %7948 = vst [vmem:[#allocation34_spill] sm:$0xff] %v6683_v3  ;;  %7949 = vst [vmem:[#allocation35_spill] sm:$0xff] %v6685_v4  ;;  %v6687_v5 = vld [vmem:[#allocation10 + $0x10] sm:$0xf]  ;;  %v6689_v6 = vld [vmem:[#allocation10 + $0x14] sm:$0xf] }
  0xa5   : > { %7950 = vst [vmem:[#allocation36_spill] sm:$0xff] %v6687_v5  ;;  %7951 = vst [vmem:[#allocation37_spill] sm:$0xff] %v6689_v6  ;;  %v6691_v7 = vld [vmem:[#allocation10 + $0x18] sm:$0xf]  ;;  %v6693_v8 = vld [vmem:[#allocation10 + $0x1c] sm:$0xf] }
  0xa6   : > { %7952 = vst [vmem:[#allocation38_spill] sm:$0xff] %v6691_v7  ;;  %7953 = vst [vmem:[#allocation39_spill] sm:$0xff] %v6693_v8  ;;  %v6695_v9 = vld [vmem:[#allocation10 + $0x20] sm:$0xf]  ;;  %v6697_v10 = vld [vmem:[#allocation10 + $0x24] sm:$0xf] }
  0xa7   : > { %7954 = vst [vmem:[#allocation40_spill] sm:$0xff] %v6695_v9  ;;  %7955 = vst [vmem:[#allocation41_spill] sm:$0xff] %v6697_v10  ;;  %v6699_v11 = vld [vmem:[#allocation10 + $0x28] sm:$0xf]  ;;  %v6701_v12 = vld [vmem:[#allocation10 + $0x2c] sm:$0xf] }
  0xa8   : > { %7956 = vst [vmem:[#allocation42_spill] sm:$0xff] %v6699_v11  ;;  %7957 = vst [vmem:[#allocation43_spill] sm:$0xff] %v6701_v12  ;;  %v6703_v13 = vld [vmem:[#allocation10 + $0x30] sm:$0xf]  ;;  %v6705_v14 = vld [vmem:[#allocation10 + $0x34] sm:$0xf] }
  0xa9   : > { %7958 = vst [vmem:[#allocation44_spill] sm:$0xff] %v6703_v13  ;;  %7959 = vst [vmem:[#allocation45_spill] sm:$0xff] %v6705_v14  ;;  %v6707_v15 = vld [vmem:[#allocation10 + $0x38] sm:$0xf]  ;;  %v6709_v16 = vld [vmem:[#allocation10 + $0x3c] sm:$0xf] }
  0xaa   : > { %7960 = vst [vmem:[#allocation46_spill] sm:$0xff] %v6707_v15  ;;  %7961 = vst [vmem:[#allocation47_spill] sm:$0xff] %v6709_v16  ;;  %v5831_v17 = vld [vmem:[#allocation5] sm:$0xff]   ;;  %v5832_v18 = vld [vmem:[#allocation5 + $0x8] sm:$0xff]   ;;  %vm998_vm0 = vcmask 1043456   ;;  %vm1005_vm4 = vcmask 1040384  }
  0xab   : > { %5179 = vmatprep.subr.bf16.mxu0 %v5831_v17  ;;  %v5833_v19 = vld [vmem:[#allocation5 + $0x10] sm:$0xff]   ;;  %v385_v20 = vld [vmem:[#allocation2] sm:$0xff]  ;;  %v5835_v22 = vld [vmem:[#allocation5 + $0x20] sm:$0xff]   ;;  %vm999_vm1 = vsmask.f32 7938  ;;  %p4735_p3 = scmp.ne.s32.totalorder %s6382_s30, 0 }
  0xac   : > { %5180 = vmatpush3.bf16.msra.mxu0 %v5831_v17  ;;  %v5834_v21 = vld [vmem:[#allocation5 + $0x18] sm:$0xff]   ;;  %5195 = vmatprep.mubr.bf16.mxu0 %v385_v20  ;;  %v5836_v23 = vld [vmem:[#allocation5 + $0x28] sm:$0xff]   ;;  %v5837_v24 = vld [vmem:[#allocation5 + $0x30] sm:$0xff]   ;;  %vm795_vm2 = vsmask.f32 256 }
  0xad   : > { %5181 = vmatprep.subr.bf16.mxu0 %v5832_v18  ;;  %v5838_v25 = vld [vmem:[#allocation5 + $0x38] sm:$0xff]   ;;  %v386_v26 = vld [vmem:[#allocation2 + $0x8] sm:$0xff]  ;;  %v387_v27 = vld [vmem:[#allocation2 + $0x10] sm:$0xff]  ;;  %vm796_vm3 = vsmask.f32 4368 }
  0xae   : > { %v388_v28 = vld [vmem:[#allocation2 + $0x18] sm:$0xff]  ;;  %v389_v29 = vld [vmem:[#allocation2 + $0x20] sm:$0xff]  ;;  %v390_v30 = vld [vmem:[#allocation2 + $0x28] sm:$0xff] }
  0xaf   : > { %v391_v31 = vld [vmem:[#allocation2 + $0x30] sm:$0xff]  ;;  %v392_v32 = vld [vmem:[#allocation2 + $0x38] sm:$0xff]  ;;  %v393_v33 = vld [vmem:[#allocation2 + $0x40] sm:$0xff] }
  0xb0   : > { %5182 = vmatpush3.bf16.msra.mxu0 %v5832_v18  ;;  %v394_v34 = vld [vmem:[#allocation2 + $0x48] sm:$0xff]  ;;  %v6714_v35 = vld [vmem:[%s7890_s2] ss:$0 sm:$0xff]  ;;  %vm6808_vm5 = vmand %vm998_vm0, %vm999_vm1 }
  0xb1   : > { %5183 = vmatprep.subr.bf16.mxu0 %v5833_v19  ;;  %vm6814_vm6 = vmor %vm795_vm2, %vm796_vm3 }
  0xb2   : > { %vm6823_vm7 = vmand %vm1005_vm4, %vm795_vm2 }
  0xb4   : > { %5184 = vmatpush3.bf16.msra.mxu0 %v5833_v19 }
  0xb5   : > { %5185 = vmatprep.subr.bf16.mxu0 %v5834_v21 }
  0xb8   : > { %5186 = vmatpush3.bf16.msra.mxu0 %v5834_v21 }
  0xb9   : > { %5187 = vmatprep.subr.bf16.mxu0 %v5835_v22 }
  0xbc   : > { %5188 = vmatpush3.bf16.msra.mxu0 %v5835_v22 }
  0xbd   : > { %5189 = vmatprep.subr.bf16.mxu0 %v5836_v23 }
  0xc0   : > { %5190 = vmatpush3.bf16.msra.mxu0 %v5836_v23 }
  0xc1   : > { %5191 = vmatprep.subr.bf16.mxu0 %v5837_v24 }
  0xc4   : > { %5192 = vmatpush3.bf16.msra.mxu0 %v5837_v24 }
  0xc5   : > { %5193 = vmatprep.subr.bf16.mxu0 %v5838_v25 }
  0xc8   : > { %5194 = vmatpush3.bf16.msra.mxu0 %v5838_v25 }
  0xcb   : > { %5196 = vmatmul.mubr.bf16.vlgmr.msra.gmra.mrb[0].mxu0 %v386_v26 }
  0xcc   : > { %5199 = vmatprep.mubr.bf16.mxu0 %v387_v27 }
  0xd3   : > { %5200 = vmatmul.mubr.bf16.gmra.mrb[4].mxu0 %v388_v28 }
  0xd4   : > { %5203 = vmatprep.mubr.bf16.mxu0 %v389_v29 }
  0xdb   : > { %5204 = vmatmul.mubr.bf16.gmra.mrb[8].mxu0 %v390_v30 }
  0xdc   : > { %5207 = vmatprep.mubr.bf16.mxu0 %v391_v31 }
  0xe3   : > { %5208 = vmatmul.mubr.bf16.gmra.mrb[12].mxu0 %v392_v32 }
  0xe4   : > { %5211 = vmatprep.mubr.bf16.mxu0 %v393_v33 }
  0xeb   : > { %5212 = vmatmul.mubr.bf16.gmra.mrb[16].mxu0 %v394_v34 }
 0x19e   : > { %v5197_v36 = vpop.f32.mrb[0].mxu0 }
 0x19f   : > { %v6717_v37 = vadd.f32 %v5197_v36, %v6714_v35  ;;  %v500_v38 = vpop.f32.mrb[1].mxu0 }
 0x1a0   : > { %v6720_v39 = vadd.f32 %v6714_v35, %v500_v38  ;;  %v5198_v40 = vpop.f32.mrb[2].mxu0 }
 0x1a1   : > { %v4697_v41 = vmul.f32 -1.442695, %v6717_v37  ;;  %v6724_v42 = vadd.f32 %v5198_v40, %v6714_v35  ;;  %v503_v43 = vpop.f32.mrb[3].mxu0 }
 0x1a2   : > { %v4695_v44 = vmul.f32 -1.442695, %v6720_v39  ;;  %v6728_v45 = vadd.f32 %v6714_v35, %v503_v43 }
 0x1a3   : > { %5839 = vpow2.f32 %v4697_v41  ;;  %v4698_v46 = vmul.f32 -1.442695, %v6724_v42 }
 0x1a4   : > { %5841 = vpow2.f32 %v4695_v44  ;;  %v4696_v47 = vmul.f32 -1.442695, %v6728_v45 }
 0x1a5   : > { %5843 = vpow2.f32 %v4698_v46 }
 0x1a6   : > { %5845 = vpow2.f32 %v4696_v47  ;;  %v5201_v48 = vpop.f32.mrb[4].mxu0 }
 0x1a7   : > { %v6733_v49 = vadd.f32 %v5201_v48, %v6714_v35  ;;  %v516_v50 = vpop.f32.mrb[5].mxu0 }
 0x1a8   : > { %v6736_v51 = vadd.f32 %v6714_v35, %v516_v50  ;;  %v5202_v52 = vpop.f32.mrb[6].mxu0 }
 0x1a9   : > { %v4701_v53 = vmul.f32 -1.442695, %v6733_v49  ;;  %v6740_v54 = vadd.f32 %v5202_v52, %v6714_v35  ;;  %v519_v55 = vpop.f32.mrb[7].mxu0 }
 0x1aa   : > { %v4699_v56 = vmul.f32 -1.442695, %v6736_v51  ;;  %v6744_v57 = vadd.f32 %v6714_v35, %v519_v55 }
 0x1ab   : > { %5847 = vpow2.f32 %v4701_v53  ;;  %v4702_v58 = vmul.f32 -1.442695, %v6740_v54 }
 0x1ac   : > { %5849 = vpow2.f32 %v4699_v56  ;;  %v4700_v59 = vmul.f32 -1.442695, %v6744_v57 }
 0x1ad   : > { %v5840_v60 = vpop.eup %5839  ;;  %5851 = vpow2.f32 %v4702_v58 }
 0x1ae   : > { %v5842_v61 = vpop.eup %5841  ;;  %v641_v62 = vadd.f32 1.0, %v5840_v60  ;;  %5853 = vpow2.f32 %v4700_v59  ;;  %v5205_v63 = vpop.f32.mrb[8].mxu0 }
 0x1af   : > { %v5844_v0 = vpop.eup %5843  ;;  %v639_v17 = vadd.f32 1.0, %v5842_v61  ;;  %v6749_v18 = vadd.f32 %v5205_v63, %v6714_v35  ;;  %v532_v19 = vpop.f32.mrb[9].mxu0 }
 0x1b0   : > { %v5846_v20 = vpop.eup %5845  ;;  %5855 = vrcp.f32 %v641_v62  ;;  %v642_v21 = vadd.f32 1.0, %v5844_v0  ;;  %v6752_v22 = vadd.f32 %v6714_v35, %v532_v19  ;;  %v5206_v23 = vpop.f32.mrb[10].mxu0 }
 0x1b1   : > { %5857 = vrcp.f32 %v639_v17  ;;  %v640_v24 = vadd.f32 1.0, %v5846_v20  ;;  %v4705_v25 = vmul.f32 -1.442695, %v6749_v18  ;;  %v6756_v26 = vadd.f32 %v5206_v23, %v6714_v35  ;;  %v535_v27 = vpop.f32.mrb[11].mxu0 }
 0x1b2   : > { %5859 = vrcp.f32 %v642_v21  ;;  %v4703_v28 = vmul.f32 -1.442695, %v6752_v22  ;;  %v6760_v29 = vadd.f32 %v6714_v35, %v535_v27 }
 0x1b3   : > { %5861 = vrcp.f32 %v640_v24  ;;  %v4706_v30 = vmul.f32 -1.442695, %v6756_v26 }
 0x1b4   : > { %5863 = vpow2.f32 %v4705_v25  ;;  %v4704_v31 = vmul.f32 -1.442695, %v6760_v29 }
 0x1b5   : > { %v5848_v32 = vpop.eup %5847  ;;  %5865 = vpow2.f32 %v4703_v28 }
 0x1b6   : > { %v5850_v33 = vpop.eup %5849  ;;  %v645_v34 = vadd.f32 1.0, %v5848_v32  ;;  %5867 = vpow2.f32 %v4706_v30  ;;  %v5209_v36 = vpop.f32.mrb[12].mxu0  ;;  %v1007_v30 = vld [vmem:[#allocation4 + $0x8] sm:$0x1] }
 0x1b7   : > { %v5852_v38 = vpop.eup %5851  ;;  %v643_v40 = vadd.f32 1.0, %v5850_v33  ;;  %5869 = vpow2.f32 %v4704_v31  ;;  %v6765_v41 = vadd.f32 %v5209_v36, %v6714_v35  ;;  %v548_v43 = vpop.f32.mrb[13].mxu0 }
 0x1b8   : > { %v5854_v44 = vpop.eup %5853  ;;  %5871 = vrcp.f32 %v645_v34  ;;  %v646_v46 = vadd.f32 1.0, %v5852_v38  ;;  %v6768_v47 = vadd.f32 %v6714_v35, %v548_v43  ;;  %v5210_v48 = vpop.f32.mrb[14].mxu0 }
 0x1b9   : > { %5873 = vrcp.f32 %v643_v40  ;;  %v644_v50 = vadd.f32 1.0, %v5854_v44  ;;  %v4709_v52 = vmul.f32 -1.442695, %v6765_v41  ;;  %v6772_v53 = vadd.f32 %v5210_v48, %v6714_v35  ;;  %v551_v55 = vpop.f32.mrb[15].mxu0 }
 0x1ba   : > { %v5856_v56 = vpop.eup %5855  ;;  %5875 = vrcp.f32 %v646_v46  ;;  %v4707_v58 = vmul.f32 -1.442695, %v6768_v47  ;;  %v6776_v59 = vadd.f32 %v6714_v35, %v551_v55 }
 0x1bb   : > { %v5858_v60 = vpop.eup %5857  ;;  %v6779_v61 = vmul.f32 %v5856_v56, %v6717_v37  ;;  %5877 = vrcp.f32 %v644_v50  ;;  %v4710_v62 = vmul.f32 -1.442695, %v6772_v53  ;;  %v1010_v56 = vld [vmem:[#allocation4 + $0xc] sm:$0xf] }
 0x1bc   : > { %v5860_v63 = vpop.eup %5859  ;;  %v699_v0 = vmul.f32 %v5858_v60, %v6720_v39  ;;  %5879 = vpow2.f32 %v4709_v52  ;;  %v6790_v24 = vmul.f32 -1.442695, %v6776_v59 }
 0x1bd   : > { %7962 = vst [vmem:[#allocation48_spill] sm:$0xff] %v6779_v61  ;;  %v5862_v17 = vpop.eup %5861  ;;  %v4966_v19 = vpack.c.bf16 %v6779_v61, %v6779_v61  ;;  %v6786_v20 = vmul.f32 %v5860_v63, %v6724_v42  ;;  %5881 = vpow2.f32 %v4707_v58 }
 0x1be   : > { %v5864_v37 = vpop.eup %5863  ;;  %v4964_v21 = vpack.c.bf16 %v699_v0, %v699_v0  ;;  %v700_v23 = vmul.f32 %v5862_v17, %v6728_v45  ;;  %5883 = vpow2.f32 %v4710_v62  ;;  %v6792_v39 = vpop.f32.mrb[16].mxu0 }
 0x1bf   : > { %7963 = vst [vmem:[#allocation49_spill] sm:$0xff] %v6786_v20  ;;  %v5866_v25 = vpop.eup %5865  ;;  %v816_v27 = vshrl.u32 %v4966_v19, 16  ;;  %v819_v28 = vshll.u32 %v4966_v19, 16  ;;  %v4967_v42 = vpack.c.bf16 %v6786_v20, %v6786_v20  ;;  %v6798_v31 = vpop.f32.mrb[17].mxu0  ;;  %v649_v36 = vadd.f32 1.0, %v5864_v37 }
 0x1c0   : > { %v6800_v32 = vpop.eup %5867  ;;  %v799_v45 = vshrl.u32 %v4964_v21, 16  ;;  %v802_v33 = vshll.u32 %v4964_v21, 16  ;;  %v4965_v34 = vpack.c.bf16 %v700_v23, %v700_v23  ;;  %v6802_v38 = vpop.f32.mrb[18].mxu0  ;;  %v647_v48 = vadd.f32 1.0, %v5866_v25  ;;  %v1001_v19 = vld [vmem:[#allocation4] sm:$0xf] }
 0x1c1   : > { %v5870_v40 = vpop.eup %5869  ;;  %v818_v43 = vrot.slane %v816_v27, 7  ;;  %v824_v44 = vshrl.u32 %v4967_v42, 16  ;;  %v827_v46 = vshll.u32 %v4967_v42, 16  ;;  %v6804_v50 = vpop.f32.mrb[19].mxu0  ;;  %5885 = vrcp.f32 %v649_v36 }
 0x1c2   : > { %v5872_v52 = vpop.eup %5871  ;;  %v801_v58 = vrot.slane %v799_v45, 7  ;;  %v807_v60 = vshrl.u32 %v4965_v34, 16  ;;  %v810_v62 = vshll.u32 %v4965_v34, 16  ;;  %5887 = vrcp.f32 %v647_v48 }
 0x1c3   : > { %v5874_v63 = vpop.eup %5873  ;;  %v821_v0 = vor.u32 %v819_v28, %v818_v43  ;;  %v822_v17 = vrot.slane %v818_v43, 4  ;;  %v826_v21 = vrot.slane %v824_v44, 7  ;;  %v6819_v23 = vmul.f32 %v5872_v52, %v6733_v49  ;;  %v1014_v28 = vld [vmem:[#allocation4 + $0x14] sm:$0x1] }
 0x1c4   : > { %v5876_v25 = vpop.eup %5875  ;;  %v804_v27 = vor.u32 %v802_v33, %v801_v58  ;;  %v805_v42 = vrot.slane %v801_v58, 4  ;;  %v809_v34 = vrot.slane %v807_v60, 7  ;;  %v6828_v36 = vmul.f32 %v5874_v63, %v6736_v51 }
 0x1c5   : > { %7968 = vst [vmem:[#allocation50_spill] sm:$0xff] %v6819_v23  ;;  %v5878_v43 = vpop.eup %5877  ;;  %v1011_v44 = vsel %vm6808_vm5, %v821_v0, %v1010_v56  ;;  %v829_v49 = vor.u32 %v827_v46, %v826_v21  ;;  %v831_v52 = vrot.slane %v826_v21, 4  ;;  %v4970_v33 = vpack.c.bf16 %v6819_v23, %v6819_v23 }
 0x1c6   : > { %7971 = vst [vmem:[#allocation51_spill] sm:$0xff] %v6828_v36  ;;  %v5880_v58 = vpop.eup %5879  ;;  %1012 = vst [vmem:[#allocation4 + $0xc] sm:$0xf] %v1011_v44  ;;  %v1002_v61 = vsel %vm6808_vm5, %v804_v27, %v1001_v19  ;;  %v812_v20 = vor.u32 %v810_v62, %v809_v34  ;;  %v814_v60 = vrot.slane %v809_v34, 4  ;;  %v4968_v51 = vpack.c.bf16 %v6828_v36, %v6828_v36  ;;  %v1024_v44 = vld [vmem:[#allocation4 + $0x24] sm:$0xf] }
 0x1c7   : > { %v5882_v63 = vpop.eup %5881  ;;  %1003 = vst [vmem:[#allocation4] sm:$0xf] %v1002_v61  ;;  %v830_v46 = vsel %vm6814_vm6, %v822_v17, %v829_v49  ;;  %v1015_v56 = vsel %vm6823_vm7, %v831_v52, %v1014_v28  ;;  %v850_v0 = vshrl.u32 %v4970_v33, 16  ;;  %v853_v21 = vshll.u32 %v4970_v33, 16 }
 0x1c8   : > { %v5884_v15 = vpop.eup %5883  ;;  %1013 = vst [vmem:[#allocation4 + $0x10] sm:$0xf] %v830_v46  ;;  %1016 = vst [vmem:[#allocation4 + $0x14] sm:$0x1] %v1015_v56  ;;  %v813_v62 = vsel %vm6814_vm6, %v805_v42, %v812_v20  ;;  %v1008_v19 = vsel %vm6823_vm7, %v814_v60, %v1007_v30  ;;  %v833_v27 = vshrl.u32 %v4968_v51, 16  ;;  %v836_v34 = vshll.u32 %v4968_v51, 16 }
 0x1c9   : > { %1004 = vst [vmem:[#allocation4 + $0x4] sm:$0xf] %v813_v62  ;;  %1009 = vst [vmem:[#allocation4 + $0x8] sm:$0x1] %v1008_v19  ;;  %v852_v61 = vrot.slane %v850_v0, 7  ;;  %v6847_v17 = vmul.f32 %v5876_v25, %v6740_v54  ;;  %v6850_v28 = vmul.f32 %v5878_v43, %v6744_v57  ;;  %v650_v52 = vadd.f32 1.0, %v6800_v32 }
 0x1ca   : > { %v835_v49 = vrot.slane %v833_v27, 7  ;;  %v648_v20 = vadd.f32 1.0, %v5870_v40  ;;  %v653_v42 = vadd.f32 1.0, %v5880_v58  ;;  %v1017_v60 = vld [vmem:[#allocation4 + $0x18] sm:$0xf] }
 0x1cb   : > { %7972 = vst [vmem:[#allocation52_spill] sm:$0xff] %v6847_v17  ;;  %7973 = vst [vmem:[#allocation53_spill] sm:$0xff] %v6850_v28  ;;  %v855_v33 = vor.u32 %v853_v21, %v852_v61  ;;  %v856_v30 = vrot.slane %v852_v61, 4  ;;  %v4971_v54 = vpack.c.bf16 %v6847_v17, %v6847_v17  ;;  %v5886_v25 = vpop.eup %5885  ;;  %v4969_v32 = vpack.c.bf16 %v6850_v28, %v6850_v28  ;;  %v1028_v61 = vld [vmem:[#allocation4 + $0x2c] sm:$0x1] }
 0x1cc   : > { %v838_v46 = vor.u32 %v836_v34, %v835_v49  ;;  %v839_v57 = vrot.slane %v835_v49, 4  ;;  %v6864_v56 = vmul.f32 %v5886_v25, %v6749_v18  ;;  %5889 = vrcp.f32 %v650_v52 }
 0x1cd   : > { %v1025_v40 = vsel %vm6808_vm5, %v855_v33, %v1024_v44  ;;  %v858_v43 = vshrl.u32 %v4971_v54, 16  ;;  %v861_v58 = vshll.u32 %v4971_v54, 16  ;;  %v841_v21 = vshrl.u32 %v4969_v32, 16  ;;  %v1021_v54 = vld [vmem:[#allocation4 + $0x20] sm:$0x1] }
 0x1ce   : > { %7974 = vst [vmem:[#allocation54_spill] sm:$0xff] %v6864_v56  ;;  %1026 = vst [vmem:[#allocation4 + $0x24] sm:$0xf] %v1025_v40  ;;  %v1018_v0 = vsel %vm6808_vm5, %v838_v46, %v1017_v60  ;;  %v844_v62 = vshll.u32 %v4969_v32, 16  ;;  %v4974_v27 = vpack.c.bf16 %v6864_v56, %v6864_v56  ;;  %5891 = vrcp.f32 %v648_v20  ;;  %v5888_v20 = vpop.eup %5887 }
 0x1cf   : > { %1019 = vst [vmem:[#allocation4 + $0x18] sm:$0xf] %v1018_v0  ;;  %v860_v19 = vrot.slane %v858_v43, 7  ;;  %v651_v34 = vadd.f32 1.0, %v5882_v63  ;;  %v843_v44 = vrot.slane %v841_v21, 7  ;;  %5893 = vrcp.f32 %v653_v42 }
 0x1d0   : > { %v654_v49 = vadd.f32 1.0, %v5884_v15  ;;  %v6872_v18 = vadd.f32 %v6792_v39, %v6714_v35  ;;  %v884_v25 = vshrl.u32 %v4974_v27, 16  ;;  %v887_v52 = vshll.u32 %v4974_v27, 16 }
 0x1d1   : > { %v863_v33 = vor.u32 %v861_v58, %v860_v19  ;;  %v865_v60 = vrot.slane %v860_v19, 4  ;;  %v846_v46 = vor.u32 %v844_v62, %v843_v44  ;;  %v848_v32 = vrot.slane %v843_v44, 4  ;;  %v1038_v58 = vld [vmem:[#allocation4 + $0x3c] sm:$0xf] }
 0x1d2   : > { %5895 = vrcp.f32 %v651_v34  ;;  %v4713_v40 = vmul.f32 -1.442695, %v6872_v18  ;;  %v6879_v42 = vrot.slane %v884_v25, 7  ;;  %v6886_v0 = vmul.f32 %v5888_v20, %v6752_v22 }
 0x1d3   : > { %v864_v63 = vsel %vm6814_vm6, %v856_v30, %v863_v33  ;;  %v1029_v15 = vsel %vm6823_vm7, %v865_v60, %v1028_v61  ;;  %5897 = vrcp.f32 %v654_v49  ;;  %v847_v39 = vsel %vm6814_vm6, %v839_v57, %v846_v46  ;;  %v1031_v60 = vld [vmem:[#allocation4 + $0x30] sm:$0xf] }
 0x1d4   : > { %1027 = vst [vmem:[#allocation4 + $0x28] sm:$0xf] %v864_v63  ;;  %1030 = vst [vmem:[#allocation4 + $0x2c] sm:$0x1] %v1029_v15  ;;  %v1022_v43 = vsel %vm6823_vm7, %v848_v32, %v1021_v54  ;;  %5899 = vpow2.f32 %v6790_v24  ;;  %v889_v30 = vor.u32 %v887_v52, %v6879_v42  ;;  %v6892_v21 = vadd.f32 %v6714_v35, %v6798_v31 }
 0x1d5   : > { %7975 = vst [vmem:[#allocation55_spill] sm:$0xff] %v6886_v0  ;;  %1020 = vst [vmem:[#allocation4 + $0x1c] sm:$0xf] %v847_v39  ;;  %v4972_v57 = vpack.c.bf16 %v6886_v0, %v6886_v0  ;;  %v6898_v62 = vadd.f32 %v6802_v38, %v6714_v35  ;;  %v6902_v22 = vadd.f32 %v6714_v35, %v6804_v50  ;;  %5901 = vpow2.f32 %v4713_v40 }
 0x1d6   : > { %1023 = vst [vmem:[#allocation4 + $0x20] sm:$0x1] %v1022_v43  ;;  %v1039_v24 = vsel %vm6808_vm5, %v889_v30, %v1038_v58  ;;  %v4711_v19 = vmul.f32 -1.442695, %v6892_v21  ;;  %v5890_v27 = vpop.eup %5889  ;;  %v890_v46 = vrot.slane %v6879_v42, 4 }
 0x1d7   : > { %1040 = vst [vmem:[#allocation4 + $0x3c] sm:$0xf] %v1039_v24  ;;  %v867_v31 = vshrl.u32 %v4972_v57, 16  ;;  %v4714_v34 = vmul.f32 -1.442695, %v6898_v62  ;;  %v6910_v38 = vmul.f32 %v5890_v27, %v6756_v26  ;;  %v870_v49 = vshll.u32 %v4972_v57, 16 }
 0x1d8   : > { %v4712_v61 = vmul.f32 -1.442695, %v6902_v22  ;;  %v5892_v44 = vpop.eup %5891  ;;  %5903 = vpow2.f32 %v4711_v19 }
 0x1d9   : > { %7976 = vst [vmem:[#allocation56_spill] sm:$0xff] %v6910_v38  ;;  %v5894_v35 = vpop.eup %5893  ;;  %v869_v50 = vrot.slane %v867_v31, 7  ;;  %v6913_v33 = vmul.f32 %v5892_v44, %v6760_v29  ;;  %5905 = vpow2.f32 %v4714_v34  ;;  %v4975_v25 = vpack.c.bf16 %v6910_v38, %v6910_v38  ;;  %v1042_v34 = vld [vmem:[#allocation4 + $0x44] sm:$0x1] }
 0x1da   : > { %v6920_v52 = vmul.f32 %v5894_v35, %v6765_v41  ;;  %5907 = vpow2.f32 %v4712_v61 }
 0x1db   : > { %7977 = vst [vmem:[#allocation57_spill] sm:$0xff] %v6913_v33  ;;  %v872_v32 = vor.u32 %v870_v49, %v869_v50  ;;  %v4973_v40 = vpack.c.bf16 %v6913_v33, %v6913_v33  ;;  %v892_v63 = vshrl.u32 %v4975_v25, 16  ;;  %v895_v15 = vshll.u32 %v4975_v25, 16 }
 0x1dc   : > { %7978 = vst [vmem:[#allocation58_spill] sm:$0xff] %v6920_v52  ;;  %v5896_v26 = vpop.eup %5895  ;;  %v4978_v39 = vpack.c.bf16 %v6920_v52, %v6920_v52 }
 0x1dd   : > { %v5898_v20 = vpop.eup %5897  ;;  %v6930_v41 = vmul.f32 %v5896_v26, %v6768_v47  ;;  %v1032_v42 = vsel %vm6808_vm5, %v872_v32, %v1031_v60  ;;  %v875_v58 = vshrl.u32 %v4973_v40, 16  ;;  %v878_v30 = vshll.u32 %v4973_v40, 16 }
 0x1de   : > { %v5900_v43 = vpop.eup %5899  ;;  %v6935_v57 = vmul.f32 %v5898_v20, %v6772_v53  ;;  %1033 = vst [vmem:[#allocation4 + $0x30] sm:$0xf] %v1032_v42  ;;  %v894_v24 = vrot.slane %v892_v63, 7  ;;  %v918_v19 = vshrl.u32 %v4978_v39, 16  ;;  %v921_v27 = vshll.u32 %v4978_v39, 16 }
 0x1df   : > { %7979 = vst [vmem:[#allocation59_spill] sm:$0xff] %v6930_v41  ;;  %v4976_v31 = vpack.c.bf16 %v6930_v41, %v6930_v41  ;;  %v877_v61 = vrot.slane %v875_v58, 7  ;;  %v652_v35 = vadd.f32 1.0, %v5900_v43  ;;  %v1035_v53 = vld [vmem:[#allocation4 + $0x38] sm:$0x1]  ;;  %v5902_v32 = vpop.eup %5901  ;;  %v873_v40 = vrot.slane %v869_v50, 4 }
 0x1e0   : > { %7980 = vst [vmem:[#allocation60_spill] sm:$0xff] %v6935_v57  ;;  %v4979_v44 = vpack.c.bf16 %v6935_v57, %v6935_v57  ;;  %v897_v49 = vor.u32 %v895_v15, %v894_v24  ;;  %v899_v60 = vrot.slane %v894_v24, 4  ;;  %v920_v25 = vrot.slane %v918_v19, 7  ;;  %v1052_v39 = vld [vmem:[#allocation4 + $0x54] sm:$0xf] }
 0x1e1   : > { %v901_v26 = vshrl.u32 %v4976_v31, 16  ;;  %v880_v20 = vor.u32 %v878_v30, %v877_v61  ;;  %v882_v63 = vrot.slane %v877_v61, 4  ;;  %v904_v43 = vshll.u32 %v4976_v31, 16 }
 0x1e2   : > { %v926_v42 = vshrl.u32 %v4979_v44, 16  ;;  %v5904_v54 = vpop.eup %5903  ;;  %v898_v58 = vsel %vm6814_vm6, %v890_v46, %v897_v49  ;;  %v1043_v47 = vsel %vm6823_vm7, %v899_v60, %v1042_v34  ;;  %v923_v29 = vor.u32 %v921_v27, %v920_v25  ;;  %v1045_v27 = vld [vmem:[#allocation4 + $0x48] sm:$0xf]  ;;  %v1056_v34 = vld [vmem:[#allocation4 + $0x5c] sm:$0x1] }
 0x1e3   : > { %v5906_v15 = vpop.eup %5905  ;;  %1041 = vst [vmem:[#allocation4 + $0x40] sm:$0xf] %v898_v58  ;;  %1044 = vst [vmem:[#allocation4 + $0x44] sm:$0x1] %v1043_v47  ;;  %v881_v24 = vsel %vm6814_vm6, %v873_v40, %v880_v20  ;;  %v1036_v50 = vsel %vm6823_vm7, %v882_v63, %v1035_v53  ;;  %v6951_v30 = vrot.slane %v901_v26, 7  ;;  %v929_v31 = vshll.u32 %v4979_v44, 16 }
 0x1e4   : > { %v928_v19 = vrot.slane %v926_v42, 7  ;;  %v5908_v61 = vpop.eup %5907  ;;  %1034 = vst [vmem:[#allocation4 + $0x34] sm:$0xf] %v881_v24  ;;  %1037 = vst [vmem:[#allocation4 + $0x38] sm:$0x1] %v1036_v50  ;;  %v1053_v46 = vsel %vm6808_vm5, %v923_v29, %v1052_v39  ;;  %5909 = vrcp.f32 %v652_v35  ;;  %v657_v47 = vadd.f32 1.0, %v5902_v32 }
 0x1e5   : > { %v924_v49 = vrot.slane %v920_v25, 4  ;;  %1054 = vst [vmem:[#allocation4 + $0x54] sm:$0xf] %v1053_v46  ;;  %v906_v60 = vor.u32 %v904_v43, %v6951_v30  ;;  %v655_v53 = vadd.f32 1.0, %v5904_v54  ;;  %v658_v20 = vadd.f32 1.0, %v5906_v15 }
 0x1e6   : > { %v933_v40 = vrot.slane %v928_v19, 4  ;;  %v931_v26 = vor.u32 %v929_v31, %v928_v19  ;;  %5911 = vrcp.f32 %v657_v47  ;;  %v656_v63 = vadd.f32 1.0, %v5908_v61 }
 0x1e7   : > { %v1046_v42 = vsel %vm6808_vm5, %v906_v60, %v1045_v27  ;;  %5913 = vrcp.f32 %v655_v53  ;;  %v907_v46 = vrot.slane %v6951_v30, 4  ;;  %v1049_v60 = vld [vmem:[#allocation4 + $0x50] sm:$0x1] }
 0x1e8   : > { %v1057_v29 = vsel %vm6823_vm7, %v933_v40, %v1056_v34  ;;  %1047 = vst [vmem:[#allocation4 + $0x48] sm:$0xf] %v1046_v42  ;;  %v932_v44 = vsel %vm6814_vm6, %v924_v49, %v931_v26  ;;  %5915 = vrcp.f32 %v658_v20  ;;  %v1066_v42 = vld [vmem:[#allocation4 + $0x6c] sm:$0xf] }
 0x1e9   : > { %1058 = vst [vmem:[#allocation4 + $0x5c] sm:$0x1] %v1057_v29  ;;  %1055 = vst [vmem:[#allocation4 + $0x58] sm:$0xf] %v932_v44  ;;  %5917 = vrcp.f32 %v656_v63 }
 0x1ee   : > { %v5910_v54 = vpop.eup %5909 }
 0x1ef   : > { %v6963_v35 = vmul.f32 %v5910_v54, %v6776_v59 }
 0x1f0   : > { %v5912_v25 = vpop.eup %5911 }
 0x1f1   : > { %7981 = vst [vmem:[#allocation61_spill] sm:$0xff] %v6963_v35  ;;  %v5914_v32 = vpop.eup %5913  ;;  %v4977_v58 = vpack.c.bf16 %v6963_v35, %v6963_v35  ;;  %v717_v43 = vmul.f32 %v5912_v25, %v6872_v18 }
 0x1f2   : > { %v5916_v15 = vpop.eup %5915  ;;  %v6971_v24 = vmul.f32 %v5914_v32, %v6892_v21 }
 0x1f3   : > { %v5918_v50 = vpop.eup %5917  ;;  %v909_v19 = vshrl.u32 %v4977_v58, 16  ;;  %v4982_v61 = vpack.c.bf16 %v717_v43, %v717_v43  ;;  %v718_v59 = vmul.f32 %v5916_v15, %v6898_v62  ;;  %v912_v47 = vshll.u32 %v4977_v58, 16  ;;  %v1059_v58 = vld [vmem:[#allocation4 + $0x60] sm:$0xf] }
 0x1f4   : > { %7982 = vst [vmem:[#allocation62_spill] sm:$0xff] %v6971_v24  ;;  %v4980_v27 = vpack.c.bf16 %v6971_v24, %v6971_v24  ;;  %v6978_v31 = vmul.f32 %v5918_v50, %v6902_v22 }
 0x1f5   : > { %v911_v34 = vrot.slane %v909_v19, 7  ;;  %v952_v18 = vshrl.u32 %v4982_v61, 16  ;;  %v4983_v49 = vpack.c.bf16 %v718_v59, %v718_v59  ;;  %v955_v21 = vshll.u32 %v4982_v61, 16 }
 0x1f6   : > { %7983 = vst [vmem:[#allocation63_spill] sm:$0xff] %v6978_v31  ;;  %v935_v40 = vshrl.u32 %v4980_v27, 16  ;;  %v4981_v62 = vpack.c.bf16 %v6978_v31, %v6978_v31  ;;  %v938_v29 = vshll.u32 %v4980_v27, 16 }
 0x1f7   : > { %v914_v30 = vor.u32 %v912_v47, %v911_v34  ;;  %v916_v26 = vrot.slane %v911_v34, 4  ;;  %v954_v20 = vrot.slane %v952_v18, 7  ;;  %v960_v63 = vshrl.u32 %v4983_v49, 16  ;;  %v1070_v47 = vld [vmem:[#allocation4 + $0x74] sm:$0x1] }
 0x1f8   : > { %v937_v22 = vrot.slane %v935_v40, 7  ;;  %v943_v44 = vshrl.u32 %v4981_v62, 16  ;;  %v963_v43 = vshll.u32 %v4983_v49, 16  ;;  %v946_v61 = vshll.u32 %v4981_v62, 16  ;;  %v1063_v49 = vld [vmem:[#allocation4 + $0x68] sm:$0x1] }
 0x1f9   : > { %v915_v54 = vsel %vm6814_vm6, %v907_v46, %v914_v30  ;;  %v1050_v25 = vsel %vm6823_vm7, %v916_v26, %v1049_v60  ;;  %v957_v32 = vor.u32 %v955_v21, %v954_v20  ;;  %v962_v50 = vrot.slane %v960_v63, 7  ;;  %1076 = sbr.rel (%p4735_p3) target bundleno = 513 (0x201), region = 72 }
 0x1fa   : > { %1048 = vst [vmem:[#allocation4 + $0x4c] sm:$0xf] %v915_v54  ;;  %1051 = vst [vmem:[#allocation4 + $0x50] sm:$0x1] %v1050_v25  ;;  %v940_v15 = vor.u32 %v938_v29, %v937_v22  ;;  %v945_v19 = vrot.slane %v943_v44, 7  ;;  %v958_v59 = vrot.slane %v954_v20, 4 }
 0x1fb   : > { %v1067_v27 = vsel %vm6808_vm5, %v957_v32, %v1066_v42  ;;  %v941_v34 = vrot.slane %v937_v22, 4  ;;  %v965_v18 = vor.u32 %v963_v43, %v962_v50  ;;  %v967_v60 = vrot.slane %v962_v50, 4 }
 0x1fc   : > { %1068 = vst [vmem:[#allocation4 + $0x6c] sm:$0xf] %v1067_v27  ;;  %v1060_v46 = vsel %vm6808_vm5, %v940_v15, %v1059_v58  ;;  %v948_v21 = vor.u32 %v946_v61, %v945_v19  ;;  %v950_v40 = vrot.slane %v945_v19, 4  ;;  %v6408_v20 = vmov (!%p4735_p3), 0  }
 0x1fd   : > { %1061 = vst [vmem:[#allocation4 + $0x60] sm:$0xf] %v1060_v46  ;;  %v966_v30 = vsel %vm6814_vm6, %v958_v59, %v965_v18  ;;  %v1071_v62 = vsel %vm6823_vm7, %v967_v60, %v1070_v47  ;;  %1077 = vst [vmem:[#allocation4] sm:$0xf] (!%p4735_p3), %v6408_v20 }
 0x1fe   : > { %v949_v26 = vsel %vm6814_vm6, %v941_v34, %v948_v21  ;;  %1069 = vst [vmem:[#allocation4 + $0x70] sm:$0xf] %v966_v30  ;;  %1072 = vst [vmem:[#allocation4 + $0x74] sm:$0x1] %v1071_v62  ;;  %v1064_v55 = vsel %vm6823_vm7, %v950_v40, %v1063_v49 }
 0x1ff   : > { %1062 = vst [vmem:[#allocation4 + $0x64] sm:$0xf] %v949_v26  ;;  %1065 = vst [vmem:[#allocation4 + $0x68] sm:$0x1] %v1064_v55 }
 0x200   : > { %1078 = vst [vmem:[#allocation4 + $0x4] sm:$0xf] %v6408_v20  ;;  %1079 = vst [vmem:[#allocation4 + $0x8] sm:$0x1] %v6408_v20 }
 0x201 PF: > { %p4736_p2 = scmp.ne.s32.totalorder %s6382_s30, 1 }
 0x202   : > { %v6409_v37 = vmov (!%p4736_p2), 0  }
 0x203   : > { %1083 = sbr.rel (%p4736_p2) target bundleno = 522 (0x20a), region = 76  ;;  %1085 = vst [vmem:[#allocation4 + $0x6c] sm:$0xf] (!%p4736_p2), %v6409_v37  ;;  %1086 = vst [vmem:[#allocation4 + $0x70] sm:$0xf] (!%p4736_p2), %v6409_v37 }
 0x204   : > { %1087 = vst [vmem:[#allocation4 + $0x74] sm:$0x1] (!%p4736_p2), %v6409_v37 }
 0x20a PF: > { %v5919_v63 = vld [vmem:[#allocation8 + $0xc0] sm:$0xff]   ;;  %v5920_v45 = vld [vmem:[#allocation8 + $0xc8] sm:$0xff]   ;;  %v5921_v42 = vld [vmem:[#allocation8 + $0xd0] sm:$0xff]   ;;  %vm1128_vm8 = vsmask.f32 3328  ;;  %vm1734_vm11 = vcmask 1042432  }
 0x20b   : > { %5311 = vmatprep.subr.bf16.mxu1 %v5919_v63  ;;  %v5922_v22 = vld [vmem:[#allocation8 + $0xd8] sm:$0xff]   ;;  %v5927_v29 = vld [vmem:[#allocation8 + $0x40] sm:$0xff]   ;;  %v5931_v25 = vld [vmem:[#allocation8 + $0x48] sm:$0xff]   ;;  %vm1129_vm9 = vsmask.f32 7440  ;;  %vm1735_vm12 = vcmask 1046532  }
 0x20c   : > { %5312 = vmatpush3.bf16.msra.mxu1 %v5919_v63  ;;  %v5928_v44 = vld [vmem:[#allocation4 + $0xc] sm:$0xff]   ;;  %5215 = vmatprep.subr.bf16.mxu0 %v5927_v29  ;;  %v5923_v54 = vld [vmem:[#allocation8 + $0xe0] sm:$0xff]   ;;  %v5924_v58 = vld [vmem:[#allocation8 + $0xe8] sm:$0xff]   ;;  %s4958_s22 = sshll.u32 %s6386_s9, 5  ;;  %s4554_s11 = sshll.u32 %s6677_s15, 4  ;;  %s7828_s11 = int_to_ptr.vmem [resolvable:$true] %s4554_s11 }
 0x20d   : > { %5313 = vmatprep.subr.bf16.mxu1 %v5920_v45  ;;  %5216 = vmatpush3.bf16.msra.mxu0 %v5927_v29  ;;  %v5933_v32 = vld [vmem:[#allocation8 + $0x50] sm:$0xff]   ;;  %v5937_v43 = vld [vmem:[#allocation8 + $0x58] sm:$0xff]   ;;  %v5939_v50 = vld [vmem:[#allocation8 + $0x60] sm:$0xff]   ;;  %s4551_s13 = sadd.s32 %s4963_s26, %s4958_s22  ;;  %s7836_s18 = scalar_lea.sflag [#allocation7], %s328_s23 }
 0x20e   : > { %5327 = vmatprep.mubr.bf16.mxu1 %v5928_v44  ;;  %5217 = vmatprep.subr.bf16.mxu0 %v5931_v25  ;;  %v5925_v15 = vld [vmem:[#allocation8 + $0xf0] sm:$0xff]   ;;  %v5926_v19 = vld [vmem:[#allocation8 + $0xf8] sm:$0xff]   ;;  %v5943_v61 = vld [vmem:[#allocation8 + $0x68] sm:$0xff]   ;;  %s4959_s21 = sshll.u32 %s4551_s13, 7  ;;  %s6290_s14 = scalar_lea.vmem %s7828_s11, 2048 }
 0x20f   : > { %v5930_v59 = vld [vmem:[#allocation8 + $0x100] sm:$0xff]   ;;  %v5945_v27 = vld [vmem:[#allocation8 + $0x70] sm:$0xff]   ;;  %v5932_v47 = vld [vmem:[#allocation8 + $0x108] sm:$0xff]   ;;  %s7826_s26 = scalar_lea.hbm %s7896_s8, %s4959_s21  ;;  %p6291_p0 = scmp.ne.s32.totalorder %s7828_s11, %s6290_s14 }
 0x210   : > { %5314 = vmatpush3.bf16.msra.mxu1 %v5920_v45  ;;  %v5929_v34 = vld [vmem:[#allocation4 + $0x18] sm:$0xff]   ;;  %v5934_v46 = vld [vmem:[#allocation4 + $0x24] sm:$0xff]   ;;  %v5949_v18 = vld [vmem:[#allocation8 + $0x78] sm:$0xff]   ;;  %p8035_p8 = scmp.ne.s32.totalorder %s7935_s19, 0  ;;  %s6410_s25 = smov [#allocation13]  }
 0x211   : > { %5315 = vmatprep.subr.bf16.mxu1 %v5921_v42  ;;  %5218 = vmatpush3.bf16.msra.mxu0 %v5931_v25  ;;  %v7002_v60 = vld [vmem:[#allocation4] sm:$0xf]  ;;  %v7004_v21 = vld [vmem:[#allocation4 + $0x4] sm:$0xf]  ;;  %v7006_v49 = vld [vmem:[#allocation4 + $0x8] sm:$0x1] }
 0x212   : > { %5219 = vmatprep.subr.bf16.mxu0 %v5933_v32  ;;  %v1132_v40 = vshrl.u32 %v7002_v60, 16  ;;  %v1135_v30 = vshll.u32 %v7002_v60, 16  ;;  %v1141_v62 = vshll.u32 %v7004_v21, 16  ;;  %v1145_v26 = vshrl.u32 %v7004_v21, 16  ;;  %v7013_v20 = vld [vmem:[#allocation4 + $0xc] sm:$0xf]  ;;  %vm7027_vm10 = vmor %vm1128_vm8, %vm1129_vm9  ;;  %p6292_p10 = pnand %p6291_p0, %p8035_p8 }
 0x213   : > { %v1151_v55 = vshll.u32 %v7006_v49, 16  ;;  %v7015_v45 = vld [vmem:[#allocation4 + $0x10] sm:$0xf]  ;;  %v5936_v29 = vld [vmem:[#allocation8 + $0x110] sm:$0xff]   ;;  %v1156_v25 = vshrl.u32 %v7013_v20, 16  ;;  %v5947_v35 = vld [vmem:[#allocation4 + $0x60] sm:$0xff]  }
 0x214   : > { %5316 = vmatpush3.bf16.msra.mxu1 %v5921_v42  ;;  %v1134_v37 = vrot.slane %v1132_v40, 4  ;;  %v1137_v63 = vrot.slane %v1135_v30, 5  ;;  %v7017_v42 = vld [vmem:[#allocation4 + $0x14] sm:$0x1]  ;;  %v1143_v44 = vrot.slane %v1141_v62, 5  ;;  %vm7222_vm13 = vmor %vm1734_vm11, %vm1735_vm12  ;;  %p6293_p12 = pneg %p6292_p10  ;;  %s6294_s10 = sshll.u32 %s6410_s25, 4  ;;  %s6295_s10 = int_to_ptr.vmem [resolvable:$false] %s6294_s10 }
 0x215   : > { %5317 = vmatprep.subr.bf16.mxu1 %v5922_v22  ;;  %5220 = vmatpush3.bf16.msra.mxu0 %v5933_v32  ;;  %v2246_v40 = vld [vmem:[#allocation4 + $0xc] sm:$0xf]  ;;  %v5938_v53 = vld [vmem:[#allocation8 + $0x118] sm:$0xff]   ;;  %v7113_v16 = vld [vmem:[#allocation4 + $0x38] sm:$0x1]  ;;  %s6296_s27 = scalar_lea.vmem %s6295_s10, 4096  ;;  %p6297_p1 = scmp.lt.s32.totalorder %s7828_s11, %s6295_s10 }
 0x216   : > { %5221 = vmatprep.subr.bf16.mxu0 %v5937_v43  ;;  %v1138_v32 = vor.u32 %v1137_v63, %v1134_v37  ;;  %v7032_v63 = vld [vmem:[#allocation4 + $0x10] sm:$0xf]  ;;  %v2271_v48 = vshrl.u32 %v2246_v40, 16  ;;  %v2274_v24 = vshll.u32 %v2246_v40, 16  ;;  %v7089_v33 = vld [vmem:[#allocation4 + $0x2c] sm:$0x1]  ;;  %p6298_p4 = scmp.lt.s32.totalorder %s6296_s27, %s6290_s14 }
 0x217   : > { %v5950_v0 = vld [vmem:[#allocation8 + $0x138] sm:$0xff]   ;;  %v7131_v13 = vld [vmem:[#allocation4 + $0x44] sm:$0x1]  ;;  %v7191_v6 = vld [vmem:[#allocation4 + $0x58] sm:$0xf] }
 0x218   : > { %5318 = vmatpush3.bf16.msra.mxu1 %v5922_v22  ;;  %v5935_v22 = vld [vmem:[#allocation4 + $0x30] sm:$0xff]   ;;  %v1139_v30 = vrot.slane %v1138_v32, 4  ;;  %v2280_v32 = vshll.u32 %v7032_v63, 16  ;;  %7986 = vst [vmem:[#allocation64_spill] sm:$0xff] %v7131_v13  ;;  %p6299_p5 = por %p6298_p4, %p6297_p1 }
 0x219   : > { %5319 = vmatprep.subr.bf16.mxu1 %v5923_v54  ;;  %5222 = vmatpush3.bf16.msra.mxu0 %v5937_v43  ;;  %v1165_v43 = vshll.u32 %v7015_v45, 16  ;;  %v2255_v23 = vld [vmem:[#allocation4 + $0x30] sm:$0xf] }
 0x21a   : > { %5223 = vmatprep.subr.bf16.mxu0 %v5939_v50  ;;  %p6300_p6 = pnand %p6299_p5, %p6293_p12 }
 0x21c   : > { %5320 = vmatpush3.bf16.msra.mxu1 %v5923_v54  ;;  %v1147_v54 = vrot.slane %v1145_v26, 4  ;;  %v1167_v26 = vrot.slane %v1165_v43, 5  ;;  %v2273_v43 = vrot.slane %v2271_v48, 4 }
 0x21d   : > { %5321 = vmatprep.subr.bf16.mxu1 %v5924_v58  ;;  %5224 = vmatpush3.bf16.msra.mxu0 %v5939_v50  ;;  %v7023_v50 = vld [vmem:[#allocation8] sm:$0xff]  }
 0x21e   : > { %5225 = vmatprep.subr.bf16.mxu0 %v5943_v61 }
 0x220   : > { %5322 = vmatpush3.bf16.msra.mxu1 %v5924_v58  ;;  %v1159_v58 = vshll.u32 %v7013_v20, 16 }
 0x221   : > { %5323 = vmatprep.subr.bf16.mxu1 %v5925_v15  ;;  %5226 = vmatpush3.bf16.msra.mxu0 %v5943_v61 }
 0x222   : > { %5227 = vmatprep.subr.bf16.mxu0 %v5945_v27  ;;  %v1161_v62 = vrot.slane %v1159_v58, 5  ;;  %v2249_v58 = vld [vmem:[#allocation4 + $0x18] sm:$0xf] }
 0x224   : > { %5324 = vmatpush3.bf16.msra.mxu1 %v5925_v15  ;;  %v1169_v15 = vshrl.u32 %v7015_v45, 16 }
 0x225   : > { %5325 = vmatprep.subr.bf16.mxu1 %v5926_v19  ;;  %5228 = vmatpush3.bf16.msra.mxu0 %v5945_v27  ;;  %v1153_v27 = vrot.slane %v1151_v55, 5  ;;  %v1144_v55 = vsel %vm7027_vm10, %v1139_v30, %v1143_v44 }
 0x226   : > { %5229 = vmatprep.subr.bf16.mxu0 %v5949_v18  ;;  %v1171_v37 = vrot.slane %v1169_v15, 4  ;;  %v2276_v15 = vrot.slane %v2274_v24, 5  ;;  %v5953_v24 = vld [vmem:[#allocation8 + $0x8] sm:$0xff]  }
 0x228   : > { %5326 = vmatpush3.bf16.msra.mxu1 %v5926_v19  ;;  %v5940_v19 = vld [vmem:[#allocation4 + $0x3c] sm:$0xff]   ;;  %v2277_v31 = vor.u32 %v2276_v15, %v2273_v43 }
 0x229   : > { %5343 = vmatprep.subr.bf16.mxu1 %v5930_v59  ;;  %5230 = vmatpush3.bf16.msra.mxu0 %v5949_v18 }
 0x22a   : > { %5247 = vmatprep.subr.bf16.mxu0 %v7023_v50 }
 0x22b   : > { %5328 = vmatmul.mubr.bf16.vlgmr.msra.gmra.mrb[0].mxu1 %v5929_v34  ;;  %v1158_v34 = vrot.slane %v1156_v25, 4  ;;  %v1172_v25 = vor.u32 %v1171_v37, %v1167_v26  ;;  %v7045_v37 = vld [vmem:[#allocation4 + $0x20] sm:$0x1] }
 0x22c   : > { %5344 = vmatpush3.bf16.msra.mxu1 %v5930_v59  ;;  %5331 = vmatprep.mubr.bf16.mxu1 %v5934_v46  ;;  %v1148_v59 = vor.u32 %v1147_v54, %v1143_v44  ;;  %v1175_v46 = vshll.u32 %v7017_v42, 16  ;;  %v5942_v44 = vld [vmem:[#allocation8 + $0x120] sm:$0xff]  }
 0x22d   : > { %5345 = vmatprep.subr.bf16.mxu1 %v5932_v47  ;;  %v1162_v54 = vor.u32 %v1161_v62, %v1158_v34  ;;  %v1173_v30 = vrot.slane %v1172_v25, 4  ;;  %v2282_v62 = vrot.slane %v2280_v32, 5  ;;  %v2278_v32 = vrot.slane %v2277_v31, 4  ;;  %v7059_v31 = vld [vmem:[#allocation4 + $0x1c] sm:$0xf] }
 0x22e   : > { %v1149_v39 = vrot.slane %v1148_v59, 4  ;;  %v1177_v51 = vrot.slane %v1175_v46, 5  ;;  %v2284_v59 = vshrl.u32 %v7032_v63, 16  ;;  %v7043_v46 = vld [vmem:[#allocation4 + $0x1c] sm:$0xf] }
 0x22f   : > { %v1163_v40 = vrot.slane %v1162_v54, 4  ;;  %v2304_v54 = vshll.u32 %v7043_v46, 16  ;;  %v2308_v41 = vshrl.u32 %v7043_v46, 16 }
 0x230   : > { %5346 = vmatpush3.bf16.msra.mxu1 %v5932_v47  ;;  %v7037_v47 = vld [vmem:[#allocation4 + $0x14] sm:$0x1]  ;;  %v1154_v18 = vsel %vm7027_vm10, %v1149_v39, %v1153_v27  ;;  %v2286_v52 = vrot.slane %v2284_v59, 4  ;;  %v2295_v39 = vshrl.u32 %v2249_v58, 16 }
 0x231   : > { %5347 = vmatprep.subr.bf16.mxu1 %v5936_v29  ;;  %v4737_v34 = vcombine.low %v1144_v55, %v1154_v18  ;;  %v2290_v48 = vshll.u32 %v7037_v47, 16  ;;  %v5946_v27 = vld [vmem:[#allocation4 + $0x54] sm:$0xff]   ;;  %v2298_v55 = vshll.u32 %v2249_v58, 16  ;;  %v2306_v57 = vrot.slane %v2304_v54, 5 }
 0x232   : > { %v2287_v18 = vor.u32 %v2286_v52, %v2282_v62  ;;  %v2297_v15 = vrot.slane %v2295_v39, 4  ;;  %v1189_v54 = vshll.u32 %v7059_v31, 16 }
 0x233   : > { %5332 = vmatmul.mubr.bf16.gmra.mrb[4].mxu1 %v5935_v22  ;;  %v5941_v22 = vld [vmem:[#allocation4 + $0x48] sm:$0xff]   ;;  %5231 = vmatprep.mubr.bf16.mxu0 %v4737_v34  ;;  %v2292_v43 = vrot.slane %v2290_v48, 5  ;;  %v2300_v59 = vrot.slane %v2298_v55, 5  ;;  %v7054_v34 = vld [vmem:[#allocation4 + $0x18] sm:$0xf] }
 0x234   : > { %5348 = vmatpush3.bf16.msra.mxu1 %v5936_v29  ;;  %5335 = vmatprep.mubr.bf16.mxu1 %v5940_v19  ;;  %v1168_v29 = vsel %vm7027_vm10, %v1163_v40, %v1167_v26  ;;  %v1178_v19 = vsel %vm7027_vm10, %v1173_v30, %v1177_v51  ;;  %v5944_v26 = vld [vmem:[#allocation8 + $0x128] sm:$0xff]   ;;  %v2283_v51 = vsel %vm7027_vm10, %v2278_v32, %v2282_v62  ;;  %v2288_v58 = vrot.slane %v2287_v18, 4  ;;  %v5948_v62 = vld [vmem:[#allocation8 + $0x130] sm:$0xff]  }
 0x235   : > { %5349 = vmatprep.subr.bf16.mxu1 %v5938_v53  ;;  %v4738_v25 = vcombine.low %v1168_v29, %v1178_v19  ;;  %v2314_v40 = vshll.u32 %v7045_v37, 16  ;;  %v2310_v30 = vrot.slane %v2308_v41, 4  ;;  %v7064_v48 = vld [vmem:[#allocation4 + $0x20] sm:$0x1]  ;;  %v1180_v39 = vshrl.u32 %v7054_v34, 16  ;;  %v5955_v41 = vld [vmem:[#allocation8 + $0x10] sm:$0xff]  }
 0x236   : > { %v1183_v29 = vshll.u32 %v7054_v34, 16  ;;  %v2293_v19 = vsel %vm7027_vm10, %v2288_v58, %v2292_v43  ;;  %v1191_v43 = vrot.slane %v1189_v54, 5  ;;  %v2252_v54 = vld [vmem:[#allocation4 + $0x24] sm:$0xf] }
 0x237   : > { %5232 = vmatmul.mubr.bf16.vlgmr.msra.gmra.mrb[20].mxu0 %v4738_v25  ;;  %v2316_v55 = vrot.slane %v2314_v40, 5  ;;  %v1193_v25 = vshrl.u32 %v7059_v31, 16  ;;  %v4809_v32 = vcombine.low %v2283_v51, %v2293_v19  ;;  %v1199_v40 = vshll.u32 %v7064_v48, 16  ;;  %v5957_v51 = vld [vmem:[#allocation8 + $0x18] sm:$0xff]   ;;  %v1123_v19 = vld [vmem:[#allocation4 + $0x2c] sm:$0x1] }
 0x238   : > { %5350 = vmatpush3.bf16.msra.mxu1 %v5938_v53  ;;  %5248 = vmatpush3.bf16.msra.mxu0 %v7023_v50  ;;  %v2301_v53 = vor.u32 %v2300_v59, %v2297_v15  ;;  %v7072_v50 = vld [vmem:[#allocation4 + $0x24] sm:$0xf]  ;;  %v2311_v15 = vor.u32 %v2310_v30, %v2306_v57  ;;  %v1182_v59 = vrot.slane %v1180_v39, 4  ;;  %v1185_v52 = vrot.slane %v1183_v29, 5 }
 0x239   : > { %5351 = vmatprep.subr.bf16.mxu1 %v5942_v44  ;;  %5249 = vmatprep.subr.bf16.mxu0 %v5953_v24  ;;  %v1195_v58 = vrot.slane %v1193_v25, 4  ;;  %v1201_v39 = vrot.slane %v1199_v40, 5  ;;  %v1223_v36 = vshll.u32 %v1123_v19, 16 }
 0x23a   : > { %v2302_v18 = vrot.slane %v2301_v53, 4  ;;  %v2312_v38 = vrot.slane %v2311_v15, 4  ;;  %v1186_v53 = vor.u32 %v1185_v52, %v1182_v59  ;;  %v7085_v15 = vld [vmem:[#allocation4 + $0x28] sm:$0xf] }
 0x23b   : > { %5336 = vmatmul.mubr.bf16.gmra.mrb[8].mxu1 %v5941_v22  ;;  %v7074_v22 = vld [vmem:[#allocation4 + $0x28] sm:$0xf]  ;;  %v1196_v30 = vor.u32 %v1195_v58, %v1191_v43  ;;  %v2332_v28 = vshrl.u32 %v7085_v15, 16 }
 0x23c   : > { %5352 = vmatpush3.bf16.msra.mxu1 %v5942_v44  ;;  %5339 = vmatprep.mubr.bf16.mxu1 %v5946_v27  ;;  %v2307_v56 = vsel %vm7027_vm10, %v2302_v18, %v2306_v57  ;;  %v1204_v44 = vshrl.u32 %v7072_v50, 16  ;;  %v1207_v27 = vshll.u32 %v7072_v50, 16  ;;  %v1213_v29 = vshll.u32 %v7074_v22, 16 }
 0x23d   : > { %5353 = vmatprep.subr.bf16.mxu1 %v5944_v26  ;;  %5250 = vmatpush3.bf16.msra.mxu0 %v5953_v24  ;;  %v2317_v25 = vsel %vm7027_vm10, %v2312_v38, %v2316_v55  ;;  %v1217_v24 = vshrl.u32 %v7074_v22, 16  ;;  %v1187_v59 = vrot.slane %v1186_v53, 4  ;;  %v1197_v58 = vrot.slane %v1196_v30, 4  ;;  %v7091_v55 = vld [vmem:[#allocation4 + $0x34] sm:$0xf] }
 0x23e   : > { %5251 = vmatprep.subr.bf16.mxu0 %v5955_v41  ;;  %v1206_v57 = vrot.slane %v1204_v44, 4  ;;  %v1209_v18 = vrot.slane %v1207_v27, 5  ;;  %v7087_v52 = vcombine.low %v2307_v56, %v2317_v25  ;;  %v1215_v40 = vrot.slane %v1213_v29, 5  ;;  %v5959_v44 = vld [vmem:[#allocation8 + $0x20] sm:$0xff]  }
 0x23f   : > { %v1219_v17 = vrot.slane %v1217_v24, 4  ;;  %v2319_v38 = vshrl.u32 %v2252_v54, 16  ;;  %v5952_v27 = vld [vmem:[#allocation8 + $0x140] sm:$0xff]   ;;  %v1192_v56 = vsel %vm7027_vm10, %v1187_v59, %v1191_v43  ;;  %v1202_v53 = vsel %vm7027_vm10, %v1197_v58, %v1201_v39 }
 0x240   : > { %5354 = vmatpush3.bf16.msra.mxu1 %v5944_v26  ;;  %v1210_v26 = vor.u32 %v1209_v18, %v1206_v57  ;;  %v2322_v30 = vshll.u32 %v2252_v54, 16  ;;  %v2328_v29 = vshll.u32 %v7085_v15, 16  ;;  %v4739_v19 = vcombine.low %v1192_v56, %v1202_v53  ;;  %v7099_v43 = vld [vmem:[#allocation4 + $0x38] sm:$0x1] }
 0x241   : > { %5355 = vmatprep.subr.bf16.mxu1 %v5948_v62  ;;  %5252 = vmatpush3.bf16.msra.mxu0 %v5955_v41  ;;  %v1220_v25 = vor.u32 %v1219_v17, %v1215_v40  ;;  %v1225_v57 = vrot.slane %v1223_v36, 5  ;;  %v2321_v18 = vrot.slane %v2319_v38, 4  ;;  %v2334_v17 = vrot.slane %v2332_v28, 4 }
 0x242   : > { %5253 = vmatprep.subr.bf16.mxu0 %v5957_v51  ;;  %v1211_v41 = vrot.slane %v1210_v26, 4  ;;  %v2330_v24 = vrot.slane %v2328_v29, 5  ;;  %5235 = vmatprep.mubr.bf16.mxu0 %v4739_v19  ;;  %v2346_v36 = vshll.u32 %v2255_v23, 16  ;;  %v2352_v58 = vshll.u32 %v7091_v55, 16  ;;  %v7105_v26 = vld [vmem:[#allocation4 + $0x30] sm:$0xf] }
 0x243   : > { %5340 = vmatmul.mubr.bf16.gmra.mrb[12].mxu1 %v5947_v35  ;;  %v2324_v35 = vrot.slane %v2322_v30, 5  ;;  %v1221_v54 = vrot.slane %v1220_v25, 4  ;;  %v5961_v30 = vld [vmem:[#allocation8 + $0x28] sm:$0xff]   ;;  %v5963_v25 = vld [vmem:[#allocation8 + $0x30] sm:$0xff]  }
 0x244   : > { %5356 = vmatpush3.bf16.msra.mxu1 %v5948_v62  ;;  %5359 = vmatprep.mubr.bf16.mxu1 %v4809_v32  ;;  %v1216_v39 = vsel %vm7027_vm10, %v1211_v41, %v1215_v40  ;;  %v2338_v62 = vshll.u32 %v7089_v33, 16  ;;  %v2343_v32 = vshrl.u32 %v2255_v23, 16  ;;  %v2356_v40 = vshrl.u32 %v7091_v55, 16  ;;  %v5954_v29 = vld [vmem:[#allocation8 + $0x148] sm:$0xff]   ;;  %v7110_v41 = vld [vmem:[#allocation4 + $0x34] sm:$0xf] }
 0x245   : > { %5357 = vmatprep.subr.bf16.mxu1 %v5950_v0  ;;  %5254 = vmatpush3.bf16.msra.mxu0 %v5957_v51  ;;  %v2325_v59 = vor.u32 %v2324_v35, %v2321_v18  ;;  %v1226_v38 = vsel %vm7027_vm10, %v1221_v54, %v1225_v57  ;;  %v2335_v28 = vor.u32 %v2334_v17, %v2330_v24  ;;  %v2348_v23 = vrot.slane %v2346_v36, 5 }
 0x246   : > { %5255 = vmatprep.subr.bf16.mxu0 %v5959_v44  ;;  %v2340_v56 = vrot.slane %v2338_v62, 5  ;;  %v2345_v53 = vrot.slane %v2343_v32, 4  ;;  %v4740_v51 = vcombine.low %v1216_v39, %v1226_v38  ;;  %v2354_v18 = vrot.slane %v2352_v58, 5 }
 0x247   : > { %v2326_v19 = vrot.slane %v2325_v59, 4  ;;  %v2358_v35 = vrot.slane %v2356_v40, 4  ;;  %v1228_v57 = vshrl.u32 %v7105_v26, 16  ;;  %v2336_v54 = vrot.slane %v2335_v28, 4  ;;  %v7120_v59 = vld [vmem:[#allocation4 + $0x3c] sm:$0xf] }
 0x248   : > { %5358 = vmatpush3.bf16.msra.mxu1 %v5950_v0  ;;  %v2362_v0 = vshll.u32 %v7099_v43, 16  ;;  %5236 = vmatmul.mubr.bf16.gmra.mrb[24].mxu0 %v4740_v51  ;;  %v2349_v62 = vor.u32 %v2348_v23, %v2345_v53  ;;  %v1231_v32 = vshll.u32 %v7105_v26, 16  ;;  %v1237_v38 = vshll.u32 %v7110_v41, 16  ;;  %v5956_v40 = vld [vmem:[#allocation8 + $0x150] sm:$0xff]   ;;  %v7126_v51 = vld [vmem:[#allocation4 + $0x40] sm:$0xf] }
 0x249   : > { %5375 = vmatprep.subr.bf16.mxu1 %v5952_v27  ;;  %5256 = vmatpush3.bf16.msra.mxu0 %v5959_v44  ;;  %v2331_v39 = vsel %vm7027_vm10, %v2326_v19, %v2330_v24  ;;  %v2359_v17 = vor.u32 %v2358_v35, %v2354_v18  ;;  %v1230_v58 = vrot.slane %v1228_v57, 4  ;;  %v1241_v53 = vshrl.u32 %v7110_v41, 16 }
 0x24a   : > { %v2364_v36 = vrot.slane %v2362_v0, 5  ;;  %5257 = vmatprep.subr.bf16.mxu0 %v5961_v30  ;;  %v2350_v44 = vrot.slane %v2349_v62, 4  ;;  %v1233_v24 = vrot.slane %v1231_v32, 5  ;;  %v1247_v23 = vshll.u32 %v7113_v16, 16  ;;  %v5958_v62 = vld [vmem:[#allocation8 + $0x158] sm:$0xff]  }
 0x24b   : > { %5360 = vmatmul.mubr.bf16.vlgmr.msra.gmra.mrb[0].mxu1 %v7087_v52  ;;  %v2341_v52 = vsel %vm7027_vm10, %v2336_v54, %v2340_v56  ;;  %v2360_v28 = vrot.slane %v2359_v17, 4  ;;  %v1243_v57 = vrot.slane %v1241_v53, 4  ;;  %v1252_v56 = vshrl.u32 %v7120_v59, 16  ;;  %v5965_v54 = vld [vmem:[#allocation8 + $0x38] sm:$0xff]  }
 0x24c   : > { %5376 = vmatpush3.bf16.msra.mxu1 %v5952_v27  ;;  %v4811_v19 = vcombine.low %v2331_v39, %v2341_v52  ;;  %v1239_v27 = vrot.slane %v1237_v38, 5  ;;  %v2355_v35 = vsel %vm7027_vm10, %v2350_v44, %v2354_v18  ;;  %v1234_v0 = vor.u32 %v1233_v24, %v1230_v58  ;;  %v2258_v18 = vld [vmem:[#allocation4 + $0x3c] sm:$0xf]  ;;  %v7138_v24 = vld [vmem:[#allocation4 + $0x40] sm:$0xf] }
 0x24d   : > { %5377 = vmatprep.subr.bf16.mxu1 %v5954_v29  ;;  %5258 = vmatpush3.bf16.msra.mxu0 %v5961_v30  ;;  %v2365_v39 = vsel %vm7027_vm10, %v2360_v28, %v2364_v36  ;;  %v1249_v32 = vrot.slane %v1247_v23, 5  ;;  %v1255_v30 = vshll.u32 %v7120_v59, 16  ;;  %v1261_v17 = vshll.u32 %v7126_v51, 16  ;;  %v7142_v28 = vld [vmem:[#allocation4 + $0x44] sm:$0x1] }
 0x24e   : > { %5259 = vmatprep.subr.bf16.mxu0 %v5963_v25  ;;  %5363 = vmatprep.mubr.bf16.mxu1 %v4811_v19  ;;  %v4812_v58 = vcombine.low %v2355_v35, %v2365_v39  ;;  %v1235_v38 = vrot.slane %v1234_v0, 4  ;;  %v1244_v52 = vor.u32 %v1243_v57, %v1239_v27  ;;  %v1254_v44 = vrot.slane %v1252_v56, 4  ;;  %v2261_v23 = vld [vmem:[#allocation4 + $0x48] sm:$0xf]  ;;  %v7146_v56 = vld [vmem:[#allocation4 + $0x4c] sm:$0xf] }
 0x24f   : > { %v1257_v53 = vrot.slane %v1255_v30, 5  ;;  %v1265_v19 = vshrl.u32 %v7126_v51, 16  ;;  %v1271_v36 = vshll.u32 %v7131_v13, 16  ;;  %v2367_v0 = vshrl.u32 %v2258_v18, 16  ;;  %v7148_v30 = vld [vmem:[#allocation8 + $0x80] sm:$0xff]  }
 0x250   : > { %5378 = vmatpush3.bf16.msra.mxu1 %v5954_v29  ;;  %v1263_v29 = vrot.slane %v1261_v17, 5  ;;  %v1240_v35 = vsel %vm7027_vm10, %v1235_v38, %v1239_v27  ;;  %v1245_v39 = vrot.slane %v1244_v52, 4  ;;  %v2370_v57 = vshll.u32 %v2258_v18, 16  ;;  %v5960_v18 = vld [vmem:[#allocation8 + $0x160] sm:$0xff]   ;;  %v7199_v13 = vld [vmem:[#allocation4 + $0x64] sm:$0xf] }
 0x251   : > { %5379 = vmatprep.subr.bf16.mxu1 %v5956_v40  ;;  %5260 = vmatpush3.bf16.msra.mxu0 %v5963_v25  ;;  %v1258_v17 = vor.u32 %v1257_v53, %v1254_v44  ;;  %v1267_v14 = vrot.slane %v1265_v19, 4  ;;  %v1273_v11 = vrot.slane %v1271_v36, 5  ;;  %v2376_v12 = vshll.u32 %v7138_v24, 16 }
 0x252   : > { %5261 = vmatprep.subr.bf16.mxu0 %v5965_v54  ;;  %v1250_v25 = vsel %vm7027_vm10, %v1245_v39, %v1249_v32  ;;  %v2372_v27 = vrot.slane %v2370_v57, 5  ;;  %v2380_v38 = vshrl.u32 %v7138_v24, 16  ;;  %v2386_v53 = vshll.u32 %v7142_v28, 16  ;;  %v7158_v39 = vld [vmem:[#allocation4 + $0x50] sm:$0x1] }
 0x253   : > { %5364 = vmatmul.mubr.bf16.gmra.mrb[4].mxu1 %v4812_v58  ;;  %v2369_v58 = vrot.slane %v2367_v0, 4  ;;  %v4741_v52 = vcombine.low %v1240_v35, %v1250_v25  ;;  %v1259_v9 = vrot.slane %v1258_v17, 4  ;;  %v1268_v10 = vor.u32 %v1267_v14, %v1263_v29  ;;  %v5962_v17 = vld [vmem:[#allocation8 + $0x168] sm:$0xff]   ;;  %v7161_v25 = vld [vmem:[#allocation4 + $0x48] sm:$0xf] }
 0x254   : > { %5380 = vmatpush3.bf16.msra.mxu1 %v5956_v40  ;;  %v2378_v7 = vrot.slane %v2376_v12, 5  ;;  %v2382_v44 = vrot.slane %v2380_v38, 4  ;;  %v2391_v19 = vshrl.u32 %v2261_v23, 16  ;;  %v2394_v35 = vshll.u32 %v2261_v23, 16 }
 0x255   : > { %5381 = vmatprep.subr.bf16.mxu1 %v5958_v62  ;;  %5262 = vmatpush3.bf16.msra.mxu0 %v5965_v54  ;;  %v2373_v40 = vor.u32 %v2372_v27, %v2369_v58  ;;  %v1264_v32 = vsel %vm7027_vm10, %v1259_v9, %v1263_v29  ;;  %v1269_v36 = vrot.slane %v1268_v10, 4  ;;  %v2400_v14 = vshll.u32 %v7146_v56, 16  ;;  %v7166_v10 = vld [vmem:[#allocation4 + $0x4c] sm:$0xf] }
 0x256   : > { %5279 = vmatprep.subr.bf16.mxu0 %v7148_v30  ;;  %5239 = vmatprep.mubr.bf16.mxu0 %v4741_v52  ;;  %v2383_v54 = vor.u32 %v2382_v44, %v2378_v7  ;;  %v2388_v0 = vrot.slane %v2386_v53, 5  ;;  %v2393_v57 = vrot.slane %v2391_v19, 4  ;;  %v2396_v58 = vrot.slane %v2394_v35, 5 }
 0x257   : > { %v2374_v12 = vrot.slane %v2373_v40, 4  ;;  %v2402_v27 = vrot.slane %v2400_v14, 5  ;;  %v2404_v9 = vshrl.u32 %v7146_v56, 16  ;;  %v2410_v52 = vshll.u32 %v7158_v39, 16  ;;  %v7171_v40 = vld [vmem:[#allocation4 + $0x50] sm:$0x1] }
 0x258   : > { %5382 = vmatpush3.bf16.msra.mxu1 %v5958_v62  ;;  %v1274_v62 = vsel %vm7027_vm10, %v1269_v36, %v1273_v11  ;;  %v2384_v38 = vrot.slane %v2383_v54, 4  ;;  %7987 = vst [vmem:[#allocation65_spill] sm:$0xff] %v7171_v40  ;;  %v2397_v44 = vor.u32 %v2396_v58, %v2393_v57  ;;  %v1276_v11 = vshrl.u32 %v7161_v25, 16  ;;  %v7179_v14 = vld [vmem:[#allocation4 + $0x54] sm:$0xf] }
 0x259   : > { %5383 = vmatprep.subr.bf16.mxu1 %v5960_v18  ;;  %v4742_v29 = vcombine.low %v1264_v32, %v1274_v62  ;;  %v2379_v23 = vsel %vm7027_vm10, %v2374_v12, %v2378_v7  ;;  %v2406_v53 = vrot.slane %v2404_v9, 4  ;;  %v1279_v19 = vshll.u32 %v7161_v25, 16  ;;  %v5964_v12 = vld [vmem:[#allocation8 + $0x170] sm:$0xff]   ;;  %v7181_v58 = vld [vmem:[#allocation4 + $0x58] sm:$0xf] }
 0x25a   : > { %v2389_v36 = vsel %vm7027_vm10, %v2384_v38, %v2388_v0  ;;  %v2412_v32 = vrot.slane %v2410_v52, 5  ;;  %v1285_v7 = vshll.u32 %v7166_v10, 16  ;;  %v1289_v35 = vshrl.u32 %v7166_v10, 16  ;;  %v7184_v38 = vld [vmem:[#allocation4 + $0x5c] sm:$0x1] }
 0x25b   : > { %5240 = vmatmul.mubr.bf16.gmra.mrb[28].mxu0 %v4742_v29  ;;  %v4813_v54 = vcombine.low %v2379_v23, %v2389_v36  ;;  %v2398_v57 = vrot.slane %v2397_v44, 4  ;;  %v1278_v62 = vrot.slane %v1276_v11, 4  ;;  %v1281_v9 = vrot.slane %v1279_v19, 5  ;;  %7988 = vst [vmem:[#allocation66_spill] sm:$0xff] %v7184_v38  ;;  %v5966_v11 = vld [vmem:[#allocation8 + $0x178] sm:$0xff]  }
 0x25c   : > { %5384 = vmatpush3.bf16.msra.mxu1 %v5960_v18  ;;  %v2407_v18 = vor.u32 %v2406_v53, %v2402_v27  ;;  %v1287_v29 = vrot.slane %v1285_v7, 5  ;;  %v1291_v8 = vrot.slane %v1289_v35, 4  ;;  %v1295_v0 = vshll.u32 %v7171_v40, 16  ;;  %v2264_v53 = vld [vmem:[#allocation4 + $0x54] sm:$0xf] }
 0x25d   : > { %5385 = vmatprep.subr.bf16.mxu1 %v5962_v17  ;;  %5367 = vmatprep.mubr.bf16.mxu1 %v4813_v54  ;;  %v2403_v52 = vsel %vm7027_vm10, %v2398_v57, %v2402_v27  ;;  %v1300_v23 = vshrl.u32 %v7179_v14, 16  ;;  %v1303_v44 = vshll.u32 %v7179_v14, 16  ;;  %v1282_v36 = vor.u32 %v1281_v9, %v1278_v62  ;;  %v2267_v9 = vld [vmem:[#allocation4 + $0x60] sm:$0xf] }
 0x25e   : > { %v2408_v5 = vrot.slane %v2407_v18, 4  ;;  %v1292_v19 = vor.u32 %v1291_v8, %v1287_v29  ;;  %v1297_v7 = vrot.slane %v1295_v0, 5  ;;  %v1309_v35 = vshll.u32 %v7181_v58, 16  ;;  %v7196_v8 = vld [vmem:[#allocation4 + $0x5c] sm:$0x1] }
 0x25f   : > { %v1305_v54 = vrot.slane %v1303_v44, 5  ;;  %v1313_v57 = vshrl.u32 %v7181_v58, 16  ;;  %v1283_v3 = vrot.slane %v1282_v36, 4  ;;  %v1319_v2 = vshll.u32 %v7184_v38, 16 }
 0x260   : > { %5386 = vmatpush3.bf16.msra.mxu1 %v5962_v17  ;;  %v2413_v27 = vsel %vm7027_vm10, %v2408_v5, %v2412_v32  ;;  %v1302_v17 = vrot.slane %v1300_v23, 4  ;;  %v1293_v4 = vrot.slane %v1292_v19, 4  ;;  %v1311_v62 = vrot.slane %v1309_v35, 5  ;;  %v7201_v5 = vld [vmem:[#allocation8 + $0x180] sm:$0xff]  }
 0x261   : > { %5387 = vmatprep.subr.bf16.mxu1 %v5964_v12  ;;  %v4814_v18 = vcombine.low %v2403_v52, %v2413_v27  ;;  %v1315_v1 = vrot.slane %v1313_v57, 4  ;;  %v2415_v40 = vshrl.u32 %v2264_v53, 16  ;;  %v1288_v32 = vsel %vm7027_vm10, %v1283_v3, %v1287_v29 }
 0x262   : > { %v1306_v0 = vor.u32 %v1305_v54, %v1302_v17  ;;  %v1298_v52 = vsel %vm7027_vm10, %v1293_v4, %v1297_v7  ;;  %v2418_v23 = vshll.u32 %v2264_v53, 16  ;;  %v2424_v44 = vshll.u32 %v7191_v6, 16  ;;  %v2672_v7 = vld [vmem:[#allocation4 + $0xc] sm:$0xe] }
 0x263   : > { %5368 = vmatmul.mubr.bf16.gmra.mrb[8].mxu1 %v4814_v18  ;;  %v4743_v36 = vcombine.low %v1288_v32, %v1298_v52  ;;  %v1316_v35 = vor.u32 %v1315_v1, %v1311_v62  ;;  %v1321_v27 = vrot.slane %v1319_v2, 5  ;;  %v2417_v17 = vrot.slane %v2415_v40, 4  ;;  %v7209_v18 = vld [vmem:[#allocation4 + $0x68] sm:$0x1]  ;;  %v2673_v32 = vld [vmem:[#allocation4 + $0x18] sm:$0xe] }
 0x264   : > { %5388 = vmatpush3.bf16.msra.mxu1 %v5964_v12  ;;  %v1307_v19 = vrot.slane %v1306_v0, 4  ;;  %v2420_v54 = vrot.slane %v2418_v23, 5  ;;  %v2426_v12 = vrot.slane %v2424_v44, 5  ;;  %v2428_v57 = vshrl.u32 %v7191_v6, 16 }
 0x265   : > { %5389 = vmatprep.subr.bf16.mxu1 %v5966_v11  ;;  %5243 = vmatprep.mubr.bf16.mxu0 %v4743_v36  ;;  %v1317_v4 = vrot.slane %v1316_v35, 4  ;;  %v2434_v29 = vshll.u32 %v7196_v8, 16  ;;  %v2439_v53 = vshrl.u32 %v2267_v9, 16  ;;  %v2442_v2 = vshll.u32 %v2267_v9, 16 }
 0x266   : > { %v1312_v3 = vsel %vm7027_vm10, %v1307_v19, %v1311_v62  ;;  %v2421_v0 = vor.u32 %v2420_v54, %v2417_v17  ;;  %v2430_v1 = vrot.slane %v2428_v57, 4  ;;  %v2448_v40 = vshll.u32 %v7199_v13, 16  ;;  %v6021_v54 = vld [vmem:[#allocation11 + $0x30] sm:$0xff]  }
 0x267   : > { %v1322_v52 = vsel %vm7027_vm10, %v1317_v4, %v1321_v27  ;;  %v2436_v23 = vrot.slane %v2434_v29, 5  ;;  %v2441_v44 = vrot.slane %v2439_v53, 4  ;;  %v2452_v62 = vshrl.u32 %v7199_v13, 16 }
 0x268   : > { %5390 = vmatpush3.bf16.msra.mxu1 %v5966_v11  ;;  %v4744_v36 = vcombine.low %v1312_v3, %v1322_v52  ;;  %v2422_v19 = vrot.slane %v2421_v0, 4  ;;  %v2431_v35 = vor.u32 %v2430_v1, %v2426_v12  ;;  %v2444_v11 = vrot.slane %v2442_v2, 5 }
 0x269   : > { %5407 = vmatprep.subr.bf16.mxu1 %v7201_v5  ;;  %v2450_v38 = vrot.slane %v2448_v40, 5  ;;  %v2454_v17 = vrot.slane %v2452_v62, 4  ;;  %v2458_v9 = vshll.u32 %v7209_v18, 16  ;;  %v4825_v57 = vrot.slane %v2672_v7, 9 }
 0x26a   : > { %5244 = vmatmul.mubr.bf16.gmra.mrb[32].mxu0 %v4744_v36  ;;  %v2427_v27 = vsel %vm7027_vm10, %v2422_v19, %v2426_v12  ;;  %v2432_v4 = vrot.slane %v2431_v35, 4  ;;  %v2445_v3 = vor.u32 %v2444_v11, %v2441_v44  ;;  %v2706_v29 = vrot.slane %v7032_v63, 5  ;;  %v2674_v19 = vld [vmem:[#allocation4 + $0x24] sm:$0xe] }
 0x26b   : > { %v2455_v53 = vor.u32 %v2454_v17, %v2450_v38  ;;  %v2460_v0 = vrot.slane %v2458_v9, 5  ;;  %v7991_v1 = vcombine.low %v7002_v60, %v7004_v21  ;;  %v2709_v2 = vrot.slane %v7037_v47, 5 }
 0x26c   : > { %v4826_v40 = vrot.slane %v2673_v32, 9  ;;  %v2437_v7 = vsel %vm7027_vm10, %v2432_v4, %v2436_v23  ;;  %v2446_v52 = vrot.slane %v2445_v3, 4  ;;  %v2707_v12 = vsel %vm7222_vm13, %v4825_v57, %v2706_v29  ;;  %v2675_v4 = vld [vmem:[#allocation4 + $0x30] sm:$0xe] }
 0x26d   : > { %5263 = vmatprep.mubr.bf16.mxu0 %v7991_v1  ;;  %v2708_v62 = vrot.slane %v2706_v29, 4  ;;  %v4815_v44 = vcombine.low %v2427_v27, %v2437_v7  ;;  %v2456_v36 = vrot.slane %v2455_v53, 4  ;;  %v2713_v63 = vrot.slane %v7043_v46, 5  ;;  %v5971_v46 = vld [vmem:[#allocation8 + $0x88] sm:$0xff]   ;;  %v2677_v53 = vld [vmem:[#allocation4 + $0x48] sm:$0xe] }
 0x26e   : > { %v2451_v60 = vsel %vm7027_vm10, %v2446_v52, %v2450_v38  ;;  %v4754_v21 = vcombine.low %v7013_v20, %v7015_v45  ;;  %v2716_v11 = vrot.slane %v7045_v37, 5  ;;  %v4755_v9 = vcombine.low %v7054_v34, %v7059_v31 }
 0x26f   : > { %v2710_v47 = vsel %vm7222_vm13, %v2708_v62, %v2709_v2  ;;  %5371 = vmatprep.mubr.bf16.mxu1 %v4815_v44  ;;  %v2461_v32 = vsel %vm7027_vm10, %v2456_v36, %v2460_v0  ;;  %v2715_v35 = vrot.slane %v2713_v63, 4  ;;  %v2720_v38 = vrot.slane %v7085_v15, 5  ;;  %v2676_v15 = vld [vmem:[#allocation4 + $0x3c] sm:$0xe]  ;;  %v5972_v36 = vld [vmem:[#allocation8 + $0x188] sm:$0xff]  }
 0x270   : > { %v4833_v23 = vcombine.low %v2707_v12, %v2710_v47  ;;  %v4816_v17 = vcombine.low %v2451_v60, %v2461_v32  ;;  %v4827_v57 = vrot.slane %v2674_v19, 9  ;;  %v2723_v20 = vrot.slane %v7089_v33, 5  ;;  %v5975_v33 = vld [vmem:[#allocation8 + $0x90] sm:$0xff]   ;;  %v5977_v19 = vld [vmem:[#allocation8 + $0x98] sm:$0xff]   ;;  %v5981_v32 = vld [vmem:[#allocation8 + $0xa0] sm:$0xff]  }
 0x271   : > { %v1742_v45 = vrot.slane %v7006_v49, 5  ;;  %v2722_v27 = vrot.slane %v2720_v38, 4  ;;  %v2727_v3 = vrot.slane %v7091_v55, 5  ;;  %v2714_v37 = vsel %vm7222_vm13, %v4826_v40, %v2713_v63  ;;  %v2678_v47 = vld [vmem:[#allocation4 + $0x54] sm:$0xe] }
 0x272   : > { %5372 = vmatmul.mubr.bf16.gmra.mrb[12].mxu1 %v4816_v17  ;;  %5264 = vmatmul.mubr.bf16.vlgmr.msra.gmra.mrb[20].mxu0 %v4754_v21  ;;  %v2717_v34 = vsel %vm7222_vm13, %v2715_v35, %v2716_v11  ;;  %v2734_v29 = vrot.slane %v7138_v24, 5  ;;  %v1749_v0 = vrot.slane %v7017_v42, 5  ;;  %v2721_v55 = vsel %vm7222_vm13, %v4827_v57, %v2720_v38 }
 0x273   : > { %5280 = vmatpush3.bf16.msra.mxu0 %v7148_v30  ;;  %5391 = vmatprep.mubr.bf16.mxu1 %v4833_v23  ;;  %v2724_v30 = vsel %vm7222_vm13, %v2722_v27, %v2723_v20  ;;  %v2741_v1 = vrot.slane %v7146_v56, 5  ;;  %v4834_v2 = vcombine.low %v2714_v37, %v2717_v34  ;;  %v4756_v40 = vcombine.low %v7072_v50, %v7074_v22  ;;  %v7288_v20 = vld [vmem:[#allocation4 + $0x10] sm:$0xf] }
 0x274   : > { %5281 = vmatprep.subr.bf16.mxu0 %v5971_v46  ;;  %5267 = vmatprep.mubr.bf16.mxu0 %v4755_v9  ;;  %v4828_v7 = vrot.slane %v2675_v4, 9  ;;  %v2730_v52 = vrot.slane %v7099_v43, 5  ;;  %v2729_v24 = vrot.slane %v2727_v3, 4  ;;  %v4829_v12 = vrot.slane %v2676_v15, 9  ;;  %v5976_v43 = vld [vmem:[#allocation8 + $0x190] sm:$0xff]  }
 0x275   : > { %v2737_v62 = vrot.slane %v7142_v28, 5  ;;  %v4830_v44 = vrot.slane %v2677_v53, 9  ;;  %v4835_v63 = vcombine.low %v2721_v55, %v2724_v30  ;;  %v2736_v60 = vrot.slane %v2734_v29, 4  ;;  %v2679_v28 = vld [vmem:[#allocation4 + $0x60] sm:$0xe] }
 0x276   : > { %v2743_v21 = vrot.slane %v2741_v1, 4  ;;  %v2744_v56 = vrot.slane %v7158_v39, 5  ;;  %v4757_v50 = vcombine.low %v7105_v26, %v7110_v41  ;;  %v2748_v23 = vrot.slane %v7191_v6, 5  ;;  %v1710_v26 = vld [vmem:[#allocation4] sm:$0xe] }
 0x277   : > { %5282 = vmatpush3.bf16.msra.mxu0 %v5971_v46  ;;  %v2755_v35 = vrot.slane %v7199_v13, 5  ;;  %v2728_v11 = vsel %vm7222_vm13, %v4828_v7, %v2727_v3  ;;  %v2731_v39 = vsel %vm7222_vm13, %v2729_v24, %v2730_v52  ;;  %v2735_v17 = vsel %vm7222_vm13, %v4829_v12, %v2734_v29  ;;  %v6151_v13 = vld [vmem:[#allocation4 + $0x4] sm:$0xf]  ;;  %v5978_v3 = vld [vmem:[#allocation8 + $0x198] sm:$0xff]   ;;  %v7304_v52 = vld [vmem:[#allocation4 + $0x18] sm:$0xe] }
 0x278   : > { %5283 = vmatprep.subr.bf16.mxu0 %v5975_v33  ;;  %v2738_v6 = vsel %vm7222_vm13, %v2736_v60, %v2737_v62  ;;  %v4831_v46 = vrot.slane %v2678_v47, 9  ;;  %v1739_v9 = vrot.slane %v6151_v13, 5  ;;  %v4758_v38 = vcombine.low %v7120_v59, %v7126_v51  ;;  %v5982_v12 = vld [vmem:[#allocation8 + $0x1a0] sm:$0xff]   ;;  %v5987_v62 = vld [vmem:[#allocation8 + $0xb0] sm:$0xff]  }
 0x279   : > { %v2751_v57 = vrot.slane %v7196_v8, 5  ;;  %v1746_v27 = vrot.slane %v7288_v20, 5  ;;  %v4836_v4 = vcombine.low %v2728_v11, %v2731_v39  ;;  %v7293_v37 = vsel %vm7222_vm13, %v4830_v44, %v2741_v1  ;;  %v5983_v8 = vld [vmem:[#allocation8 + $0xa8] sm:$0xff]   ;;  %v7992_v39 = vld [vmem:[#allocation64_spill] sm:$0xff] }
 0x27a   : > { %5392 = vmatmul.mubr.bf16.vlgmr.msra.gmra.mrb[0].mxu1 %v4834_v2  ;;  %5268 = vmatmul.mubr.bf16.gmra.mrb[24].mxu0 %v4756_v40  ;;  %v2750_v34 = vrot.slane %v2748_v23, 4  ;;  %v1753_v15 = vrot.slane %v7059_v31, 5  ;;  %v2745_v59 = vsel %vm7222_vm13, %v2743_v21, %v2744_v56  ;;  %v4832_v29 = vrot.slane %v2679_v28, 9  ;;  %v1714_v56 = vld [vmem:[#allocation4 + $0x30] sm:$0xe]  ;;  %v5984_v28 = vld [vmem:[#allocation8 + $0x1a8] sm:$0xff]  }
 0x27b   : > { %5408 = vmatpush3.bf16.msra.mxu1 %v7201_v5  ;;  %5284 = vmatpush3.bf16.msra.mxu0 %v5975_v33  ;;  %v7283_v5 = vld [vmem:[#allocation4 + $0xc] sm:$0xe]  ;;  %v4837_v33 = vcombine.low %v2735_v17, %v2738_v6  ;;  %v2757_v53 = vrot.slane %v2755_v35, 4  ;;  %v2758_v55 = vrot.slane %v7209_v18, 5  ;;  %v4769_v30 = vrot.slane %v1710_v26, 9  ;;  %v5989_v17 = vld [vmem:[#allocation8 + $0xb8] sm:$0xff]  }
 0x27c   : > { %5409 = vmatprep.subr.bf16.mxu1 %v5972_v36  ;;  %5395 = vmatprep.mubr.bf16.mxu1 %v4835_v63  ;;  %v1741_v2 = vrot.slane %v1739_v9, 4  ;;  %v4770_v1 = vrot.slane %v7283_v5, 9  ;;  %v4759_v40 = vcombine.low %v7161_v25, %v7166_v10  ;;  %v1748_v7 = vrot.slane %v1746_v27, 4 }
 0x27d   : > { %5285 = vmatprep.subr.bf16.mxu0 %v5977_v19  ;;  %5271 = vmatprep.mubr.bf16.mxu0 %v4757_v50  ;;  %v1756_v24 = vrot.slane %v7064_v48, 5  ;;  %v4760_v18 = vcombine.low %v7179_v14, %v7181_v58  ;;  %v1755_v44 = vrot.slane %v1753_v15, 4  ;;  %v4838_v25 = vcombine.low %v7293_v37, %v2745_v59 }
 0x27e   : > { %v2749_v63 = vsel %vm7222_vm13, %v4831_v46, %v2748_v23  ;;  %v7319_v14 = vsel %vm7222_vm13, %v4832_v29, %v2755_v35  ;;  %v1740_v60 = vsel %vm7222_vm13, %v4769_v30, %v1739_v9  ;;  %v1743_v21 = vsel %vm7222_vm13, %v1741_v2, %v1742_v45  ;;  %v1715_v23 = vld [vmem:[#allocation4 + $0x3c] sm:$0xe]  ;;  %v7993_v46 = vld [vmem:[#allocation65_spill] sm:$0xff]  ;;  %v7994_v29 = vld [vmem:[#allocation66_spill] sm:$0xff] }
 0x27f   : > { %5410 = vmatpush3.bf16.msra.mxu1 %v5972_v36  ;;  %5286 = vmatpush3.bf16.msra.mxu0 %v5977_v19  ;;  %v1760_v36 = vrot.slane %v7074_v22, 5  ;;  %v2752_v19 = vsel %vm7222_vm13, %v2750_v34, %v2751_v57  ;;  %v4771_v50 = vrot.slane %v7304_v52, 9  ;;  %v4773_v47 = vrot.slane %v1714_v56, 9  ;;  %v7403_v56 = vld [vmem:[#allocation4 + $0x1c] sm:$0xf] }
 0x280   : > { %5411 = vmatprep.subr.bf16.mxu1 %v5976_v43  ;;  %5287 = vmatprep.subr.bf16.mxu0 %v5981_v32  ;;  %v4774_v35 = vrot.slane %v1715_v23, 9  ;;  %v1774_v11 = vrot.slane %v7126_v51, 5  ;;  %v1777_v49 = vrot.slane %v7992_v39, 5  ;;  %v1781_v26 = vrot.slane %v7166_v10, 5 }
 0x281   : > { %v4839_v45 = vcombine.low %v2749_v63, %v2752_v19  ;;  %v2759_v51 = vsel %vm7222_vm13, %v2757_v53, %v2758_v55  ;;  %v4777_v5 = vcombine.low %v1740_v60, %v1743_v21  ;;  %v1750_v57 = vsel %vm7222_vm13, %v1748_v7, %v1749_v0  ;;  %v1717_v0 = vld [vmem:[#allocation4 + $0x54] sm:$0xe]  ;;  %v5988_v55 = vld [vmem:[#allocation8 + $0x1b0] sm:$0xff]   ;;  %v5993_v19 = vld [vmem:[#allocation8 + $0x1c0] sm:$0xff]  }
 0x282   : > { %5396 = vmatmul.mubr.bf16.gmra.mrb[4].mxu1 %v4836_v4  ;;  %5272 = vmatmul.mubr.bf16.gmra.mrb[28].mxu0 %v4758_v38  ;;  %v7342_v13 = vsel %vm7222_vm13, %v4774_v35, %v1774_v11  ;;  %v1776_v10 = vrot.slane %v1774_v11, 4  ;;  %v1783_v9 = vrot.slane %v1781_v26, 4  ;;  %v1747_v38 = vsel %vm7222_vm13, %v4770_v1, %v1746_v27  ;;  %v1716_v27 = vld [vmem:[#allocation4 + $0x48] sm:$0xe]  ;;  %v3213_v21 = vld [vmem:[#allocation4 + $0x18] sm:$0xf] }
 0x283   : > { %5412 = vmatpush3.bf16.msra.mxu1 %v5976_v43  ;;  %5288 = vmatpush3.bf16.msra.mxu0 %v5981_v32  ;;  %v1767_v43 = vrot.slane %v7110_v41, 5  ;;  %v1770_v32 = vrot.slane %v7113_v16, 5  ;;  %v1784_v16 = vrot.slane %v7993_v46, 5  ;;  %v1788_v34 = vrot.slane %v7181_v58, 5  ;;  %v7407_v35 = vld [vmem:[#allocation4 + $0x20] sm:$0x1] }
 0x284   : > { %5413 = vmatprep.subr.bf16.mxu1 %v5978_v3  ;;  %5399 = vmatprep.mubr.bf16.mxu1 %v4837_v33  ;;  %v7360_v20 = vsel %vm7222_vm13, %v1776_v10, %v1777_v49  ;;  %v4775_v59 = vrot.slane %v1716_v27, 9  ;;  %v1791_v53 = vrot.slane %v7994_v29, 5  ;;  %v1757_v30 = vsel %vm7222_vm13, %v1755_v44, %v1756_v24  ;;  %v3216_v11 = vld [vmem:[#allocation4 + $0x24] sm:$0xf]  ;;  %v3219_v46 = vld [vmem:[#allocation4 + $0x30] sm:$0xf] }
 0x285   : > { %5289 = vmatprep.subr.bf16.mxu0 %v5983_v8  ;;  %5275 = vmatprep.mubr.bf16.mxu0 %v4759_v40  ;;  %v7335_v6 = vsel %vm7222_vm13, %v4773_v47, %v1767_v43  ;;  %v1769_v41 = vrot.slane %v1767_v43, 4  ;;  %v7364_v42 = vsel %vm7222_vm13, %v1783_v9, %v1784_v16  ;;  %v4782_v33 = vcombine.low %v7342_v13, %v7360_v20  ;;  %v5995_v43 = vld [vmem:[#allocation4 + $0x30] sm:$0xff]   ;;  %v5996_v16 = vld [vmem:[#allocation4 + $0x3c] sm:$0xff]   ;;  %v7436_v20 = vld [vmem:[#allocation4 + $0x38] sm:$0x1] }
 0x286   : > { %v1790_v2 = vrot.slane %v1788_v34, 4  ;;  %v1754_v58 = vsel %vm7222_vm13, %v4771_v50, %v1753_v15  ;;  %v7380_v1 = vsel %vm7222_vm13, %v4775_v59, %v1781_v26  ;;  %v4840_v48 = vcombine.low %v7319_v14, %v2759_v51  ;;  %v5991_v15 = vld [vmem:[#allocation4 + $0x18] sm:$0xff]   ;;  %v5992_v50 = vld [vmem:[#allocation4 + $0x24] sm:$0xff]   ;;  %v7417_v9 = vld [vmem:[#allocation4 + $0x34] sm:$0xf] }
 0x287   : > { %5414 = vmatpush3.bf16.msra.mxu1 %v5978_v3  ;;  %5290 = vmatpush3.bf16.msra.mxu0 %v5983_v8  ;;  %v7354_v4 = vsel %vm7222_vm13, %v1769_v41, %v1770_v32  ;;  %v1713_v3 = vld [vmem:[#allocation4 + $0x24] sm:$0xe]  ;;  %v4776_v8 = vrot.slane %v1717_v0, 9  ;;  %v4778_v7 = vcombine.low %v1747_v38, %v1750_v57  ;;  %v4783_v52 = vcombine.low %v7380_v1, %v7364_v42  ;;  %v5997_v26 = vld [vmem:[#allocation8 + $0x1d0] sm:$0xff]   ;;  %v6001_v29 = vld [vmem:[#allocation8 + $0x1e0] sm:$0xff]  }
 0x288   : > { %5415 = vmatprep.subr.bf16.mxu1 %v5982_v12  ;;  %5291 = vmatprep.subr.bf16.mxu0 %v5987_v62  ;;  %v4781_v37 = vcombine.low %v7335_v6, %v7354_v4  ;;  %v7391_v31 = vsel %vm7222_vm13, %v1790_v2, %v1791_v53  ;;  %v4772_v24 = vrot.slane %v1713_v3, 9  ;;  %v4779_v63 = vcombine.low %v1754_v58, %v1757_v30  ;;  %v7414_v41 = vld [vmem:[#allocation4 + $0x28] sm:$0xf]  ;;  %v5998_v4 = vld [vmem:[#allocation8 + $0x1d8] sm:$0xff]   ;;  %v3222_v30 = vld [vmem:[#allocation4 + $0x3c] sm:$0xf] }
 0x289   : > { %v7384_v40 = vsel %vm7222_vm13, %v4776_v8, %v1788_v34  ;;  %v3238_v32 = vshrl.u32 %v3213_v21, 16  ;;  %v3241_v23 = vshll.u32 %v3213_v21, 16  ;;  %v3247_v22 = vshll.u32 %v7403_v56, 16  ;;  %v7422_v34 = vld [vmem:[#allocation4 + $0x2c] sm:$0x1] }
 0x28a   : > { %5400 = vmatmul.mubr.bf16.gmra.mrb[8].mxu1 %v4838_v25  ;;  %5276 = vmatmul.mubr.bf16.gmra.mrb[32].mxu0 %v4760_v18  ;;  %v6153_v18 = vld [vmem:[#allocation4 + $0x2c] sm:$0x1]  ;;  %v4784_v44 = vcombine.low %v7384_v40, %v7391_v31  ;;  %v5990_v25 = vld [vmem:[#allocation8 + $0x1b8] sm:$0xff]   ;;  %v1761_v14 = vsel %vm7222_vm13, %v4772_v24, %v1760_v36  ;;  %v3257_v51 = vshll.u32 %v7407_v35, 16  ;;  %v3262_v10 = vshrl.u32 %v3216_v11, 16 }
 0x28b   : > { %5416 = vmatpush3.bf16.msra.mxu1 %v5982_v12  ;;  %5292 = vmatpush3.bf16.msra.mxu0 %v5987_v62  ;;  %v1762_v12 = vrot.slane %v1760_v36, 4  ;;  %v1763_v62 = vrot.slane %v6153_v18, 5  ;;  %v3251_v36 = vshrl.u32 %v7403_v56, 16  ;;  %v3240_v39 = vrot.slane %v3238_v32, 4  ;;  %v6000_v24 = vld [vmem:[#allocation4 + $0x54] sm:$0xff]   ;;  %v6003_v18 = vld [vmem:[#allocation4 + $0x60] sm:$0xff]  }
 0x28c   : > { %5417 = vmatprep.subr.bf16.mxu1 %v5984_v28  ;;  %5403 = vmatprep.mubr.bf16.mxu1 %v4839_v45  ;;  %v3243_v49 = vrot.slane %v3241_v23, 5  ;;  %v7412_v45 = vrot.slane %v3247_v22, 5  ;;  %v3265_v57 = vshll.u32 %v3216_v11, 16  ;;  %v3271_v3 = vshll.u32 %v7414_v41, 16  ;;  %v7445_v1 = vld [vmem:[#allocation4 + $0x4c] sm:$0xf] }
 0x28d   : > { %5293 = vmatprep.subr.bf16.mxu0 %v5989_v17  ;;  %5295 = vmatprep.mubr.bf16.mxu0 %v4777_v5  ;;  %v1764_v60 = vsel %vm7222_vm13, %v1762_v12, %v1763_v62  ;;  %v5999_v5 = vld [vmem:[#allocation4 + $0x48] sm:$0xff]   ;;  %v3275_v6 = vshrl.u32 %v7414_v41, 16  ;;  %v3286_v27 = vshrl.u32 %v3219_v46, 16  ;;  %v3289_v0 = vshll.u32 %v3219_v46, 16  ;;  %v7463_v31 = vld [vmem:[#allocation4 + $0x50] sm:$0x1] }
 0x28e   : > { %v4780_v47 = vcombine.low %v1761_v14, %v1764_v60  ;;  %v3244_v38 = vor.u32 %v3243_v49, %v3240_v39  ;;  %v3295_v59 = vshll.u32 %v7417_v9, 16  ;;  %v3299_v8 = vshrl.u32 %v7417_v9, 16  ;;  %v3225_v12 = vld [vmem:[#allocation4 + $0x48] sm:$0xf] }
 0x28f   : > { %5418 = vmatpush3.bf16.msra.mxu1 %v5984_v28  ;;  %5294 = vmatpush3.bf16.msra.mxu0 %v5989_v17  ;;  %v5994_v28 = vld [vmem:[#allocation8 + $0x1c8] sm:$0xff]   ;;  %v3253_v17 = vrot.slane %v3251_v36, 4  ;;  %v3259_v53 = vrot.slane %v3257_v51, 5  ;;  %v3267_v58 = vrot.slane %v3265_v57, 5  ;;  %v3291_v62 = vrot.slane %v3289_v0, 5  ;;  %v6004_v0 = vld [vmem:[#allocation4 + $0x6c] sm:$0xff]  }
 0x290   : > { %5419 = vmatprep.subr.bf16.mxu1 %v5988_v55  ;;  %v3245_v2 = vrot.slane %v3244_v38, 4  ;;  %v3310_v14 = vshrl.u32 %v3222_v30, 16  ;;  %v3281_v60 = vshll.u32 %v7422_v34, 16  ;;  %v3313_v21 = vshll.u32 %v3222_v30, 16  ;;  %v6006_v30 = vld [vmem:[#allocation8 + $0x1f8] sm:$0xff]  }
 0x291   : > { %v3305_v39 = vshll.u32 %v7436_v20, 16  ;;  %v3347_v46 = vshrl.u32 %v7445_v1, 16 }
 0x292   : > { %5404 = vmatmul.mubr.bf16.gmra.mrb[12].mxu1 %v4840_v48  ;;  %5296 = vmatmul.mubr.bf16.vlgmr.msra.gmra.mrb[20].mxu0 %v4778_v7  ;;  %v7429_v48 = vrot.slane %v3271_v3, 5  ;;  %v3277_v7 = vrot.slane %v3275_v6, 4  ;;  %v3250_v32 = vsel %vm7027_vm10, %v3245_v2, %v7412_v45  ;;  %v3312_v49 = vrot.slane %v3310_v14, 4 }
 0x293   : > { %5420 = vmatpush3.bf16.msra.mxu1 %v5988_v55  ;;  %5423 = vmatprep.mubr.bf16.mxu1 %v5991_v15  ;;  %v3264_v55 = vrot.slane %v3262_v10, 4  ;;  %v7431_v15 = vld [vmem:[#allocation4 + $0x40] sm:$0xf]  ;;  %v3283_v40 = vrot.slane %v3281_v60, 5  ;;  %v6007_v60 = vld [vmem:[#allocation8 + $0x200] sm:$0xff]  }
 0x294   : > { %5421 = vmatprep.subr.bf16.mxu1 %v5990_v25  ;;  %5299 = vmatprep.mubr.bf16.mxu0 %v4779_v63  ;;  %v3301_v63 = vrot.slane %v3299_v8, 4  ;;  %v3323_v42 = vshrl.u32 %v7431_v15, 16  ;;  %v3278_v22 = vor.u32 %v3277_v7, %v7429_v48  ;;  %v3353_v7 = vshll.u32 %v7463_v31, 16 }
 0x296   : > { %v3325_v10 = vrot.slane %v3323_v42, 4  ;;  %v3279_v6 = vrot.slane %v3278_v22, 4 }
 0x297   : > { %5422 = vmatpush3.bf16.msra.mxu1 %v5990_v25  ;;  %v7438_v25 = vrot.slane %v3295_v59, 5 }
 0x298   : > { %5439 = vmatprep.subr.bf16.mxu1 %v5993_v19 }
 0x299   : > { %v3302_v11 = vor.u32 %v3301_v63, %v7438_v25 }
 0x29a   : > { %5424 = vmatmul.mubr.bf16.vlgmr.msra.gmra.mrb[0].mxu1 %v5992_v50  ;;  %5300 = vmatmul.mubr.bf16.gmra.mrb[24].mxu0 %v4780_v47  ;;  %v3319_v50 = vshll.u32 %v7431_v15, 16  ;;  %v3337_v47 = vshll.u32 %v3225_v12, 16 }
 0x29b   : > { %5440 = vmatpush3.bf16.msra.mxu1 %v5993_v19  ;;  %5427 = vmatprep.mubr.bf16.mxu1 %v5995_v43  ;;  %v7440_v19 = vld [vmem:[#allocation4 + $0x44] sm:$0x1] }
 0x29c   : > { %5441 = vmatprep.subr.bf16.mxu1 %v5994_v28  ;;  %5303 = vmatprep.mubr.bf16.mxu0 %v4781_v37  ;;  %v3254_v37 = vor.u32 %v3253_v17, %v7412_v45  ;;  %v6002_v43 = vld [vmem:[#allocation8 + $0x1e8] sm:$0xff]   ;;  %v3329_v45 = vshll.u32 %v7440_v19, 16  ;;  %v3343_v17 = vshll.u32 %v7445_v1, 16  ;;  %v7461_v51 = vrot.slane %v3319_v50, 5 }
 0x29d   : > { %v3339_v38 = vrot.slane %v3337_v47, 5 }
 0x29e   : > { %v3255_v13 = vrot.slane %v3254_v37, 4  ;;  %v3303_v37 = vrot.slane %v3302_v11, 4  ;;  %v7465_v8 = vrot.slane %v3329_v45, 5  ;;  %v3326_v2 = vor.u32 %v3325_v10, %v7461_v51  ;;  %v7494_v10 = vld [vmem:[#allocation4 + $0x70] sm:$0xf] }
 0x29f   : > { %5442 = vmatpush3.bf16.msra.mxu1 %v5994_v28  ;;  %v3268_v28 = vor.u32 %v3267_v58, %v3264_v55  ;;  %v7469_v55 = vld [vmem:[#allocation4 + $0x58] sm:$0xf] }
 0x2a0   : > { %5443 = vmatprep.subr.bf16.mxu1 %v5997_v26  ;;  %v3260_v23 = vsel %vm7027_vm10, %v3255_v13, %v3259_v53  ;;  %v3349_v53 = vrot.slane %v3347_v46, 4  ;;  %v3367_v14 = vshll.u32 %v7469_v55, 16  ;;  %v3371_v42 = vshrl.u32 %v7469_v55, 16  ;;  %v3234_v46 = vld [vmem:[#allocation4 + $0x6c] sm:$0xf] }
 0x2a1   : > { %v4865_v57 = vcombine.low %v3250_v32, %v3260_v23  ;;  %v3269_v3 = vrot.slane %v3268_v28, 4 }
 0x2a2   : > { %5428 = vmatmul.mubr.bf16.gmra.mrb[4].mxu1 %v5996_v16  ;;  %5304 = vmatmul.mubr.bf16.gmra.mrb[28].mxu0 %v4782_v33  ;;  %v3288_v33 = vrot.slane %v3286_v27, 4  ;;  %v6005_v16 = vld [vmem:[#allocation8 + $0x1f0] sm:$0xff]   ;;  %v3307_v27 = vrot.slane %v3305_v39, 5  ;;  %v7492_v39 = vrot.slane %v3367_v14, 5 }
 0x2a3   : > { %5444 = vmatpush3.bf16.msra.mxu1 %v5997_v26  ;;  %5431 = vmatprep.mubr.bf16.mxu1 %v5999_v5  ;;  %v3315_v26 = vrot.slane %v3313_v21, 5  ;;  %v3274_v13 = vsel %vm7027_vm10, %v3269_v3, %v7429_v48 }
 0x2a4   : > { %5445 = vmatprep.subr.bf16.mxu1 %v5998_v4  ;;  %5307 = vmatprep.mubr.bf16.mxu0 %v4783_v52  ;;  %v3334_v52 = vshrl.u32 %v3225_v12, 16  ;;  %v3292_v36 = vor.u32 %v3291_v62, %v3288_v33  ;;  %v3231_v33 = vld [vmem:[#allocation4 + $0x60] sm:$0xf]  ;;  %v7476_v12 = vld [vmem:[#allocation4 + $0x64] sm:$0xf]  ;;  %v3308_v21 = vsel %vm7027_vm10, %v3303_v37, %v3307_v27 }
 0x2a5   : > { %v3316_v59 = vor.u32 %v3315_v26, %v3312_v49  ;;  %v3382_v23 = vshrl.u32 %v3231_v33, 16  ;;  %v3385_v28 = vshll.u32 %v3231_v33, 16  ;;  %v3391_v22 = vshll.u32 %v7476_v12, 16  ;;  %v6008_v26 = vld [vmem:[#allocation8 + $0x208] sm:$0xff]  }
 0x2a6   : > { %v3336_v5 = vrot.slane %v3334_v52, 4  ;;  %v3327_v52 = vrot.slane %v3326_v2, 4  ;;  %v6009_v2 = vld [vmem:[#allocation8 + $0x210] sm:$0xff]  }
 0x2a7   : > { %5446 = vmatpush3.bf16.msra.mxu1 %v5998_v4  ;;  %v3293_v4 = vrot.slane %v3292_v36, 4  ;;  %v3317_v50 = vrot.slane %v3316_v59, 4  ;;  %v3395_v36 = vshrl.u32 %v7476_v12, 16 }
 0x2a8   : > { %5447 = vmatprep.subr.bf16.mxu1 %v6001_v29  ;;  %v3340_v58 = vor.u32 %v3339_v38, %v3336_v5  ;;  %v3384_v5 = vrot.slane %v3382_v23, 4  ;;  %v3387_v38 = vrot.slane %v3385_v28, 5 }
 0x2a9   : > { %v3298_v62 = vsel %vm7027_vm10, %v3293_v4, %v7438_v25  ;;  %v7488_v25 = vld [vmem:[#allocation4 + $0x5c] sm:$0x1]  ;;  %v3397_v3 = vrot.slane %v3395_v36, 4  ;;  %v7503_v4 = vld [vmem:[#allocation4 + $0x68] sm:$0x1] }
 0x2aa   : > { %5432 = vmatmul.mubr.bf16.gmra.mrb[8].mxu1 %v6000_v24  ;;  %5308 = vmatmul.mubr.bf16.gmra.mrb[32].mxu0 %v4784_v44  ;;  %v3228_v44 = vld [vmem:[#allocation4 + $0x54] sm:$0xf]  ;;  %v3341_v47 = vrot.slane %v3340_v58, 4  ;;  %v3388_v58 = vor.u32 %v3387_v38, %v3384_v5  ;;  %v6011_v36 = vld [vmem:[#allocation8 + $0x220] sm:$0xff]   ;;  %v6012_v38 = vld [vmem:[#allocation8 + $0x228] sm:$0xff]  }
 0x2ab   : > { %5448 = vmatpush3.bf16.msra.mxu1 %v6001_v29  ;;  %5435 = vmatprep.mubr.bf16.mxu1 %v6003_v18  ;;  %v7467_v29 = vrot.slane %v3343_v17, 5  ;;  %v3358_v24 = vshrl.u32 %v3228_v44, 16  ;;  %v3284_v18 = vsel %vm7027_vm10, %v3279_v6, %v3283_v40  ;;  %v3361_v63 = vshll.u32 %v3228_v44, 16 }
 0x2ac   : > { %5449 = vmatprep.subr.bf16.mxu1 %v6002_v43  ;;  %v4866_v49 = vcombine.low %v3274_v13, %v3284_v18  ;;  %v3373_v17 = vrot.slane %v3371_v42, 4  ;;  %v3322_v40 = vsel %vm7027_vm10, %v3317_v50, %v7461_v51  ;;  %v3332_v44 = vsel %vm7027_vm10, %v3327_v52, %v7465_v8  ;;  %v6010_v50 = vld [vmem:[#allocation8 + $0x218] sm:$0xff]  }
 0x2ad   : > { %v3350_v48 = vor.u32 %v3349_v53, %v7467_v29  ;;  %v3360_v32 = vrot.slane %v3358_v24, 4  ;;  %v3363_v11 = vrot.slane %v3361_v63, 5  ;;  %v3377_v6 = vshll.u32 %v7488_v25, 16 }
 0x2ae   : > { %v3346_v37 = vsel %vm7027_vm10, %v3341_v47, %v7467_v29  ;;  %v3374_v59 = vor.u32 %v3373_v17, %v7492_v39  ;;  %v3406_v51 = vshrl.u32 %v3234_v46, 16  ;;  %v3409_v53 = vshll.u32 %v3234_v46, 16  ;;  %v7514_v47 = vld [vmem:[#allocation4 + $0x74] sm:$0x1] }
 0x2af   : > { %5450 = vmatpush3.bf16.msra.mxu1 %v6002_v43  ;;  %v3355_v43 = vrot.slane %v3353_v7, 5  ;;  %v3351_v45 = vrot.slane %v3350_v48, 4  ;;  %v3415_v8 = vshll.u32 %v7494_v10, 16  ;;  %v3401_v29 = vshll.u32 %v7503_v4, 16 }
 0x2b0   : > { %5451 = vmatprep.subr.bf16.mxu1 %v6005_v16  ;;  %v4868_v24 = vcombine.low %v3322_v40, %v3332_v44  ;;  %v3375_v18 = vrot.slane %v3374_v59, 4  ;;  %v3408_v63 = vrot.slane %v3406_v51, 4  ;;  %v3411_v14 = vrot.slane %v3409_v53, 5  ;;  %v3641_v51 = vld [vmem:[#allocation4 + $0x30] sm:$0xe] }
 0x2b1   : > { %v3356_v27 = vsel %vm7027_vm10, %v3351_v45, %v3355_v43  ;;  %v3389_v48 = vrot.slane %v3388_v58, 4  ;;  %v3403_v52 = vrot.slane %v3401_v29, 5  ;;  %v3676_v44 = vrot.slane %v7407_v35, 5  ;;  %v3640_v35 = vld [vmem:[#allocation4 + $0x24] sm:$0xe] }
 0x2b2   : > { %5436 = vmatmul.mubr.bf16.gmra.mrb[12].mxu1 %v6004_v0  ;;  %v3364_v0 = vor.u32 %v3363_v11, %v3360_v32  ;;  %v4869_v13 = vcombine.low %v3346_v37, %v3356_v27  ;;  %v3412_v23 = vor.u32 %v3411_v14, %v3408_v63  ;;  %v6013_v37 = vld [vmem:[#allocation8 + $0x230] sm:$0xff]   ;;  %v3687_v59 = vrot.slane %v7417_v9, 5 }
 0x2b3   : > { %5452 = vmatpush3.bf16.msra.mxu1 %v6005_v16  ;;  %5455 = vmatprep.mubr.bf16.mxu1 %v4865_v57  ;;  %v4867_v16 = vcombine.low %v3298_v62, %v3308_v21  ;;  %v3393_v57 = vrot.slane %v3391_v22, 5  ;;  %v3379_v62 = vrot.slane %v3377_v6, 5  ;;  %v3425_v22 = vshll.u32 %v7514_v47, 16 }
 0x2b4   : > { %5453 = vmatprep.subr.bf16.mxu1 %v6006_v30  ;;  %v3365_v33 = vrot.slane %v3364_v0, 4  ;;  %v3413_v46 = vrot.slane %v3412_v23, 4  ;;  %v3680_v6 = vrot.slane %v7414_v41, 5  ;;  %v6014_v41 = vld [vmem:[#allocation8 + $0x238] sm:$0xff]   ;;  %v4883_v58 = vrot.slane %v3641_v51, 9  ;;  %v7995_v51 = vld [vmem:[#allocation33_spill] sm:$0xff] }
 0x2b5   : > { %v3398_v7 = vor.u32 %v3397_v3, %v3393_v57  ;;  %v3380_v32 = vsel %vm7027_vm10, %v3375_v18, %v3379_v62  ;;  %v3394_v11 = vsel %vm7027_vm10, %v3389_v48, %v3393_v57  ;;  %v3427_v5 = vrot.slane %v3425_v22, 5  ;;  %v3642_v18 = vld [vmem:[#allocation4 + $0x3c] sm:$0xe]  ;;  %v3643_v62 = vld [vmem:[#allocation4 + $0x48] sm:$0xe] }
 0x2b6   : > { %v3370_v43 = vsel %vm7027_vm10, %v3365_v33, %v7492_v39  ;;  %v3639_v39 = vld [vmem:[#allocation4 + $0x18] sm:$0xe]  ;;  %v3682_v61 = vrot.slane %v3680_v6, 4  ;;  %v3690_v29 = vrot.slane %v7436_v20, 5  ;;  %v3701_v20 = vrot.slane %v7445_v1, 5 }
 0x2b7   : > { %5454 = vmatpush3.bf16.msra.mxu1 %v6006_v30  ;;  %v3419_v30 = vshrl.u32 %v7494_v10, 16  ;;  %v3399_v42 = vrot.slane %v3398_v7, 4  ;;  %v4870_v45 = vcombine.low %v3370_v43, %v3380_v32  ;;  %v4881_v3 = vrot.slane %v3639_v39, 9  ;;  %v3644_v23 = vld [vmem:[#allocation4 + $0x54] sm:$0xe] }
 0x2b8   : > { %5471 = vmatprep.subr.bf16.mxu1 %v6007_v60  ;;  %v3689_v7 = vrot.slane %v3687_v59, 4  ;;  %v4885_v48 = vrot.slane %v3643_v62, 9  ;;  %v3708_v43 = vrot.slane %v7469_v55, 5  ;;  %v3718_v55 = vrot.slane %v7503_v4, 5 }
 0x2b9   : > { %v3421_v21 = vrot.slane %v3419_v30, 4  ;;  %v4882_v30 = vrot.slane %v3640_v35, 9  ;;  %v6020_v35 = vld [vmem:[#allocation11 + $0x28] sm:$0xff]  }
 0x2ba   : > { %5456 = vmatmul.mubr.bf16.vlgmr.msra.gmra.mrb[0].mxu1 %v4866_v49  ;;  %v3404_v49 = vsel %vm7027_vm10, %v3399_v42, %v3403_v52  ;;  %v3691_v33 = vsel %vm7222_vm13, %v3689_v7, %v3690_v29  ;;  %v3704_v42 = vrot.slane %v7463_v31, 5  ;;  %v3702_v32 = vsel %vm7222_vm13, %v4885_v48, %v3701_v20  ;;  %v3645_v31 = vld [vmem:[#allocation4 + $0x60] sm:$0xe] }
 0x2bb   : > { %5472 = vmatpush3.bf16.msra.mxu1 %v6007_v60  ;;  %5459 = vmatprep.mubr.bf16.mxu1 %v4867_v16  ;;  %v3417_v60 = vrot.slane %v3415_v8, 5  ;;  %v4871_v17 = vcombine.low %v3394_v11, %v3404_v49  ;;  %v3681_v9 = vsel %vm7222_vm13, %v4882_v30, %v3680_v6  ;;  %v4886_v11 = vrot.slane %v3644_v23, 9  ;;  %v6015_v6 = vld [vmem:[#allocation11] sm:$0xff]  }
 0x2bc   : > { %5473 = vmatprep.subr.bf16.mxu1 %v6008_v26  ;;  %v3710_v49 = vrot.slane %v3708_v43, 4  ;;  %v4887_v39 = vrot.slane %v3645_v31, 9  ;;  %5503 = vmatprep.subr.bf16.mxu0 %v6015_v6 }
 0x2bd   : > { %v3422_v28 = vor.u32 %v3421_v21, %v3417_v60  ;;  %v3418_v57 = vsel %vm7027_vm10, %v3413_v46, %v3417_v60  ;;  %v4884_v60 = vrot.slane %v3642_v18, 9  ;;  %5504 = vmatpush3.bf16.msra.mxu0 %v6015_v6 }
 0x2bf   : > { %5474 = vmatpush3.bf16.msra.mxu1 %v6008_v26  ;;  %v3673_v26 = vrot.slane %v7403_v56, 5  ;;  %v3423_v16 = vrot.slane %v3422_v28, 4  ;;  %v3715_v28 = vrot.slane %v7476_v12, 5  ;;  %v3722_v12 = vrot.slane %v7494_v10, 5 }
 0x2c0   : > { %5475 = vmatprep.subr.bf16.mxu1 %v6009_v2 }
 0x2c1   : > { %v3675_v40 = vrot.slane %v3673_v26, 4  ;;  %v3428_v56 = vsel %vm7027_vm10, %v3423_v16, %v3427_v5  ;;  %v3674_v27 = vsel %vm7222_vm13, %v4881_v3, %v3673_v26  ;;  %v3711_v26 = vrot.slane %v7488_v25, 5  ;;  %v3646_v5 = vld [vmem:[#allocation4 + $0x6c] sm:$0xe] }
 0x2c2   : > { %5460 = vmatmul.mubr.bf16.gmra.mrb[4].mxu1 %v4868_v24  ;;  %v4872_v53 = vcombine.low %v3418_v57, %v3428_v56  ;;  %v3716_v16 = vsel %vm7222_vm13, %v4887_v39, %v3715_v28  ;;  %v4888_v4 = vrot.slane %v3646_v5, 9 }
 0x2c3   : > { %5476 = vmatpush3.bf16.msra.mxu1 %v6009_v2  ;;  %5463 = vmatprep.mubr.bf16.mxu1 %v4869_v13  ;;  %v3677_v0 = vsel %vm7222_vm13, %v3675_v40, %v3676_v44  ;;  %v3683_v2 = vrot.slane %v7422_v34, 5  ;;  %v3694_v13 = vrot.slane %v7431_v15, 5  ;;  %v3688_v34 = vsel %vm7222_vm13, %v4883_v58, %v3687_v59  ;;  %v6022_v59 = vld [vmem:[#allocation11 + $0x38] sm:$0xff]  }
 0x2c4   : > { %5477 = vmatprep.subr.bf16.mxu1 %v6010_v50  ;;  %v4889_v8 = vcombine.low %v3674_v27, %v3677_v0  ;;  %v4891_v14 = vcombine.low %v3688_v34, %v3691_v33  ;;  %v3703_v15 = vrot.slane %v3701_v20, 4  ;;  %v3712_v46 = vsel %vm7222_vm13, %v3710_v49, %v3711_v26  ;;  %v6017_v27 = vld [vmem:[#allocation11 + $0x10] sm:$0xff]   ;;  %v6019_v0 = vld [vmem:[#allocation11 + $0x20] sm:$0xff]  }
 0x2c5   : > { %v3684_v24 = vsel %vm7222_vm13, %v3682_v61, %v3683_v2  ;;  %v3696_v21 = vrot.slane %v3694_v13, 4  ;;  %v3695_v52 = vsel %vm7222_vm13, %v4884_v60, %v3694_v13  ;;  %v3724_v40 = vrot.slane %v3722_v12, 4  ;;  %v7596_v60 = vld [vmem:[%s7892_s4] ss:$0 sm:$0xff] }
 0x2c6   : > { %v4890_v63 = vcombine.low %v3681_v9, %v3684_v24  ;;  %v3725_v44 = vrot.slane %v7514_v47, 5  ;;  %v3723_v57 = vsel %vm7222_vm13, %v4888_v4, %v3722_v12  ;;  %v6018_v47 = vld [vmem:[#allocation11 + $0x18] sm:$0xff]  }
 0x2c7   : > { %5478 = vmatpush3.bf16.msra.mxu1 %v6010_v50  ;;  %v3697_v50 = vrot.slane %v7440_v19, 5  ;;  %v3705_v19 = vsel %vm7222_vm13, %v3703_v15, %v3704_v42 }
 0x2c8   : > { %5479 = vmatprep.subr.bf16.mxu1 %v6011_v36  ;;  %v3726_v10 = vsel %vm7222_vm13, %v3724_v40, %v3725_v44 }
 0x2c9   : > { %v3698_v1 = vsel %vm7222_vm13, %v3696_v21, %v3697_v50  ;;  %v4896_v56 = vcombine.low %v3723_v57, %v3726_v10 }
 0x2ca   : > { %5464 = vmatmul.mubr.bf16.gmra.mrb[8].mxu1 %v4870_v45  ;;  %v4892_v22 = vcombine.low %v3695_v52, %v3698_v1  ;;  %v3717_v45 = vrot.slane %v3715_v28, 4 }
 0x2cb   : > { %5480 = vmatpush3.bf16.msra.mxu1 %v6011_v36  ;;  %5467 = vmatprep.mubr.bf16.mxu1 %v4871_v17  ;;  %v4893_v36 = vcombine.low %v3702_v32, %v3705_v19  ;;  %v3709_v17 = vsel %vm7222_vm13, %v4886_v11, %v3708_v43 }
 0x2cc   : > { %5481 = vmatprep.subr.bf16.mxu1 %v6012_v38  ;;  %v3719_v25 = vsel %vm7222_vm13, %v3717_v45, %v3718_v55 }
 0x2cd   : > { %v4895_v3 = vcombine.low %v3716_v16, %v3719_v25 }
 0x2cf   : > { %5482 = vmatpush3.bf16.msra.mxu1 %v6012_v38  ;;  %v4894_v38 = vcombine.low %v3709_v17, %v3712_v46 }
 0x2d0   : > { %5483 = vmatprep.subr.bf16.mxu1 %v6013_v37 }
 0x2d2   : > { %5468 = vmatmul.mubr.bf16.gmra.mrb[12].mxu1 %v4872_v53  ;;  %v7996_v53 = vld [vmem:[#allocation32_spill] sm:$0xff] }
 0x2d3   : > { %5484 = vmatpush3.bf16.msra.mxu1 %v6013_v37  ;;  %5487 = vmatprep.mubr.bf16.mxu1 %v4889_v8  ;;  %v6016_v37 = vld [vmem:[#allocation11 + $0x8] sm:$0xff]   ;;  %v7580_v8 = vcombine.low %v7996_v53, %v7995_v51 }
 0x2d4   : > { %5485 = vmatprep.subr.bf16.mxu1 %v6014_v41  ;;  %5505 = vmatprep.subr.bf16.mxu0 %v6016_v37 }
 0x2d5   : > { %5506 = vmatpush3.bf16.msra.mxu0 %v6016_v37 }
 0x2d6   : > { %5507 = vmatprep.subr.bf16.mxu0 %v6017_v27 }
 0x2d7   : > { %5486 = vmatpush3.bf16.msra.mxu1 %v6014_v41 }
 0x2d9   : > { %5508 = vmatpush3.bf16.msra.mxu0 %v6017_v27 }
 0x2da   : > { %5488 = vmatmul.mubr.bf16.vlgmr.msra.gmra.mrb[0].mxu1 %v4890_v63  ;;  %5509 = vmatprep.subr.bf16.mxu0 %v6018_v47 }
 0x2db   : > { %5491 = vmatprep.mubr.bf16.mxu1 %v4891_v14 }
 0x2dd   : > { %5510 = vmatpush3.bf16.msra.mxu0 %v6018_v47 }
 0x2de   : > { %5511 = vmatprep.subr.bf16.mxu0 %v6019_v0 }
 0x2e1   : > { %5512 = vmatpush3.bf16.msra.mxu0 %v6019_v0 }
 0x2e2   : > { %5492 = vmatmul.mubr.bf16.gmra.mrb[4].mxu1 %v4892_v22  ;;  %5513 = vmatprep.subr.bf16.mxu0 %v6020_v35 }
 0x2e3   : > { %5495 = vmatprep.mubr.bf16.mxu1 %v4893_v36 }
 0x2e5   : > { %5514 = vmatpush3.bf16.msra.mxu0 %v6020_v35 }
 0x2e6   : > { %5515 = vmatprep.subr.bf16.mxu0 %v6021_v54 }
 0x2e9   : > { %5516 = vmatpush3.bf16.msra.mxu0 %v6021_v54 }
 0x2ea   : > { %5496 = vmatmul.mubr.bf16.gmra.mrb[8].mxu1 %v4894_v38  ;;  %5517 = vmatprep.subr.bf16.mxu0 %v6022_v59 }
 0x2eb   : > { %5499 = vmatprep.mubr.bf16.mxu1 %v4895_v3 }
 0x2ed   : > { %5518 = vmatpush3.bf16.msra.mxu0 %v6022_v59 }
 0x2ee   : > { %5535 = vmatprep.subr.bf16.mxu0 %v7580_v8 }
 0x2f2   : > { %5500 = vmatmul.mubr.bf16.gmra.mrb[12].mxu1 %v4896_v56 }
 0x365   : > { %v5297_v30 = vpop.f32.mrb[20].mxu0 }
 0x366   : > { %v1924_v61 = vpop.f32.mrb[21].mxu0 }
 0x367   : > { %v5298_v2 = vpop.f32.mrb[22].mxu0 }
 0x368   : > { %v1927_v41 = vpop.f32.mrb[23].mxu0 }
 0x36d   : > { %v5301_v58 = vpop.f32.mrb[24].mxu0 }
 0x36e   : > { %v1940_v7 = vpop.f32.mrb[25].mxu0 }
 0x36f   : > { %v5302_v29 = vpop.f32.mrb[26].mxu0 }
 0x370   : > { %v1943_v9 = vpop.f32.mrb[27].mxu0 }
 0x375   : > { %v5305_v24 = vpop.f32.mrb[28].mxu0 }
 0x376   : > { %v1956_v13 = vpop.f32.mrb[29].mxu0 }
 0x377   : > { %v5306_v34 = vpop.f32.mrb[30].mxu0 }
 0x378   : > { %v7583_v33 = vpop.f32.mrb[31].mxu0 }
 0x37d   : > { %v7585_v18 = vpop.f32.mrb[32].mxu0 }
 0x37e   : > { %v7587_v20 = vpop.f32.mrb[33].mxu0 }
 0x37f   : > { %v7589_v62 = vpop.f32.mrb[34].mxu0 }
 0x380   : > { %v7591_v63 = vpop.f32.mrb[35].mxu0 }
 0x3ad   : > { %v5489_v14 = vpop.f32.mrb[0].mxu1 }
 0x3ae   : > { %v5567_v21 = vadd.f32 %v5489_v14, %v5297_v30  ;;  %v3858_v50 = vpop.f32.mrb[1].mxu1 }
 0x3af   : > { %v5568_v48 = vadd.f32 %v3858_v50, %v1924_v61  ;;  %v5490_v15 = vpop.f32.mrb[2].mxu1 }
 0x3b0   : > { %v7599_v42 = vadd.f32 %v5567_v21, %v7596_v60  ;;  %v5569_v52 = vadd.f32 %v5490_v15, %v5298_v2  ;;  %v3861_v1 = vpop.f32.mrb[3].mxu1 }
 0x3b1   : > { %v7602_v43 = vadd.f32 %v5568_v48, %v7596_v60  ;;  %v5570_v32 = vadd.f32 %v3861_v1, %v1927_v41 }
 0x3b2   : > { %v4908_v19 = vmul.f32 -1.442695, %v7599_v42  ;;  %v7606_v23 = vadd.f32 %v5569_v52, %v7596_v60 }
 0x3b3   : > { %v4906_v28 = vmul.f32 -1.442695, %v7602_v43  ;;  %v7610_v31 = vadd.f32 %v5570_v32, %v7596_v60 }
 0x3b4   : > { %6023 = vpow2.f32 %v4908_v19  ;;  %v4909_v22 = vmul.f32 -1.442695, %v7606_v23 }
 0x3b5   : > { %6025 = vpow2.f32 %v4906_v28  ;;  %v4907_v36 = vmul.f32 -1.442695, %v7610_v31  ;;  %v5493_v11 = vpop.f32.mrb[4].mxu1 }
 0x3b6   : > { %6027 = vpow2.f32 %v4909_v22  ;;  %v5571_v49 = vadd.f32 %v5493_v11, %v5301_v58  ;;  %v3874_v26 = vpop.f32.mrb[5].mxu1 }
 0x3b7   : > { %6029 = vpow2.f32 %v4907_v36  ;;  %v5572_v39 = vadd.f32 %v3874_v26, %v1940_v7  ;;  %v5494_v45 = vpop.f32.mrb[6].mxu1 }
 0x3b8   : > { %v7615_v55 = vadd.f32 %v5571_v49, %v7596_v60  ;;  %v5573_v17 = vadd.f32 %v5494_v45, %v5302_v29  ;;  %v3877_v46 = vpop.f32.mrb[7].mxu1 }
 0x3b9   : > { %v7618_v12 = vadd.f32 %v5572_v39, %v7596_v60  ;;  %v5574_v16 = vadd.f32 %v3877_v46, %v1943_v9 }
 0x3ba   : > { %v4912_v25 = vmul.f32 -1.442695, %v7615_v55  ;;  %v7622_v5 = vadd.f32 %v5573_v17, %v7596_v60 }
 0x3bb   : > { %v4910_v38 = vmul.f32 -1.442695, %v7618_v12  ;;  %v7626_v3 = vadd.f32 %v5574_v16, %v7596_v60 }
 0x3bc   : > { %6031 = vpow2.f32 %v4912_v25  ;;  %v4913_v4 = vmul.f32 -1.442695, %v7622_v5 }
 0x3bd   : > { %6033 = vpow2.f32 %v4910_v38  ;;  %v4911_v40 = vmul.f32 -1.442695, %v7626_v3  ;;  %v5497_v44 = vpop.f32.mrb[8].mxu1 }
 0x3be   : > { %v6024_v57 = vpop.eup %6023  ;;  %6035 = vpow2.f32 %v4913_v4  ;;  %v5575_v10 = vadd.f32 %v5497_v44, %v5305_v24  ;;  %v3890_v56 = vpop.f32.mrb[9].mxu1 }
 0x3bf   : > { %v6026_v6 = vpop.eup %6025  ;;  %v4010_v37 = vadd.f32 1.0, %v6024_v57  ;;  %6037 = vpow2.f32 %v4911_v40  ;;  %v5576_v27 = vadd.f32 %v3890_v56, %v1956_v13  ;;  %v5498_v47 = vpop.f32.mrb[10].mxu1 }
 0x3c0   : > { %v6028_v0 = vpop.eup %6027  ;;  %v4008_v35 = vadd.f32 1.0, %v6026_v6  ;;  %v7631_v54 = vadd.f32 %v5575_v10, %v7596_v60  ;;  %v5577_v59 = vadd.f32 %v5498_v47, %v5306_v34  ;;  %v3893_v51 = vpop.f32.mrb[11].mxu1 }
 0x3c1   : > { %v6030_v53 = vpop.eup %6029  ;;  %6039 = vrcp.f32 %v4010_v37  ;;  %v4011_v30 = vadd.f32 1.0, %v6028_v0  ;;  %v7634_v61 = vadd.f32 %v5576_v27, %v7596_v60  ;;  %v5578_v2 = vadd.f32 %v3893_v51, %v7583_v33 }
 0x3c2   : > { %6041 = vrcp.f32 %v4008_v35  ;;  %v4009_v41 = vadd.f32 1.0, %v6030_v53  ;;  %v4916_v58 = vmul.f32 -1.442695, %v7631_v54  ;;  %v7639_v7 = vadd.f32 %v5577_v59, %v7596_v60  ;;  %v7998_v59 = vld [vmem:[#allocation34_spill] sm:$0xff] }
 0x3c3   : > { %6043 = vrcp.f32 %v4011_v30  ;;  %v4914_v29 = vmul.f32 -1.442695, %v7634_v61  ;;  %v7643_v9 = vadd.f32 %v5578_v2, %v7596_v60 }
 0x3c4   : > { %6045 = vrcp.f32 %v4009_v41  ;;  %v4917_v24 = vmul.f32 -1.442695, %v7639_v7 }
 0x3c5   : > { %6047 = vpow2.f32 %v4916_v58  ;;  %v4915_v13 = vmul.f32 -1.442695, %v7643_v9  ;;  %v5501_v34 = vpop.f32.mrb[12].mxu1  ;;  %v7999_v58 = vld [vmem:[#allocation37_spill] sm:$0xff] }
 0x3c6   : > { %v6032_v33 = vpop.eup %6031  ;;  %6049 = vpow2.f32 %v4914_v29  ;;  %v5579_v14 = vadd.f32 %v5501_v34, %v7585_v18  ;;  %v3906_v21 = vpop.f32.mrb[13].mxu1  ;;  %v8000_v29 = vld [vmem:[#allocation36_spill] sm:$0xff] }
 0x3c7   : > { %v6034_v50 = vpop.eup %6033  ;;  %v4014_v48 = vadd.f32 1.0, %v6032_v33  ;;  %6051 = vpow2.f32 %v4917_v24  ;;  %v5580_v15 = vadd.f32 %v3906_v21, %v7587_v20  ;;  %v5502_v52 = vpop.f32.mrb[14].mxu1  ;;  %v4932_v24 = vcombine.low %v8000_v29, %v7999_v58  ;;  %v8026_v29 = vld [vmem:[#allocation61_spill] sm:$0xff] }
 0x3c8   : > { %v6036_v1 = vpop.eup %6035  ;;  %v4012_v32 = vadd.f32 1.0, %v6034_v50  ;;  %6053 = vpow2.f32 %v4915_v13  ;;  %v7650_v19 = vadd.f32 %v5579_v14, %v7596_v60  ;;  %v5581_v28 = vadd.f32 %v5502_v52, %v7589_v62  ;;  %v3909_v22 = vpop.f32.mrb[15].mxu1 }
 0x3c9   : > { %v6038_v36 = vpop.eup %6037  ;;  %6055 = vrcp.f32 %v4014_v48  ;;  %v4015_v11 = vadd.f32 1.0, %v6036_v1  ;;  %v7654_v18 = vadd.f32 %v5580_v15, %v7596_v60  ;;  %v5582_v49 = vadd.f32 %v3909_v22, %v7591_v63  ;;  %v8002_v1 = vld [vmem:[#allocation38_spill] sm:$0xff] }
 0x3ca   : > { %6057 = vrcp.f32 %v4012_v32  ;;  %v4013_v20 = vadd.f32 1.0, %v6038_v36  ;;  %v4920_v26 = vmul.f32 -1.442695, %v7650_v19  ;;  %v7659_v39 = vadd.f32 %v5581_v28, %v7596_v60  ;;  %v8003_v36 = vld [vmem:[#allocation41_spill] sm:$0xff] }
 0x3cb   : > { %v6040_v45 = vpop.eup %6039  ;;  %6059 = vrcp.f32 %v4015_v11  ;;  %v4918_v62 = vmul.f32 -1.442695, %v7654_v18  ;;  %v7663_v17 = vadd.f32 %v5582_v49, %v7596_v60  ;;  %v8004_v11 = vld [vmem:[#allocation40_spill] sm:$0xff] }
 0x3cc   : > { %v6042_v46 = vpop.eup %6041  ;;  %6061 = vrcp.f32 %v4013_v20  ;;  %v4921_v16 = vmul.f32 -1.442695, %v7659_v39  ;;  %v4058_v4 = vmul.f32 %v6040_v45, %v7599_v42  ;;  %v7997_v42 = vld [vmem:[#allocation35_spill] sm:$0xff]  ;;  %v4934_v49 = vcombine.low %v8004_v11, %v8003_v36 }
 0x3cd   : > { %v6044_v25 = vpop.eup %6043  ;;  %6063 = vpow2.f32 %v4920_v26  ;;  %v4919_v63 = vmul.f32 -1.442695, %v7663_v17  ;;  %v4056_v57 = vmul.f32 %v6042_v46, %v7602_v43 }
 0x3ce   : > { %v6046_v38 = vpop.eup %6045  ;;  %v4059_v40 = vmul.f32 %v6044_v25, %v7606_v23  ;;  %6065 = vpow2.f32 %v4918_v62  ;;  %v4931_v23 = vcombine.low %v7998_v59, %v7997_v42  ;;  %v8014_v59 = vld [vmem:[#allocation53_spill] sm:$0xff] }
 0x3cf   : > { %v6048_v44 = vpop.eup %6047  ;;  %v4057_v60 = vmul.f32 %v6046_v38, %v7610_v31  ;;  %6067 = vpow2.f32 %v4921_v16  ;;  %v8006_v38 = vld [vmem:[#allocation42_spill] sm:$0xff] }
 0x3d0   : > { %v6050_v10 = vpop.eup %6049  ;;  %v4073_v56 = vpack.c.bf16 %v4059_v40, %v4058_v4  ;;  %v4018_v6 = vadd.f32 1.0, %v6048_v44  ;;  %6069 = vpow2.f32 %v4919_v63  ;;  %v8005_v63 = vld [vmem:[#allocation43_spill] sm:$0xff] }
 0x3d1   : > { %v6052_v37 = vpop.eup %6051  ;;  %v4016_v27 = vadd.f32 1.0, %v6050_v10  ;;  %v4072_v47 = vpack.c.bf16 %v4057_v60, %v4056_v57  ;;  %v4935_v4 = vcombine.low %v8006_v38, %v8005_v63  ;;  %v8008_v60 = vld [vmem:[#allocation44_spill] sm:$0xff] }
 0x3d2   : > { %v6054_v0 = vpop.eup %6053  ;;  %6071 = vrcp.f32 %v4018_v6  ;;  %v4019_v35 = vadd.f32 1.0, %v6052_v37 }
 0x3d3   : > { %v6056_v51 = vpop.eup %6055  ;;  %6073 = vrcp.f32 %v4016_v27  ;;  %v4017_v53 = vadd.f32 1.0, %v6054_v0  ;;  %5519 = vmatprep.mubr.bf16.mxu0 %v4072_v47  ;;  %v8009_v47 = vld [vmem:[#allocation47_spill] sm:$0xff]  ;;  %v8010_v0 = vld [vmem:[#allocation46_spill] sm:$0xff] }
 0x3d4   : > { %v6058_v43 = vpop.eup %6057  ;;  %6075 = vrcp.f32 %v4019_v35  ;;  %5520 = vmatmul.mubr.bf16.vlgmr.msra.gmra.mrb[36].mxu0 %v4073_v56  ;;  %v4062_v2 = vmul.f32 %v6056_v51, %v7615_v55  ;;  %v4937_v35 = vcombine.low %v8010_v0, %v8009_v47  ;;  %v8018_v51 = vld [vmem:[#allocation50_spill] sm:$0xff] }
 0x3d5   : > { %v6060_v31 = vpop.eup %6059  ;;  %6077 = vrcp.f32 %v4017_v53  ;;  %5536 = vmatpush3.bf16.msra.mxu0 %v7580_v8  ;;  %v4060_v34 = vmul.f32 %v6058_v43, %v7618_v12  ;;  %v8020_v43 = vld [vmem:[#allocation57_spill] sm:$0xff] }
 0x3d6   : > { %v6062_v30 = vpop.eup %6061  ;;  %v4063_v41 = vmul.f32 %v6060_v31, %v7622_v5  ;;  %5537 = vmatprep.subr.bf16.mxu0 %v4931_v23  ;;  %v8001_v5 = vld [vmem:[#allocation39_spill] sm:$0xff] }
 0x3d7   : > { %v6064_v13 = vpop.eup %6063  ;;  %v4061_v33 = vmul.f32 %v6062_v30, %v7626_v3  ;;  %v4933_v32 = vcombine.low %v8002_v1, %v8001_v5  ;;  %v8021_v31 = vld [vmem:[#allocation55_spill] sm:$0xff] }
 0x3d8   : > { %v6066_v14 = vpop.eup %6065  ;;  %v4022_v21 = vadd.f32 1.0, %v6064_v13  ;;  %v4075_v50 = vpack.c.bf16 %v4063_v41, %v4062_v2  ;;  %v8022_v30 = vpack.c.bf16 %v8020_v43, %v8021_v31  ;;  %v8023_v2 = vld [vmem:[#allocation56_spill] sm:$0xff]  ;;  %v8024_v41 = vld [vmem:[#allocation54_spill] sm:$0xff] }
 0x3d9   : > { %v6068_v48 = vpop.eup %6067  ;;  %v4020_v15 = vadd.f32 1.0, %v6066_v14  ;;  %5538 = vmatpush3.bf16.msra.mxu0 %v4931_v23  ;;  %v4074_v8 = vpack.c.bf16 %v4061_v33, %v4060_v34  ;;  %v8025_v58 = vpack.c.bf16 %v8023_v2, %v8024_v41  ;;  %v8029_v34 = vld [vmem:[#allocation60_spill] sm:$0xff]  ;;  %v8030_v33 = vld [vmem:[#allocation58_spill] sm:$0xff] }
 0x3da   : > { %v6070_v52 = vpop.eup %6069  ;;  %6079 = vrcp.f32 %v4022_v21  ;;  %v4023_v55 = vadd.f32 1.0, %v6068_v48  ;;  %5539 = vmatprep.subr.bf16.mxu0 %v4932_v24  ;;  %v8031_v14 = vpack.c.bf16 %v8029_v34, %v8030_v33  ;;  %v8032_v21 = vld [vmem:[#allocation63_spill] sm:$0xff] }
 0x3db   : > { %6081 = vrcp.f32 %v4020_v15  ;;  %v4021_v28 = vadd.f32 1.0, %v6070_v52  ;;  %5523 = vmatprep.mubr.bf16.mxu0 %v4074_v8  ;;  %v7725_v15 = vld [vmem:[%s7895_s7] ss:$0 sm:$0xff] }
 0x3dc   : > { %v6072_v12 = vpop.eup %6071  ;;  %6083 = vrcp.f32 %v4023_v55  ;;  %5524 = vmatmul.mubr.bf16.gmra.mrb[40].mxu0 %v4075_v50  ;;  %v8033_v50 = vld [vmem:[#allocation62_spill] sm:$0xff] }
 0x3dd   : > { %v6074_v3 = vpop.eup %6073  ;;  %6085 = vrcp.f32 %v4021_v28  ;;  %5540 = vmatpush3.bf16.msra.mxu0 %v4932_v24  ;;  %v4066_v26 = vmul.f32 %v6072_v12, %v7631_v54  ;;  %v8027_v24 = vld [vmem:[#allocation59_spill] sm:$0xff]  ;;  %v8034_v48 = vpack.c.bf16 %v8032_v21, %v8033_v50 }
 0x3de   : > { %v6076_v22 = vpop.eup %6075  ;;  %5541 = vmatprep.subr.bf16.mxu0 %v4933_v32  ;;  %v4064_v62 = vmul.f32 %v6074_v3, %v7634_v61  ;;  %v8028_v13 = vpack.c.bf16 %v8026_v29, %v8027_v24 }
 0x3df   : > { %v6078_v20 = vpop.eup %6077  ;;  %v4067_v45 = vmul.f32 %v6076_v22, %v7639_v7 }
 0x3e0   : > { %v4065_v46 = vmul.f32 %v6078_v20, %v7643_v9  ;;  %v8007_v9 = vld [vmem:[#allocation45_spill] sm:$0xff] }
 0x3e1   : > { %5542 = vmatpush3.bf16.msra.mxu0 %v4933_v32  ;;  %v4077_v16 = vpack.c.bf16 %v4067_v45, %v4066_v26  ;;  %v4936_v10 = vcombine.low %v8008_v60, %v8007_v9 }
 0x3e2   : > { %v4076_v25 = vpack.c.bf16 %v4065_v46, %v4064_v62  ;;  %5543 = vmatprep.subr.bf16.mxu0 %v4934_v49 }
 0x3e4   : > { %v6080_v40 = vpop.eup %6079  ;;  %5527 = vmatprep.mubr.bf16.mxu0 %v4076_v25 }
 0x3e5   : > { %v6082_v44 = vpop.eup %6081  ;;  %5528 = vmatmul.mubr.bf16.gmra.mrb[44].mxu0 %v4077_v16  ;;  %v4070_v7 = vmul.f32 %v6080_v40, %v7650_v19  ;;  %v8011_v19 = vld [vmem:[#allocation49_spill] sm:$0xff] }
 0x3e6   : > { %v6084_v57 = vpop.eup %6083  ;;  %5544 = vmatpush3.bf16.msra.mxu0 %v4934_v49  ;;  %v4068_v56 = vmul.f32 %v6082_v44, %v7654_v18  ;;  %v8015_v18 = vld [vmem:[#allocation51_spill] sm:$0xff] }
 0x3e7   : > { %v6086_v54 = vpop.eup %6085  ;;  %v4071_v61 = vmul.f32 %v6084_v57, %v7659_v39  ;;  %5545 = vmatprep.subr.bf16.mxu0 %v4935_v4  ;;  %v8012_v39 = vld [vmem:[#allocation48_spill] sm:$0xff]  ;;  %v8016_v23 = vpack.c.bf16 %v8014_v59, %v8015_v18 }
 0x3e8   : > { %v4069_v6 = vmul.f32 %v6086_v54, %v7663_v17  ;;  %v8013_v42 = vpack.c.bf16 %v8011_v19, %v8012_v39  ;;  %v8017_v17 = vld [vmem:[#allocation52_spill] sm:$0xff] }
 0x3e9   : > { %v4079_v37 = vpack.c.bf16 %v4071_v61, %v4070_v7  ;;  %v8019_v53 = vpack.c.bf16 %v8017_v17, %v8018_v51 }
 0x3ea   : > { %5546 = vmatpush3.bf16.msra.mxu0 %v4935_v4  ;;  %v4078_v27 = vpack.c.bf16 %v4069_v6, %v4068_v56 }
 0x3eb   : > { %5547 = vmatprep.subr.bf16.mxu0 %v4936_v10 }
 0x3ec   : > { %5531 = vmatprep.mubr.bf16.mxu0 %v4078_v27 }
 0x3ed   : > { %5532 = vmatmul.mubr.bf16.gmra.mrb[48].mxu0 %v4079_v37 }
 0x3ee   : > { %5548 = vmatpush3.bf16.msra.mxu0 %v4936_v10  ;;  %5551 = vmatprep.mubr.bf16.mxu0 %v8013_v42 }
 0x3ef   : > { %5549 = vmatprep.subr.bf16.mxu0 %v4937_v35 }
 0x3f2   : > { %5550 = vmatpush3.bf16.msra.mxu0 %v4937_v35 }
 0x3f5   : > { %5552 = vmatmul.mubr.bf16.vlgmr.msra.gmra.mrb[36].mxu0 %v8016_v23 }
 0x3f6   : > { %5555 = vmatprep.mubr.bf16.mxu0 %v8019_v53 }
 0x3fd   : > { %5556 = vmatmul.mubr.bf16.gmra.mrb[40].mxu0 %v8022_v30 }
 0x3fe   : > { %5559 = vmatprep.mubr.bf16.mxu0 %v8025_v58 }
 0x405   : > { %5560 = vmatmul.mubr.bf16.gmra.mrb[44].mxu0 %v8028_v13 }
 0x406   : > { %5563 = vmatprep.mubr.bf16.mxu0 %v8031_v14 }
 0x40d   : > { %5564 = vmatmul.mubr.bf16.gmra.mrb[48].mxu0 %v8034_v48 }
 0x4c8   : > { %v5553_v8 = vpop.f32.mrb[36].mxu0 }
 0x4c9   : > { %v7728_v52 = vadd.f32 %v5553_v8, %v7725_v15  ;;  %v4323_v55 = vpop.f32.mrb[37].mxu0 }
 0x4ca   : > { %v7731_v5 = vadd.f32 %v7725_v15, %v4323_v55  ;;  %v5554_v1 = vpop.f32.mrb[38].mxu0 }
 0x4cb   : > { %v4941_v32 = vmul.f32 -1.442695, %v7728_v52  ;;  %v7735_v28 = vadd.f32 %v5554_v1, %v7725_v15  ;;  %v4326_v12 = vpop.f32.mrb[39].mxu0 }
 0x4cc   : > { %v4939_v3 = vmul.f32 -1.442695, %v7731_v5  ;;  %v7739_v22 = vadd.f32 %v7725_v15, %v4326_v12 }
 0x4cd   : > { %6087 = vpow2.f32 %v4941_v32  ;;  %v4942_v36 = vmul.f32 -1.442695, %v7735_v28 }
 0x4ce   : > { %6089 = vpow2.f32 %v4939_v3  ;;  %v4940_v11 = vmul.f32 -1.442695, %v7739_v22 }
 0x4cf   : > { %6091 = vpow2.f32 %v4942_v36 }
 0x4d0   : > { %6093 = vpow2.f32 %v4940_v11  ;;  %v5557_v49 = vpop.f32.mrb[40].mxu0 }
 0x4d1   : > { %v7744_v20 = vadd.f32 %v5557_v49, %v7725_v15  ;;  %v4339_v26 = vpop.f32.mrb[41].mxu0 }
 0x4d2   : > { %v7747_v45 = vadd.f32 %v7725_v15, %v4339_v26  ;;  %v5558_v62 = vpop.f32.mrb[42].mxu0 }
 0x4d3   : > { %v4945_v46 = vmul.f32 -1.442695, %v7744_v20  ;;  %v7751_v16 = vadd.f32 %v5558_v62, %v7725_v15  ;;  %v4342_v25 = vpop.f32.mrb[43].mxu0 }
 0x4d4   : > { %v4943_v63 = vmul.f32 -1.442695, %v7747_v45  ;;  %v7755_v38 = vadd.f32 %v7725_v15, %v4342_v25 }
 0x4d5   : > { %6095 = vpow2.f32 %v4945_v46  ;;  %v4946_v4 = vmul.f32 -1.442695, %v7751_v16 }
 0x4d6   : > { %6097 = vpow2.f32 %v4943_v63  ;;  %v4944_v40 = vmul.f32 -1.442695, %v7755_v38 }
 0x4d7   : > { %v6088_v44 = vpop.eup %6087  ;;  %6099 = vpow2.f32 %v4946_v4 }
 0x4d8   : > { %v6090_v57 = vpop.eup %6089  ;;  %v4459_v54 = vadd.f32 1.0, %v6088_v44  ;;  %6101 = vpow2.f32 %v4944_v40  ;;  %v5561_v7 = vpop.f32.mrb[44].mxu0 }
 0x4d9   : > { %v6092_v61 = vpop.eup %6091  ;;  %v4457_v9 = vadd.f32 1.0, %v6090_v57  ;;  %v7760_v60 = vadd.f32 %v5561_v7, %v7725_v15  ;;  %v4355_v10 = vpop.f32.mrb[45].mxu0 }
 0x4da   : > { %v6094_v56 = vpop.eup %6093  ;;  %6103 = vrcp.f32 %v4459_v54  ;;  %v4460_v6 = vadd.f32 1.0, %v6092_v61  ;;  %v7763_v37 = vadd.f32 %v7725_v15, %v4355_v10  ;;  %v5562_v27 = vpop.f32.mrb[46].mxu0 }
 0x4db   : > { %6105 = vrcp.f32 %v4457_v9  ;;  %v4458_v47 = vadd.f32 1.0, %v6094_v56  ;;  %v4949_v0 = vmul.f32 -1.442695, %v7760_v60  ;;  %v7767_v35 = vadd.f32 %v5562_v27, %v7725_v15  ;;  %v4358_v19 = vpop.f32.mrb[47].mxu0 }
 0x4dc   : > { %6107 = vrcp.f32 %v4460_v6  ;;  %v4947_v39 = vmul.f32 -1.442695, %v7763_v37  ;;  %v7771_v42 = vadd.f32 %v7725_v15, %v4358_v19 }
 0x4dd   : > { %6109 = vrcp.f32 %v4458_v47  ;;  %v4950_v59 = vmul.f32 -1.442695, %v7767_v35 }
 0x4de   : > { %6111 = vpow2.f32 %v4949_v0  ;;  %v4948_v18 = vmul.f32 -1.442695, %v7771_v42 }
 0x4df   : > { %v6096_v23 = vpop.eup %6095  ;;  %6113 = vpow2.f32 %v4947_v39 }
 0x4e0   : > { %v6098_v17 = vpop.eup %6097  ;;  %v4463_v51 = vadd.f32 1.0, %v6096_v23  ;;  %6115 = vpow2.f32 %v4950_v59  ;;  %v5565_v53 = vpop.f32.mrb[48].mxu0 }
 0x4e1   : > { %v6100_v43 = vpop.eup %6099  ;;  %v4461_v31 = vadd.f32 1.0, %v6098_v17  ;;  %6117 = vpow2.f32 %v4948_v18  ;;  %v7776_v30 = vadd.f32 %v5565_v53, %v7725_v15  ;;  %v4371_v2 = vpop.f32.mrb[49].mxu0 }
 0x4e2   : > { %v6102_v41 = vpop.eup %6101  ;;  %6119 = vrcp.f32 %v4463_v51  ;;  %v4464_v58 = vadd.f32 1.0, %v6100_v43  ;;  %v7779_v29 = vadd.f32 %v7725_v15, %v4371_v2  ;;  %v5566_v24 = vpop.f32.mrb[50].mxu0 }
 0x4e3   : > { %6121 = vrcp.f32 %v4461_v31  ;;  %v4462_v13 = vadd.f32 1.0, %v6102_v41  ;;  %v4953_v34 = vmul.f32 -1.442695, %v7776_v30  ;;  %v7783_v33 = vadd.f32 %v5566_v24, %v7725_v15  ;;  %v4374_v14 = vpop.f32.mrb[51].mxu0 }
 0x4e4   : > { %v6104_v21 = vpop.eup %6103  ;;  %6123 = vrcp.f32 %v4464_v58  ;;  %v4951_v50 = vmul.f32 -1.442695, %v7779_v29  ;;  %v7787_v48 = vadd.f32 %v7725_v15, %v4374_v14 }
 0x4e5   : > { %v6106_v8 = vpop.eup %6105  ;;  %v4507_v55 = vmul.f32 %v6104_v21, %v7728_v52  ;;  %6125 = vrcp.f32 %v4462_v13  ;;  %v4954_v1 = vmul.f32 -1.442695, %v7783_v33 }
 0x4e6   : > { %v6108_v32 = vpop.eup %6107  ;;  %v4505_v12 = vmul.f32 %v6106_v8, %v7731_v5  ;;  %6127 = vpow2.f32 %v4953_v34  ;;  %v4952_v3 = vmul.f32 -1.442695, %v7787_v48 }
 0x4e7   : > { %v6110_v36 = vpop.eup %6109  ;;  %4523 = vst [vmem:[%s6677_s15 + $0x10] sm:$0xff] %v4507_v55  ;;  %v4508_v11 = vmul.f32 %v6108_v32, %v7735_v28  ;;  %6129 = vpow2.f32 %v4951_v50 }
 0x4e8   : > { %v6112_v15 = vpop.eup %6111  ;;  %4521 = vst [vmem:[%s6677_s15] sm:$0xff] %v4505_v12  ;;  %v4506_v52 = vmul.f32 %v6110_v36, %v7739_v22  ;;  %6131 = vpow2.f32 %v4954_v1 }
 0x4e9   : > { %v6114_v49 = vpop.eup %6113  ;;  %4524 = vst [vmem:[%s6677_s15 + $0x18] sm:$0xff] %v4508_v11  ;;  %v4467_v26 = vadd.f32 1.0, %v6112_v15  ;;  %6133 = vpow2.f32 %v4952_v3 }
 0x4ea   : > { %v6116_v62 = vpop.eup %6115  ;;  %4522 = vst [vmem:[%s6677_s15 + $0x8] sm:$0xff] %v4506_v52  ;;  %v4465_v5 = vadd.f32 1.0, %v6114_v49 }
 0x4eb   : > { %v6118_v46 = vpop.eup %6117  ;;  %6135 = vrcp.f32 %v4467_v26  ;;  %v4468_v25 = vadd.f32 1.0, %v6116_v62 }
 0x4ec   : > { %v6120_v63 = vpop.eup %6119  ;;  %6137 = vrcp.f32 %v4465_v5  ;;  %v4466_v28 = vadd.f32 1.0, %v6118_v46 }
 0x4ed   : > { %v6122_v4 = vpop.eup %6121  ;;  %v4511_v22 = vmul.f32 %v6120_v63, %v7744_v20  ;;  %6139 = vrcp.f32 %v4468_v25 }
 0x4ee   : > { %v6124_v40 = vpop.eup %6123  ;;  %v4509_v44 = vmul.f32 %v6122_v4, %v7747_v45  ;;  %6141 = vrcp.f32 %v4466_v28 }
 0x4ef   : > { %v6126_v57 = vpop.eup %6125  ;;  %4527 = vst [vmem:[%s6677_s15 + $0x30] sm:$0xff] %v4511_v22  ;;  %v4512_v54 = vmul.f32 %v6124_v40, %v7751_v16 }
 0x4f0   : > { %v6128_v7 = vpop.eup %6127  ;;  %4525 = vst [vmem:[%s6677_s15 + $0x20] sm:$0xff] %v4509_v44  ;;  %v4510_v61 = vmul.f32 %v6126_v57, %v7755_v38 }
 0x4f1   : > { %v6130_v9 = vpop.eup %6129  ;;  %4528 = vst [vmem:[%s6677_s15 + $0x38] sm:$0xff] %v4512_v54  ;;  %v4471_v10 = vadd.f32 1.0, %v6128_v7 }
 0x4f2   : > { %v6132_v56 = vpop.eup %6131  ;;  %4526 = vst [vmem:[%s6677_s15 + $0x28] sm:$0xff] %v4510_v61  ;;  %v4469_v20 = vadd.f32 1.0, %v6130_v9 }
 0x4f3   : > { %v6134_v6 = vpop.eup %6133  ;;  %6143 = vrcp.f32 %v4471_v10  ;;  %v4472_v45 = vadd.f32 1.0, %v6132_v56 }
 0x4f4   : > { %6145 = vrcp.f32 %v4469_v20  ;;  %v4470_v16 = vadd.f32 1.0, %v6134_v6 }
 0x4f5   : > { %v6136_v27 = vpop.eup %6135  ;;  %6147 = vrcp.f32 %v4472_v45 }
 0x4f6   : > { %v6138_v38 = vpop.eup %6137  ;;  %v4515_v47 = vmul.f32 %v6136_v27, %v7760_v60  ;;  %6149 = vrcp.f32 %v4470_v16 }
 0x4f7   : > { %v6140_v0 = vpop.eup %6139  ;;  %v4513_v19 = vmul.f32 %v6138_v38, %v7763_v37 }
 0x4f8   : > { %v6142_v39 = vpop.eup %6141  ;;  %4531 = vst [vmem:[%s6677_s15 + $0x50] sm:$0xff] %v4515_v47  ;;  %v4516_v59 = vmul.f32 %v6140_v0, %v7767_v35 }
 0x4f9   : > { %4529 = vst [vmem:[%s6677_s15 + $0x40] sm:$0xff] %v4513_v19  ;;  %v4514_v18 = vmul.f32 %v6142_v39, %v7771_v42 }
 0x4fa   : > { %4532 = vst [vmem:[%s6677_s15 + $0x58] sm:$0xff] %v4516_v59 }
 0x4fb   : > { %4530 = vst [vmem:[%s6677_s15 + $0x48] sm:$0xff] %v4514_v18 }
 0x4fd   : > { %v6144_v60 = vpop.eup %6143 }
 0x4fe   : > { %v6146_v37 = vpop.eup %6145  ;;  %v4519_v23 = vmul.f32 %v6144_v60, %v7776_v30 }
 0x4ff   : > { %v6148_v17 = vpop.eup %6147  ;;  %v4517_v35 = vmul.f32 %v6146_v37, %v7779_v29 }
 0x500   : > { %v6150_v51 = vpop.eup %6149  ;;  %4535 = vst [vmem:[%s6677_s15 + $0x70] sm:$0xff] %v4519_v23  ;;  %v4520_v42 = vmul.f32 %v6148_v17, %v7783_v33 }
 0x501   : > { %4533 = vst [vmem:[%s6677_s15 + $0x60] sm:$0xff] %v4517_v35  ;;  %v4518_v53 = vmul.f32 %v6150_v51, %v7787_v48 }
 0x502   : > { %4536 = vst [vmem:[%s6677_s15 + $0x78] sm:$0xff] %v4520_v42 }
 0x503   : > { %4534 = vst [vmem:[%s6677_s15 + $0x68] sm:$0xff] %v4518_v53 }
 0x504   : > { %6303 = shalt.err (!%p6300_p6)
}
 0x505   : > { %s6304_s23 = scalar_lea.hbm %s7826_s26, 2048  ;;  %s6308_s24 = scalar_lea.hbm %s7896_s8, 8192 }
 0x506   : > { %p6305_p7 = scmp.ne.s32.totalorder %s7826_s26, %s6304_s23  ;;  %p6309_p13 = scmp.lt.u32.totalorder %s7826_s26, %s7896_s8 }
 0x507   : > { %p6310_p3 = scmp.lt.u32.totalorder %s6308_s24, %s6304_s23  ;;  %p6312_p0 = scmp.lt.u32.totalorder %s6304_s23, %s7826_s26 }
 0x508   : > { %p6306_p9 = pnand %p6305_p7, %p8035_p8 }
 0x509   : > { %p6311_p2 = por %p6310_p3, %p6309_p13 }
 0x50a   : > { %p6307_p11 = pneg %p6306_p9 }
 0x50b   : > { %p6313_p10 = por %p6312_p0, %p6311_p2 }
 0x50d   : > { %p6314_p12 = pnand %p6313_p10, %p6307_p11 }
 0x50f   : > { %6317 = shalt.err (!%p6314_p12)
}
 0x510   : > { %s6411_s12 = smov 128   ;;  %s6412_s20 = smov 8  }
 0x511   : > { %5727 = dma.vmem_to_hbm [thread:$0]  (%p8035_p8), %s7828_s11, 2048, %s7826_s26, %s7836_s18, %s6411_s12, %s6411_s12, %s6412_s20  }
 0x512 PF: > { %s8036_s22 = sld [smem:[#allocation27_spill]]  ;;  %s8037_s13 = sld [smem:[#allocation23_spill]] }
 0x513   : > { %s8038_s21 = sld [smem:[#allocation30_spill]] }
 0x518   : > { %p5754_p1 = scmp.ge.s32.totalorder %s8036_s22, 2  ;;  %s4569_s30 = sand.u32 1, %s8037_s13  }
 0x519   : > { %p8039_p4 = scmp.ne.s32.totalorder %s8038_s21, 0  ;;  %s4570_s9 = scalar_lea.sflag [#allocation7], %s4569_s30 }
 0x51b   : > { %p5743_p5 = pnand %p5754_p1, %p8039_p4 }
 0x51d   : > { %6365 = dma.done.wait (!%p5743_p5), %s4570_s9, 2048  }
 0x51e   : > { %6367 = vsyncadd (!%p5743_p5), %s4570_s9, 4294965248  ;;  %s24_s12 = sadd.s32 1, %s8036_s22   ;;  %s8040_s14 = sld [smem:[#allocation24_spill]] }
 0x51f   : > { %p21_p6 = scmp.ge.s32.totalorder %s24_s12, 6   ;;  %s8041_s29 = sld [smem:[#allocation31_spill]] }
 0x520   : > { %s8042_s30 = sld [smem:[#allocation25_spill]]  ;;  %s8043_s9 = sld [smem:[#allocation26_spill]] }
 0x521   : > { %s8044_s10 = sld [smem:[#allocation28_spill]]  ;;  %s8045_s11 = sld [smem:[#allocation29_spill]] }
 0x522   : > { %s8046_s27 = smov %s6374_s28  ;;  %23 = sbr.rel (!%p21_p6) target bundleno = 8 (0x8), region = 121 }
 0x524   : > { %s8047_s28 = smov %s8040_s14 }
 0x529   :  { %4575 = vsyncpa [#allocation6], 1 }
 0x52a   :  { %4577 = vsyncpa [#allocation6 + $0x1], 1 }
 0x52b   :  { %4578 = vsyncpa [#allocation9], 1 }
 0x52c   :  { %4579 = vsyncpa [#allocation12], 1 }
 0x52d   :  { %4580 = vsyncpa [#allocation7], 1 }
 0x52e   :  { %4582 = vsyncpa [#allocation7 + $0x1], 1 }
 0x52f   :  { %4583 = vsyncmov [#allocation3] }
 0x532   :  { %s4584_s19 = vpop.sfrf %4583 }
 0x533   :  { %p4962_p8 = scmp.ne.s32.totalorder %s4584_s19, 0 }
 0x535   :  { %4588 = shalt.err (%p4962_p8)  }

</bundles_post_ra>
